<compile_context>
chip_gen: v7x
topology: tpu7x:2x2x1
jax: 0.10.0
libtpu: 0.0.40
codegen_flags: <defaults>
</compile_context>

<pallas_src>
import functools
import math

import jax
import jax.numpy as jnp
from jax.experimental import pallas as pl
from jax.experimental.pallas import tpu as pltpu

HIDDEN = 32
NUM_CLASSES = 4
EHR_INPUT = 76
EHR_PAD = 128      # pooled-EHR K dim padded to one aligned MXU K tile
CXR_POOL = 3
CXR_PAD = 8        # pooled-CXR K dim padded to a full sublane
OUT_W = 512        # lane-dense output slab width (4 x 128 segments)


# ----------------------------------------------------------------------------
# Fused forward kernel.
# ----------------------------------------------------------------------------
def _drfuse_kernel(
    ehr_ref, cxr_ref, pairs_ref,
    w_ehr_ref, w_stem_ref, w_cxr_ref,
    w_sp1_ref, w_sp2_ref, w_sp3_ref,
    w_heads_ref, w_unc1_ref, w_unc2_ref, w_attn_ref,
    rep_ref, s_red_ref, s_exp_ref, w_final_ref,
    b_ref,
    out_ref,
    *, hidden, num_classes, boffs,
):
    H = hidden
    C = num_classes
    KW = C * H                      # 128 (k block width per modality)
    f32 = jnp.float32
    bf16 = jnp.bfloat16

    def bseg(name):
        off, n = boffs[name]
        return b_ref[:, off:off + n]

    def mm(x, w_ref, bname=None, act=None):
        # bf16 MXU matmul with f32 accumulation; bias add / activation in f32.
        y = jnp.dot(x.astype(bf16), w_ref[...], preferred_element_type=f32)
        if bname is not None:
            y = y + bseg(bname)
        if act == "relu":
            y = jnp.maximum(y, 0.0)
        elif act == "sigmoid":
            y = jax.nn.sigmoid(y)
        return y

    paired = pairs_ref[...]                                          # (B, 1)

    # ---- EHR branch: 4 feature heads in one 128 -> 4H matmul ----------------
    ehr_out = mm(ehr_ref[...], w_ehr_ref, "ehr")                     # (B, 4H)
    fts_raw = ehr_out[:, 0:H]          # trend shared (pre-projection)
    ftd = ehr_out[:, H:2 * H]          # trend distinct
    fss_raw = ehr_out[:, 2 * H:3 * H]  # seasonal shared (pre-projection)
    fsd = ehr_out[:, 3 * H:4 * H]      # seasonal distinct

    # ---- CXR branch stand-in: stem MLP + both heads in one matmul -----------
    stem = mm(cxr_ref[...], w_stem_ref, "stem", act="relu")          # (B, 2048)
    cxr_heads = mm(stem, w_cxr_ref, "cxr")                           # (B, 2H)
    fcs_raw = cxr_heads[:, 0:H]        # cxr shared (pre-projection)
    fcd = cxr_heads[:, H:2 * H]        # cxr distinct

    # ---- shared_project (single weights, applied per shared feature) --------
    def shared_project(f):
        h = mm(f, w_sp1_ref, "sp1", act="relu")                      # (B, 2H)
        h = mm(h, w_sp2_ref, "sp2", act="relu")                      # (B, H)
        return mm(h, w_sp3_ref, "sp3")                               # (B, H)

    h0 = shared_project(fts_raw)
    h1 = shared_project(fss_raw)
    h2 = shared_project(fcs_raw)

    # ---- logsumexp modality pooling (max-stabilised) -------------------------
    s = h0 + h1 + h2
    m1 = jnp.maximum(jnp.maximum(s, h0), jnp.maximum(h1, h2))
    lse1 = m1 + jnp.log(3.0 * jnp.exp(s - m1) + jnp.exp(h0 - m1)
                        + jnp.exp(h1 - m1) + jnp.exp(h2 - m1))
    zero = jnp.zeros_like(h0)
    m2 = jnp.maximum(jnp.maximum(zero, h0), jnp.maximum(h1, h2))
    lse2 = m2 + jnp.log(3.0 * jnp.exp(-m2) + jnp.exp(h0 - m2)
                        + jnp.exp(h1 - m2) + jnp.exp(h2 - m2))
    feat_avg_lse = lse1 - lse2

    # stabilised log((2e^(h0+h1)+e^h0+e^h1)/(2+e^h0+e^h1))
    s01 = h0 + h1
    mp1 = jnp.maximum(s01, jnp.maximum(h0, h1))
    num = mp1 + jnp.log(2.0 * jnp.exp(s01 - mp1) + jnp.exp(h0 - mp1) + jnp.exp(h1 - mp1))
    mp2 = jnp.maximum(zero, jnp.maximum(h0, h1))
    den = mp2 + jnp.log(2.0 * jnp.exp(-mp2) + jnp.exp(h0 - mp2) + jnp.exp(h1 - mp2))
    feat_pool = num - den

    feat_avg = paired * feat_avg_lse + (1.0 - paired) * feat_pool    # (B, H)

    # ---- modality concat in attention order [trend, seasonal, shared, cxr] --
    feats_cat = jnp.concatenate([ftd, fsd, feat_avg, fcd], axis=-1)  # (B, 4H)

    # ---- four small prediction heads (block-diag, one matmul) ---------------
    preds = mm(feats_cat, w_heads_ref, "heads", act="sigmoid")       # (B, 4C)

    # ---- four uncertainty nets (block-diag 2-layer MLP) ---------------------
    hu = mm(feats_cat, w_unc1_ref, "unc1", act="relu")               # (B, 2H)
    u_all = mm(hu, w_unc2_ref, "unc2", act="sigmoid")                # (B, 4)

    # ---- attention projection: single weight applied per modality -----------
    # w_attn columns are ordered [k_0..k_{C-1} | q | v] so slices are aligned.
    feat_list = (ftd, fsd, feat_avg, fcd)
    qkv = [mm(f, w_attn_ref, "attn") for f in feat_list]             # each (B, (2+C)H)

    one_minus_u = 1.0 - u_all                                        # (B, 4)
    qw = [qkv[i][:, KW:KW + H] * one_minus_u[:, i:i + 1] for i in range(4)]
    q_sum3 = qw[0] + qw[1] + qw[2]
    q_mean = (paired * ((q_sum3 + qw[3]) * 0.25)
              + (1.0 - paired) * (q_sum3 * (1.0 / 3.0)))             # (B, H)

    # attention logits per (modality, class): MXU replication + masked reduce
    rep = rep_ref[...]                                               # (H, C*H) 0/1
    s_red = s_red_ref[...]                                           # (C*H, C), 1/sqrt(H) folded
    q_rep = jnp.dot(q_mean, rep, preferred_element_type=f32)         # (B, C*H)
    lgs = [jnp.dot(qkv[i][:, 0:KW] * q_rep, s_red, preferred_element_type=f32)
           for i in range(4)]                                        # 4 x (B, C)
    # mask cxr modality when no paired image (large finite negative -> exact 0)
    lgs[3] = jnp.where(paired < 0.5, jnp.float32(-1e30), lgs[3])

    mmax = jnp.maximum(jnp.maximum(lgs[0], lgs[1]), jnp.maximum(lgs[2], lgs[3]))
    es = [jnp.exp(l - mmax) for l in lgs]
    denom = es[0] + es[1] + es[2] + es[3]
    ws = [e / denom for e in es]                                     # softmax over modalities

    # feat_final[b, c, :] = sum_i ws_i[b, c] * v_i[b, :]  (lane-dense (B, C*H))
    s_exp = s_exp_ref[...]                                           # (C, C*H) 0/1
    ffinal = jnp.zeros_like(q_rep)
    for i in range(4):
        v_rep = jnp.dot(qkv[i][:, KW + H:KW + 2 * H], rep,
                        preferred_element_type=f32)                  # (B, C*H)
        expand = jnp.dot(ws[i], s_exp, preferred_element_type=f32)   # (B, C*H)
        ffinal = ffinal + expand * v_rep

    # pred_final = diagonal(final_pred_fc(feat_final)).sigmoid()  (folded weight)
    logits_fp = jnp.dot(ffinal, w_final_ref[...], preferred_element_type=f32) + bseg("fp")
    pfinal = jax.nn.sigmoid(logits_fp)                               # (B, C)

    # ---- one lane-dense output slab, four 128-aligned full-tile stores ------
    B_tile = ftd.shape[0]
    out_ref[:, 0:4 * H] = feats_cat                                  # [0, 128)
    out_ref[:, 4 * H:4 * H + KW] = ffinal                            # [128, 256)
    out_ref[:, 256:384] = jnp.concatenate([h0, h1, h2, zero], axis=-1)
    attnw = jnp.concatenate(ws, axis=-1)                             # (B, 4C) modality-major
    small_pad = jnp.zeros((B_tile, 128 - (4 * C + 4 + 4 * C + C)), f32)
    out_ref[:, 384:512] = jnp.concatenate([preds, u_all, attnw, pfinal, small_pad],
                                          axis=-1)


# ----------------------------------------------------------------------------
# Parameter init (deterministic, synthetic) in PyTorch-module layout.
# ----------------------------------------------------------------------------
def init_params(key, hidden=HIDDEN, num_classes=NUM_CLASSES):
    h2 = hidden // 2
    keys = iter(jax.random.split(key, 64))

    def w(shape, scale=None):
        s = scale if scale is not None else 1.0 / math.sqrt(shape[0])
        return (s * jax.random.normal(next(keys), shape)).astype(jnp.float32)

    def b(shape):
        return jnp.zeros(shape, jnp.float32)

    def unc_net():
        return dict(w1=w((hidden, h2)), b1=b((1, h2)),
                    w2=w((h2, 1)), b2=b((1, 1)))

    return dict(
        ehr=dict(
            wts=w((EHR_INPUT, hidden)), bts=b((1, hidden)),
            wtd=w((EHR_INPUT, hidden)), btd=b((1, hidden)),
            wss=w((EHR_INPUT, hidden)), bss=b((1, hidden)),
            wsd=w((EHR_INPUT, hidden)), bsd=b((1, hidden)),
            w_pred_t=w((hidden, num_classes)), b_pred_t=b((1, num_classes)),
            w_pred_s=w((hidden, num_classes)), b_pred_s=b((1, num_classes)),
        ),
        cxr=dict(
            wstem=w((CXR_POOL, 2048)), bstem=b((1, 2048)),
            wsh=w((2048, hidden)), bsh=b((1, hidden)),
            wspec=w((2048, hidden)), bspec=b((1, hidden)),
        ),
        cxr_linear=dict(w=w((hidden, num_classes)), b=b((1, num_classes))),
        shared_project=dict(
            w1=w((hidden, hidden * 2)), b1=b((1, hidden * 2)),
            w2=w((hidden * 2, hidden)), b2=b((1, hidden)),
            w3=w((hidden, hidden)), b3=b((1, hidden)),
        ),
        fuse_shared=dict(w=w((hidden, num_classes)), b=b((1, num_classes))),
        unc=dict(trend=unc_net(), seasonal=unc_net(), shared=unc_net(), cxr=unc_net()),
        # columns ordered [q | v | k_0 .. k_{C-1}]  (x @ W layout)
        attn_proj=dict(w=w((hidden, (2 + num_classes) * hidden)),
                       b=b((1, (2 + num_classes) * hidden))),
        # PyTorch (out_features, in_features) layout so the diagonal fold is exact.
        final_fc=dict(w=w((num_classes, hidden), scale=1.0 / math.sqrt(hidden)),
                      b=b((1, num_classes))),
    )


# ----------------------------------------------------------------------------
# Host-side one-time parameter packing.
# ----------------------------------------------------------------------------
def _block_diag(blocks):
    rows = sum(blk.shape[0] for blk in blocks)
    cols = sum(blk.shape[1] for blk in blocks)
    out = jnp.zeros((rows, cols), jnp.float32)
    r = c = 0
    for blk in blocks:
        out = out.at[r:r + blk.shape[0], c:c + blk.shape[1]].set(blk)
        r += blk.shape[0]
        c += blk.shape[1]
    return out


def pack_params(params, hidden=HIDDEN, num_classes=NUM_CLASSES):
    H, C = hidden, num_classes
    bf16 = jnp.bfloat16
    e = params["ehr"]
    cx = params["cxr"]
    sp = params["shared_project"]
    u = params["unc"]

    # EHR: 4 heads concatenated, K padded 76 -> 128
    w_ehr = jnp.concatenate([e["wts"], e["wtd"], e["wss"], e["wsd"]], axis=1)
    w_ehr = jnp.pad(w_ehr, ((0, EHR_PAD - EHR_INPUT), (0, 0)))          # (128, 4H)
    b_ehr = jnp.concatenate([e["bts"], e["btd"], e["bss"], e["bsd"]], axis=1)

    # CXR stand-in: stem K padded 3 -> 8; shared+spec heads concatenated
    w_stem = jnp.pad(cx["wstem"], ((0, CXR_PAD - CXR_POOL), (0, 0)))    # (8, 2048)
    w_cxr = jnp.concatenate([cx["wsh"], cx["wspec"]], axis=1)           # (2048, 2H)
    b_cxr = jnp.concatenate([cx["bsh"], cx["bspec"]], axis=1)

    # modality order everywhere: [trend, seasonal, shared, cxr]
    order = ["trend", "seasonal", "shared", "cxr"]
    w_heads = _block_diag([e["w_pred_t"], e["w_pred_s"],
                           params["fuse_shared"]["w"], params["cxr_linear"]["w"]])
    b_heads = jnp.concatenate([e["b_pred_t"], e["b_pred_s"],
                               params["fuse_shared"]["b"], params["cxr_linear"]["b"]], axis=1)
    w_unc1 = _block_diag([u[k]["w1"] for k in order])
    b_unc1 = jnp.concatenate([u[k]["b1"] for k in order], axis=1)
    w_unc2 = _block_diag([u[k]["w2"] for k in order])
    b_unc2 = jnp.concatenate([u[k]["b2"] for k in order], axis=1)

    # attn projection: single copy, columns reordered [k_0..k_{C-1} | q | v]
    wa, ba = params["attn_proj"]["w"], params["attn_proj"]["b"]
    w_attn = jnp.concatenate([wa[:, 2 * H:], wa[:, 0:H], wa[:, H:2 * H]], axis=1)
    b_attn = jnp.concatenate([ba[:, 2 * H:], ba[:, 0:H], ba[:, H:2 * H]], axis=1)

    # structural constants (host-built, tiny, kept f32 for numerics)
    eyeC = jnp.eye(C, dtype=jnp.float32)
    rep = jnp.concatenate([jnp.eye(H, dtype=jnp.float32)] * C, axis=1)   # (H, C*H)
    s_red = jnp.repeat(eyeC, H, axis=0) * (1.0 / math.sqrt(H))           # (C*H, C)
    s_exp = jnp.repeat(eyeC, H, axis=1)                                  # (C, C*H)
    wfp = params["final_fc"]["w"]                                        # (C, H)
    w_final = jnp.zeros((C * H, C), jnp.float32)
    for c in range(C):
        w_final = w_final.at[c * H:(c + 1) * H, c].set(wfp[c])
    b_fp = params["final_fc"]["b"]

    # biases: one (1, N) row, every segment 128-lane aligned (kept f32; ~14 KB)
    segments = [
        ("ehr", b_ehr), ("stem", cx["bstem"]), ("cxr", b_cxr),
        ("sp1", sp["b1"]), ("sp2", sp["b2"]), ("sp3", sp["b3"]),
        ("heads", b_heads), ("unc1", b_unc1), ("unc2", b_unc2),
        ("attn", b_attn), ("fp", b_fp),
    ]
    boffs = {}
    chunks = []
    off = 0
    for name, seg in segments:
        n = seg.shape[-1]
        pad = (-n) % 128
        chunks.append(jnp.pad(seg.astype(jnp.float32), ((0, 0), (0, pad))))
        boffs[name] = (off, n)
        off += n + pad
    b_all = jnp.concatenate(chunks, axis=-1)

    weights = dict(
        w_ehr=w_ehr.astype(bf16), w_stem=w_stem.astype(bf16), w_cxr=w_cxr.astype(bf16),
        w_sp1=sp["w1"].astype(bf16), w_sp2=sp["w2"].astype(bf16), w_sp3=sp["w3"].astype(bf16),
        w_heads=w_heads.astype(bf16), w_unc1=w_unc1.astype(bf16), w_unc2=w_unc2.astype(bf16),
        w_attn=w_attn.astype(bf16),
        rep=rep, s_red=s_red, s_exp=s_exp, w_final=w_final,
        b_all=b_all,
    )
    return weights, boffs


# ----------------------------------------------------------------------------
# Forward-pass builder.
# ----------------------------------------------------------------------------
def build_forward(boffs, hidden=HIDDEN, num_classes=NUM_CLASSES):
    H, C = hidden, num_classes
    assert 4 * H == 128 and C * H == 128 and 3 * H <= 128, "slab layout assumes H=32, C=4"
    kernel = functools.partial(_drfuse_kernel, hidden=H, num_classes=C, boffs=dict(boffs))
    w_names = ["w_ehr", "w_stem", "w_cxr", "w_sp1", "w_sp2", "w_sp3",
               "w_heads", "w_unc1", "w_unc2", "w_attn",
               "rep", "s_red", "s_exp", "w_final", "b_all"]

    @jax.jit
    def forward(weights, x, img, seq_lengths, pairs):
        B, T, _ = x.shape
        x = x.astype(jnp.float32)

        # stand-in backbone pooling in XLA (keeps the raw image out of VMEM)
        mask = (jnp.arange(T)[None, :] < seq_lengths[:, None]).astype(jnp.float32)
        inv_len = 1.0 / jnp.maximum(seq_lengths.astype(jnp.float32), 1.0)
        pooled_ehr = jnp.einsum("btf,bt->bf", x, mask) * inv_len[:, None]     # (B, 76)
        pooled_ehr = jnp.pad(pooled_ehr, ((0, 0), (0, EHR_PAD - EHR_INPUT)))  # (B, 128)
        pooled_cxr = jnp.mean(img.astype(jnp.float32), axis=(2, 3))           # (B, 3)
        pooled_cxr = jnp.pad(pooled_cxr, ((0, 0), (0, CXR_PAD - CXR_POOL)))   # (B, 8)
        pairs2 = pairs.astype(jnp.float32).reshape(B, 1)

        # batch tiling: large B shards tiles across TensorCores (parallel grid);
        # tiles capped so the (TB, 2048) stem intermediate stays VMEM-friendly
        # on v7x (64 MiB) as well as v5e/v6e.
        if B >= 512 and B % 256 == 0:
            TB = 256
        elif B >= 256 and B % 128 == 0:
            TB = 128
        else:
            TB = B
        nb = B // TB

        w_args = [weights[n] for n in w_names]

        def act_spec(d):
            return pl.BlockSpec((TB, d), lambda i: (i, 0))

        def w_spec(arr):
            # full-array block, constant index -> weights stay resident across grid
            return pl.BlockSpec(arr.shape, lambda i: (0, 0))

        flops = 2 * B * (EHR_PAD * 4 * H + CXR_PAD * 2048 + 2048 * 2 * H
                         + 3 * (H * 2 * H + 2 * H * H + H * H)
                         + 4 * H * 4 * C + 4 * H * 2 * H + 2 * H * 4
                         + 4 * H * (2 + C) * H + H * C * H
                         + 8 * C * H * C + 4 * C * C * H + C * H * C)
        bytes_accessed = int(sum(int(a.size) * a.dtype.itemsize for a in w_args)
                             + (B * (EHR_PAD + CXR_PAD + 1) + B * OUT_W) * 4)
        cost = pl.CostEstimate(flops=int(flops),
                               transcendentals=int(B * (2048 + 64 * H + 24 * C)),
                               bytes_accessed=bytes_accessed)

        slab = pl.pallas_call(
            kernel,
            out_shape=jax.ShapeDtypeStruct((B, OUT_W), jnp.float32),
            grid=(nb,),
            in_specs=[act_spec(EHR_PAD), act_spec(CXR_PAD), act_spec(1)]
                     + [w_spec(a) for a in w_args],
            out_specs=pl.BlockSpec((TB, OUT_W), lambda i: (i, 0)),
            compiler_params=pltpu.CompilerParams(dimension_semantics=("parallel",)),
            cost_estimate=cost,
        )(pooled_ehr, pooled_cxr, pairs2, *w_args)

        # ---- slice the lane-dense slab apart (free in XLA) -------------------
        so = 384
        attnw = slab[:, so + 4 * C + 4:so + 8 * C + 4].reshape(B, 4, C)
        outputs = {
            "feat_trend_shared": slab[:, 256:256 + H],
            "feat_sea_shared": slab[:, 256 + H:256 + 2 * H],
            "feat_cxr_shared": slab[:, 256 + 2 * H:256 + 3 * H],
            "feat_trend_distinct": slab[:, 0:H],
            "feat_sea_distinct": slab[:, H:2 * H],
            "feat_cxr_distinct": slab[:, 3 * H:4 * H],
            "feat_final": slab[:, 128:128 + C * H].reshape(B, C, H),
            "pred_final": slab[:, so + 8 * C + 4:so + 8 * C + 4 + C],
            "pred_shared": slab[:, so + 2 * C:so + 3 * C],
            "pred_trend": slab[:, so:so + C],
            "pred_sea": slab[:, so + C:so + 2 * C],
            "pred_cxr": slab[:, so + 3 * C:so + 4 * C],
            "attn_weights": jnp.transpose(attnw, (0, 2, 1)),
            "uncertainties": {
                "trend": slab[:, so + 4 * C:so + 4 * C + 1],
                "seasonal": slab[:, so + 4 * C + 1:so + 4 * C + 2],
                "shared": slab[:, so + 4 * C + 2:so + 4 * C + 3],
                "cxr": slab[:, so + 4 * C + 3:so + 4 * C + 4],
            },
        }
        return outputs

    return forward


def drfuse_forward(weights, boffs, x, img, seq_lengths, pairs, grl_lambda=0.0):
    del grl_lambda  # unused in the reference forward pass
    return build_forward(boffs)(weights, x, img, seq_lengths, pairs)


if __name__ == "__main__":
    import numpy as np

    key = jax.random.PRNGKey(0)
    kx, kimg = jax.random.split(key, 2)

    B, T = 2, 8
    x = jax.random.normal(kx, (B, T, EHR_INPUT), dtype=jnp.float32)
    img = jax.random.normal(kimg, (B, 3, 16, 16), dtype=jnp.float32)   # NCHW
    seq_lengths = jnp.array([8, 5], dtype=jnp.int32)
    pairs = jnp.array([1.0, 0.0], dtype=jnp.float32)

    params = init_params(jax.random.PRNGKey(42))
    weights, boffs = pack_params(params)
    forward = build_forward(boffs)

    outputs = forward(weights, x, img, seq_lengths, pairs)
    jax.block_until_ready(outputs)

    assert outputs["feat_final"].shape == (B, NUM_CLASSES, HIDDEN)
    assert outputs["pred_final"].shape == (B, NUM_CLASSES)
    assert outputs["attn_weights"].shape == (B, NUM_CLASSES, 4)
    assert outputs["pred_shared"].shape == (B, NUM_CLASSES)
    assert outputs["uncertainties"]["trend"].shape == (B, 1)

    aw = np.asarray(outputs["attn_weights"])
    assert np.allclose(aw.sum(-1), 1.0, atol=1e-3)       # softmax over modalities
    assert np.all(aw[1, :, 3] < 1e-6)                    # unpaired sample: cxr masked
    assert np.all(np.isfinite(np.asarray(outputs["pred_final"])))
    print("KERNEL_OK")
</pallas_src>

<mosaic_0001>
module attributes {stable_mosaic.version = 11 : i64} {
  func.func @_drfuse_kernel(%arg0: i32, %arg1: memref<2x128xf32, #tpu.memory_space<vmem>>, %arg2: memref<2x8xf32, #tpu.memory_space<vmem>>, %arg3: memref<2x1xf32, #tpu.memory_space<vmem>>, %arg4: memref<128x128xbf16, #tpu.memory_space<vmem>>, %arg5: memref<8x2048xbf16, #tpu.memory_space<vmem>>, %arg6: memref<2048x64xbf16, #tpu.memory_space<vmem>>, %arg7: memref<32x64xbf16, #tpu.memory_space<vmem>>, %arg8: memref<64x32xbf16, #tpu.memory_space<vmem>>, %arg9: memref<32x32xbf16, #tpu.memory_space<vmem>>, %arg10: memref<128x16xbf16, #tpu.memory_space<vmem>>, %arg11: memref<128x64xbf16, #tpu.memory_space<vmem>>, %arg12: memref<64x4xbf16, #tpu.memory_space<vmem>>, %arg13: memref<32x192xbf16, #tpu.memory_space<vmem>>, %arg14: memref<32x128xf32, #tpu.memory_space<vmem>>, %arg15: memref<128x4xf32, #tpu.memory_space<vmem>>, %arg16: memref<4x128xf32, #tpu.memory_space<vmem>>, %arg17: memref<128x4xf32, #tpu.memory_space<vmem>>, %arg18: memref<1x3456xf32, #tpu.memory_space<vmem>>, %arg19: memref<2x512xf32, #tpu.memory_space<vmem>>) attributes {dimension_semantics = [#tpu.dimension_semantics<parallel>], iteration_bounds = array<i64: 1>, scalar_prefetch = 0 : i64, scratch_operands = 0 : i64, tpu.core_type = #tpu.core_type<tc>, window_params = [{transform_indices = @transform_0, window_bounds = array<i64: 2, 128>}, {transform_indices = @transform_1, window_bounds = array<i64: 2, 8>}, {transform_indices = @transform_2, window_bounds = array<i64: 2, 1>}, {pipeline_mode = #tpu.pipeline_mode<synchronous>, transform_indices = @transform_3, window_bounds = array<i64: 128, 128>}, {pipeline_mode = #tpu.pipeline_mode<synchronous>, transform_indices = @transform_4, window_bounds = array<i64: 8, 2048>}, {pipeline_mode = #tpu.pipeline_mode<synchronous>, transform_indices = @transform_5, window_bounds = array<i64: 2048, 64>}, {pipeline_mode = #tpu.pipeline_mode<synchronous>, transform_indices = @transform_6, window_bounds = array<i64: 32, 64>}, {pipeline_mode = #tpu.pipeline_mode<synchronous>, transform_indices = @transform_7, window_bounds = array<i64: 64, 32>}, {pipeline_mode = #tpu.pipeline_mode<synchronous>, transform_indices = @transform_8, window_bounds = array<i64: 32, 32>}, {pipeline_mode = #tpu.pipeline_mode<synchronous>, transform_indices = @transform_9, window_bounds = array<i64: 128, 16>}, {pipeline_mode = #tpu.pipeline_mode<synchronous>, transform_indices = @transform_10, window_bounds = array<i64: 128, 64>}, {pipeline_mode = #tpu.pipeline_mode<synchronous>, transform_indices = @transform_11, window_bounds = array<i64: 64, 4>}, {pipeline_mode = #tpu.pipeline_mode<synchronous>, transform_indices = @transform_12, window_bounds = array<i64: 32, 192>}, {pipeline_mode = #tpu.pipeline_mode<synchronous>, transform_indices = @transform_13, window_bounds = array<i64: 32, 128>}, {pipeline_mode = #tpu.pipeline_mode<synchronous>, transform_indices = @transform_14, window_bounds = array<i64: 128, 4>}, {pipeline_mode = #tpu.pipeline_mode<synchronous>, transform_indices = @transform_15, window_bounds = array<i64: 4, 128>}, {pipeline_mode = #tpu.pipeline_mode<synchronous>, transform_indices = @transform_16, window_bounds = array<i64: 128, 4>}, {pipeline_mode = #tpu.pipeline_mode<synchronous>, transform_indices = @transform_17, window_bounds = array<i64: 1, 3456>}, {transform_indices = @transform_18, window_bounds = array<i64: 2, 512>}]} {
    %c0 = arith.constant 0 : index
    %c0_0 = arith.constant 0 : index
    %0 = vector.load %arg3[%c0, %c0_0] : memref<2x1xf32, #tpu.memory_space<vmem>>, vector<2x1xf32>
    %c0_1 = arith.constant 0 : index
    %c0_2 = arith.constant 0 : index
    %1 = vector.load %arg1[%c0_1, %c0_2] : memref<2x128xf32, #tpu.memory_space<vmem>>, vector<2x128xf32>
    %2 = arith.truncf %1 : vector<2x128xf32> to vector<2x128xbf16>
    %c0_3 = arith.constant 0 : index
    %c0_4 = arith.constant 0 : index
    %3 = vector.load %arg4[%c0_3, %c0_4] : memref<128x128xbf16, #tpu.memory_space<vmem>>, vector<128x128xbf16>
    %cst = arith.constant dense<0.000000e+00> : vector<2x128xf32>
    %4 = tpu.matmul %2, %3, %cst {dimension_numbers = #tpu.dot_dimension_numbers<[1], [0], [0], [1], [0, 0, 1, 1], [], []>} : vector<2x128xbf16>, vector<128x128xbf16>, vector<2x128xf32> -> vector<2x128xf32>
    %c0_5 = arith.constant 0 : index
    %c0_6 = arith.constant 0 : index
    %5 = vector.load %arg18[%c0_5, %c0_6] : memref<1x3456xf32, #tpu.memory_space<vmem>>, vector<1x128xf32>
    %6 = vector.broadcast %5 : vector<1x128xf32> to vector<2x128xf32>
    %7 = arith.addf %4, %6 : vector<2x128xf32>
    %8 = vector.extract_strided_slice %7 {offsets = [0, 0], sizes = [2, 32], strides = [1, 1]} : vector<2x128xf32> to vector<2x32xf32>
    %9 = vector.extract_strided_slice %7 {offsets = [0, 32], sizes = [2, 32], strides = [1, 1]} : vector<2x128xf32> to vector<2x32xf32>
    %10 = vector.extract_strided_slice %7 {offsets = [0, 64], sizes = [2, 32], strides = [1, 1]} : vector<2x128xf32> to vector<2x32xf32>
    %11 = vector.extract_strided_slice %7 {offsets = [0, 96], sizes = [2, 32], strides = [1, 1]} : vector<2x128xf32> to vector<2x32xf32>
    %c0_7 = arith.constant 0 : index
    %c0_8 = arith.constant 0 : index
    %12 = vector.load %arg2[%c0_7, %c0_8] : memref<2x8xf32, #tpu.memory_space<vmem>>, vector<2x8xf32>
    %13 = arith.truncf %12 : vector<2x8xf32> to vector<2x8xbf16>
    %c0_9 = arith.constant 0 : index
    %c0_10 = arith.constant 0 : index
    %14 = vector.load %arg5[%c0_9, %c0_10] : memref<8x2048xbf16, #tpu.memory_space<vmem>>, vector<8x2048xbf16>
    %cst_11 = arith.constant dense<0.000000e+00> : vector<2x2048xf32>
    %15 = tpu.matmul %13, %14, %cst_11 {dimension_numbers = #tpu.dot_dimension_numbers<[1], [0], [0], [1], [0, 0, 1, 1], [], []>} : vector<2x8xbf16>, vector<8x2048xbf16>, vector<2x2048xf32> -> vector<2x2048xf32>
    %c0_12 = arith.constant 0 : index
    %c128 = arith.constant 128 : index
    %16 = vector.load %arg18[%c0_12, %c128] : memref<1x3456xf32, #tpu.memory_space<vmem>>, vector<1x2048xf32>
    %17 = vector.broadcast %16 : vector<1x2048xf32> to vector<2x2048xf32>
    %18 = arith.addf %15, %17 : vector<2x2048xf32>
    %cst_13 = arith.constant 0.000000e+00 : f32
    %19 = vector.broadcast %cst_13 : f32 to vector<2x2048xf32>
    %20 = arith.maximumf %18, %19 : vector<2x2048xf32>
    %21 = arith.truncf %20 : vector<2x2048xf32> to vector<2x2048xbf16>
    %c0_14 = arith.constant 0 : index
    %c0_15 = arith.constant 0 : index
    %22 = vector.load %arg6[%c0_14, %c0_15] : memref<2048x64xbf16, #tpu.memory_space<vmem>>, vector<2048x64xbf16>
    %cst_16 = arith.constant dense<0.000000e+00> : vector<2x64xf32>
    %23 = tpu.matmul %21, %22, %cst_16 {dimension_numbers = #tpu.dot_dimension_numbers<[1], [0], [0], [1], [0, 0, 1, 1], [], []>} : vector<2x2048xbf16>, vector<2048x64xbf16>, vector<2x64xf32> -> vector<2x64xf32>
    %c0_17 = arith.constant 0 : index
    %c2176 = arith.constant 2176 : index
    %24 = vector.load %arg18[%c0_17, %c2176] : memref<1x3456xf32, #tpu.memory_space<vmem>>, vector<1x64xf32>
    %25 = vector.broadcast %24 : vector<1x64xf32> to vector<2x64xf32>
    %26 = arith.addf %23, %25 : vector<2x64xf32>
    %27 = vector.extract_strided_slice %26 {offsets = [0, 0], sizes = [2, 32], strides = [1, 1]} : vector<2x64xf32> to vector<2x32xf32>
    %28 = vector.extract_strided_slice %26 {offsets = [0, 32], sizes = [2, 32], strides = [1, 1]} : vector<2x64xf32> to vector<2x32xf32>
    %29 = arith.truncf %8 : vector<2x32xf32> to vector<2x32xbf16>
    %c0_18 = arith.constant 0 : index
    %c0_19 = arith.constant 0 : index
    %30 = vector.load %arg7[%c0_18, %c0_19] : memref<32x64xbf16, #tpu.memory_space<vmem>>, vector<32x64xbf16>
    %cst_20 = arith.constant dense<0.000000e+00> : vector<2x64xf32>
    %31 = tpu.matmul %29, %30, %cst_20 {dimension_numbers = #tpu.dot_dimension_numbers<[1], [0], [0], [1], [0, 0, 1, 1], [], []>} : vector<2x32xbf16>, vector<32x64xbf16>, vector<2x64xf32> -> vector<2x64xf32>
    %c0_21 = arith.constant 0 : index
    %c2304 = arith.constant 2304 : index
    %32 = vector.load %arg18[%c0_21, %c2304] : memref<1x3456xf32, #tpu.memory_space<vmem>>, vector<1x64xf32>
    %33 = vector.broadcast %32 : vector<1x64xf32> to vector<2x64xf32>
    %34 = arith.addf %31, %33 : vector<2x64xf32>
    %cst_22 = arith.constant 0.000000e+00 : f32
    %35 = vector.broadcast %cst_22 : f32 to vector<2x64xf32>
    %36 = arith.maximumf %34, %35 : vector<2x64xf32>
    %37 = arith.truncf %36 : vector<2x64xf32> to vector<2x64xbf16>
    %c0_23 = arith.constant 0 : index
    %c0_24 = arith.constant 0 : index
    %38 = vector.load %arg8[%c0_23, %c0_24] : memref<64x32xbf16, #tpu.memory_space<vmem>>, vector<64x32xbf16>
    %cst_25 = arith.constant dense<0.000000e+00> : vector<2x32xf32>
    %39 = tpu.matmul %37, %38, %cst_25 {dimension_numbers = #tpu.dot_dimension_numbers<[1], [0], [0], [1], [0, 0, 1, 1], [], []>} : vector<2x64xbf16>, vector<64x32xbf16>, vector<2x32xf32> -> vector<2x32xf32>
    %c0_26 = arith.constant 0 : index
    %c2432 = arith.constant 2432 : index
    %40 = vector.load %arg18[%c0_26, %c2432] : memref<1x3456xf32, #tpu.memory_space<vmem>>, vector<1x32xf32>
    %41 = vector.broadcast %40 : vector<1x32xf32> to vector<2x32xf32>
    %42 = arith.addf %39, %41 : vector<2x32xf32>
    %cst_27 = arith.constant 0.000000e+00 : f32
    %43 = vector.broadcast %cst_27 : f32 to vector<2x32xf32>
    %44 = arith.maximumf %42, %43 : vector<2x32xf32>
    %45 = arith.truncf %44 : vector<2x32xf32> to vector<2x32xbf16>
    %c0_28 = arith.constant 0 : index
    %c0_29 = arith.constant 0 : index
    %46 = vector.load %arg9[%c0_28, %c0_29] : memref<32x32xbf16, #tpu.memory_space<vmem>>, vector<32x32xbf16>
    %cst_30 = arith.constant dense<0.000000e+00> : vector<2x32xf32>
    %47 = tpu.matmul %45, %46, %cst_30 {dimension_numbers = #tpu.dot_dimension_numbers<[1], [0], [0], [1], [0, 0, 1, 1], [], []>} : vector<2x32xbf16>, vector<32x32xbf16>, vector<2x32xf32> -> vector<2x32xf32>
    %c0_31 = arith.constant 0 : index
    %c2560 = arith.constant 2560 : index
    %48 = vector.load %arg18[%c0_31, %c2560] : memref<1x3456xf32, #tpu.memory_space<vmem>>, vector<1x32xf32>
    %49 = vector.broadcast %48 : vector<1x32xf32> to vector<2x32xf32>
    %50 = arith.addf %47, %49 : vector<2x32xf32>
    %51 = arith.truncf %10 : vector<2x32xf32> to vector<2x32xbf16>
    %c0_32 = arith.constant 0 : index
    %c0_33 = arith.constant 0 : index
    %52 = vector.load %arg7[%c0_32, %c0_33] : memref<32x64xbf16, #tpu.memory_space<vmem>>, vector<32x64xbf16>
    %cst_34 = arith.constant dense<0.000000e+00> : vector<2x64xf32>
    %53 = tpu.matmul %51, %52, %cst_34 {dimension_numbers = #tpu.dot_dimension_numbers<[1], [0], [0], [1], [0, 0, 1, 1], [], []>} : vector<2x32xbf16>, vector<32x64xbf16>, vector<2x64xf32> -> vector<2x64xf32>
    %c0_35 = arith.constant 0 : index
    %c2304_36 = arith.constant 2304 : index
    %54 = vector.load %arg18[%c0_35, %c2304_36] : memref<1x3456xf32, #tpu.memory_space<vmem>>, vector<1x64xf32>
    %55 = vector.broadcast %54 : vector<1x64xf32> to vector<2x64xf32>
    %56 = arith.addf %53, %55 : vector<2x64xf32>
    %cst_37 = arith.constant 0.000000e+00 : f32
    %57 = vector.broadcast %cst_37 : f32 to vector<2x64xf32>
    %58 = arith.maximumf %56, %57 : vector<2x64xf32>
    %59 = arith.truncf %58 : vector<2x64xf32> to vector<2x64xbf16>
    %c0_38 = arith.constant 0 : index
    %c0_39 = arith.constant 0 : index
    %60 = vector.load %arg8[%c0_38, %c0_39] : memref<64x32xbf16, #tpu.memory_space<vmem>>, vector<64x32xbf16>
    %cst_40 = arith.constant dense<0.000000e+00> : vector<2x32xf32>
    %61 = tpu.matmul %59, %60, %cst_40 {dimension_numbers = #tpu.dot_dimension_numbers<[1], [0], [0], [1], [0, 0, 1, 1], [], []>} : vector<2x64xbf16>, vector<64x32xbf16>, vector<2x32xf32> -> vector<2x32xf32>
    %c0_41 = arith.constant 0 : index
    %c2432_42 = arith.constant 2432 : index
    %62 = vector.load %arg18[%c0_41, %c2432_42] : memref<1x3456xf32, #tpu.memory_space<vmem>>, vector<1x32xf32>
    %63 = vector.broadcast %62 : vector<1x32xf32> to vector<2x32xf32>
    %64 = arith.addf %61, %63 : vector<2x32xf32>
    %cst_43 = arith.constant 0.000000e+00 : f32
    %65 = vector.broadcast %cst_43 : f32 to vector<2x32xf32>
    %66 = arith.maximumf %64, %65 : vector<2x32xf32>
    %67 = arith.truncf %66 : vector<2x32xf32> to vector<2x32xbf16>
    %c0_44 = arith.constant 0 : index
    %c0_45 = arith.constant 0 : index
    %68 = vector.load %arg9[%c0_44, %c0_45] : memref<32x32xbf16, #tpu.memory_space<vmem>>, vector<32x32xbf16>
    %cst_46 = arith.constant dense<0.000000e+00> : vector<2x32xf32>
    %69 = tpu.matmul %67, %68, %cst_46 {dimension_numbers = #tpu.dot_dimension_numbers<[1], [0], [0], [1], [0, 0, 1, 1], [], []>} : vector<2x32xbf16>, vector<32x32xbf16>, vector<2x32xf32> -> vector<2x32xf32>
    %c0_47 = arith.constant 0 : index
    %c2560_48 = arith.constant 2560 : index
    %70 = vector.load %arg18[%c0_47, %c2560_48] : memref<1x3456xf32, #tpu.memory_space<vmem>>, vector<1x32xf32>
    %71 = vector.broadcast %70 : vector<1x32xf32> to vector<2x32xf32>
    %72 = arith.addf %69, %71 : vector<2x32xf32>
    %73 = arith.truncf %27 : vector<2x32xf32> to vector<2x32xbf16>
    %c0_49 = arith.constant 0 : index
    %c0_50 = arith.constant 0 : index
    %74 = vector.load %arg7[%c0_49, %c0_50] : memref<32x64xbf16, #tpu.memory_space<vmem>>, vector<32x64xbf16>
    %cst_51 = arith.constant dense<0.000000e+00> : vector<2x64xf32>
    %75 = tpu.matmul %73, %74, %cst_51 {dimension_numbers = #tpu.dot_dimension_numbers<[1], [0], [0], [1], [0, 0, 1, 1], [], []>} : vector<2x32xbf16>, vector<32x64xbf16>, vector<2x64xf32> -> vector<2x64xf32>
    %c0_52 = arith.constant 0 : index
    %c2304_53 = arith.constant 2304 : index
    %76 = vector.load %arg18[%c0_52, %c2304_53] : memref<1x3456xf32, #tpu.memory_space<vmem>>, vector<1x64xf32>
    %77 = vector.broadcast %76 : vector<1x64xf32> to vector<2x64xf32>
    %78 = arith.addf %75, %77 : vector<2x64xf32>
    %cst_54 = arith.constant 0.000000e+00 : f32
    %79 = vector.broadcast %cst_54 : f32 to vector<2x64xf32>
    %80 = arith.maximumf %78, %79 : vector<2x64xf32>
    %81 = arith.truncf %80 : vector<2x64xf32> to vector<2x64xbf16>
    %c0_55 = arith.constant 0 : index
    %c0_56 = arith.constant 0 : index
    %82 = vector.load %arg8[%c0_55, %c0_56] : memref<64x32xbf16, #tpu.memory_space<vmem>>, vector<64x32xbf16>
    %cst_57 = arith.constant dense<0.000000e+00> : vector<2x32xf32>
    %83 = tpu.matmul %81, %82, %cst_57 {dimension_numbers = #tpu.dot_dimension_numbers<[1], [0], [0], [1], [0, 0, 1, 1], [], []>} : vector<2x64xbf16>, vector<64x32xbf16>, vector<2x32xf32> -> vector<2x32xf32>
    %c0_58 = arith.constant 0 : index
    %c2432_59 = arith.constant 2432 : index
    %84 = vector.load %arg18[%c0_58, %c2432_59] : memref<1x3456xf32, #tpu.memory_space<vmem>>, vector<1x32xf32>
    %85 = vector.broadcast %84 : vector<1x32xf32> to vector<2x32xf32>
    %86 = arith.addf %83, %85 : vector<2x32xf32>
    %cst_60 = arith.constant 0.000000e+00 : f32
    %87 = vector.broadcast %cst_60 : f32 to vector<2x32xf32>
    %88 = arith.maximumf %86, %87 : vector<2x32xf32>
    %89 = arith.truncf %88 : vector<2x32xf32> to vector<2x32xbf16>
    %c0_61 = arith.constant 0 : index
    %c0_62 = arith.constant 0 : index
    %90 = vector.load %arg9[%c0_61, %c0_62] : memref<32x32xbf16, #tpu.memory_space<vmem>>, vector<32x32xbf16>
    %cst_63 = arith.constant dense<0.000000e+00> : vector<2x32xf32>
    %91 = tpu.matmul %89, %90, %cst_63 {dimension_numbers = #tpu.dot_dimension_numbers<[1], [0], [0], [1], [0, 0, 1, 1], [], []>} : vector<2x32xbf16>, vector<32x32xbf16>, vector<2x32xf32> -> vector<2x32xf32>
    %c0_64 = arith.constant 0 : index
    %c2560_65 = arith.constant 2560 : index
    %92 = vector.load %arg18[%c0_64, %c2560_65] : memref<1x3456xf32, #tpu.memory_space<vmem>>, vector<1x32xf32>
    %93 = vector.broadcast %92 : vector<1x32xf32> to vector<2x32xf32>
    %94 = arith.addf %91, %93 : vector<2x32xf32>
    %95 = arith.addf %50, %72 : vector<2x32xf32>
    %96 = arith.addf %95, %94 : vector<2x32xf32>
    %97 = arith.maximumf %96, %50 : vector<2x32xf32>
    %98 = arith.maximumf %72, %94 : vector<2x32xf32>
    %99 = arith.maximumf %97, %98 : vector<2x32xf32>
    %100 = arith.subf %96, %99 : vector<2x32xf32>
    %101 = math.exp %100 : vector<2x32xf32>
    %cst_66 = arith.constant 3.000000e+00 : f32
    %102 = vector.broadcast %cst_66 : f32 to vector<2x32xf32>
    %103 = arith.mulf %102, %101 : vector<2x32xf32>
    %104 = arith.subf %50, %99 : vector<2x32xf32>
    %105 = math.exp %104 : vector<2x32xf32>
    %106 = arith.addf %103, %105 : vector<2x32xf32>
    %107 = arith.subf %72, %99 : vector<2x32xf32>
    %108 = math.exp %107 : vector<2x32xf32>
    %109 = arith.addf %106, %108 : vector<2x32xf32>
    %110 = arith.subf %94, %99 : vector<2x32xf32>
    %111 = math.exp %110 : vector<2x32xf32>
    %112 = arith.addf %109, %111 : vector<2x32xf32>
    %113 = math.log %112 : vector<2x32xf32>
    %114 = arith.addf %99, %113 : vector<2x32xf32>
    %cst_67 = arith.constant 0.000000e+00 : f32
    %115 = vector.broadcast %cst_67 : f32 to vector<2x32xf32>
    %116 = arith.maximumf %115, %50 : vector<2x32xf32>
    %117 = arith.maximumf %72, %94 : vector<2x32xf32>
    %118 = arith.maximumf %116, %117 : vector<2x32xf32>
    %cst_68 = arith.constant 0.000000e+00 : f32
    %119 = vector.broadcast %cst_68 : f32 to vector<2x32xf32>
    %120 = arith.subf %119, %118 : vector<2x32xf32>
    %121 = math.exp %120 : vector<2x32xf32>
    %cst_69 = arith.constant 3.000000e+00 : f32
    %122 = vector.broadcast %cst_69 : f32 to vector<2x32xf32>
    %123 = arith.mulf %122, %121 : vector<2x32xf32>
    %124 = arith.subf %50, %118 : vector<2x32xf32>
    %125 = math.exp %124 : vector<2x32xf32>
    %126 = arith.addf %123, %125 : vector<2x32xf32>
    %127 = arith.subf %72, %118 : vector<2x32xf32>
    %128 = math.exp %127 : vector<2x32xf32>
    %129 = arith.addf %126, %128 : vector<2x32xf32>
    %130 = arith.subf %94, %118 : vector<2x32xf32>
    %131 = math.exp %130 : vector<2x32xf32>
    %132 = arith.addf %129, %131 : vector<2x32xf32>
    %133 = math.log %132 : vector<2x32xf32>
    %134 = arith.addf %118, %133 : vector<2x32xf32>
    %135 = arith.subf %114, %134 : vector<2x32xf32>
    %136 = arith.addf %50, %72 : vector<2x32xf32>
    %137 = arith.maximumf %50, %72 : vector<2x32xf32>
    %138 = arith.maximumf %136, %137 : vector<2x32xf32>
    %139 = arith.subf %136, %138 : vector<2x32xf32>
    %140 = math.exp %139 : vector<2x32xf32>
    %cst_70 = arith.constant 2.000000e+00 : f32
    %141 = vector.broadcast %cst_70 : f32 to vector<2x32xf32>
    %142 = arith.mulf %141, %140 : vector<2x32xf32>
    %143 = arith.subf %50, %138 : vector<2x32xf32>
    %144 = math.exp %143 : vector<2x32xf32>
    %145 = arith.addf %142, %144 : vector<2x32xf32>
    %146 = arith.subf %72, %138 : vector<2x32xf32>
    %147 = math.exp %146 : vector<2x32xf32>
    %148 = arith.addf %145, %147 : vector<2x32xf32>
    %149 = math.log %148 : vector<2x32xf32>
    %150 = arith.addf %138, %149 : vector<2x32xf32>
    %151 = arith.maximumf %50, %72 : vector<2x32xf32>
    %152 = arith.maximumf %115, %151 : vector<2x32xf32>
    %cst_71 = arith.constant 0.000000e+00 : f32
    %153 = vector.broadcast %cst_71 : f32 to vector<2x32xf32>
    %154 = arith.subf %153, %152 : vector<2x32xf32>
    %155 = math.exp %154 : vector<2x32xf32>
    %cst_72 = arith.constant 2.000000e+00 : f32
    %156 = vector.broadcast %cst_72 : f32 to vector<2x32xf32>
    %157 = arith.mulf %156, %155 : vector<2x32xf32>
    %158 = arith.subf %50, %152 : vector<2x32xf32>
    %159 = math.exp %158 : vector<2x32xf32>
    %160 = arith.addf %157, %159 : vector<2x32xf32>
    %161 = arith.subf %72, %152 : vector<2x32xf32>
    %162 = math.exp %161 : vector<2x32xf32>
    %163 = arith.addf %160, %162 : vector<2x32xf32>
    %164 = math.log %163 : vector<2x32xf32>
    %165 = arith.addf %152, %164 : vector<2x32xf32>
    %166 = arith.subf %150, %165 : vector<2x32xf32>
    %167 = vector.broadcast %0 : vector<2x1xf32> to vector<2x32xf32>
    %168 = arith.mulf %167, %135 : vector<2x32xf32>
    %cst_73 = arith.constant 1.000000e+00 : f32
    %169 = vector.broadcast %cst_73 : f32 to vector<2x1xf32>
    %170 = arith.subf %169, %0 : vector<2x1xf32>
    %171 = vector.broadcast %170 : vector<2x1xf32> to vector<2x32xf32>
    %172 = arith.mulf %171, %166 : vector<2x32xf32>
    %173 = arith.addf %168, %172 : vector<2x32xf32>
    %174 = tpu.concatenate %9, %11, %173, %28 in 1 : vector<2x32xf32>, vector<2x32xf32>, vector<2x32xf32>, vector<2x32xf32> -> vector<2x128xf32>
    %175 = arith.truncf %174 : vector<2x128xf32> to vector<2x128xbf16>
    %c0_74 = arith.constant 0 : index
    %c0_75 = arith.constant 0 : index
    %176 = vector.load %arg10[%c0_74, %c0_75] : memref<128x16xbf16, #tpu.memory_space<vmem>>, vector<128x16xbf16>
    %cst_76 = arith.constant dense<0.000000e+00> : vector<2x16xf32>
    %177 = tpu.matmul %175, %176, %cst_76 {dimension_numbers = #tpu.dot_dimension_numbers<[1], [0], [0], [1], [0, 0, 1, 1], [], []>} : vector<2x128xbf16>, vector<128x16xbf16>, vector<2x16xf32> -> vector<2x16xf32>
    %c0_77 = arith.constant 0 : index
    %c2688 = arith.constant 2688 : index
    %178 = vector.load %arg18[%c0_77, %c2688] : memref<1x3456xf32, #tpu.memory_space<vmem>>, vector<1x16xf32>
    %179 = vector.broadcast %178 : vector<1x16xf32> to vector<2x16xf32>
    %180 = arith.addf %177, %179 : vector<2x16xf32>
    %181 = arith.negf %180 : vector<2x16xf32>
    %182 = math.exp %181 : vector<2x16xf32>
    %cst_78 = arith.constant 1.000000e+00 : f32
    %183 = vector.broadcast %cst_78 : f32 to vector<2x16xf32>
    %184 = arith.addf %183, %182 : vector<2x16xf32>
    %185 = arith.divf %183, %184 : vector<2x16xf32>
    %186 = arith.truncf %174 : vector<2x128xf32> to vector<2x128xbf16>
    %c0_79 = arith.constant 0 : index
    %c0_80 = arith.constant 0 : index
    %187 = vector.load %arg11[%c0_79, %c0_80] : memref<128x64xbf16, #tpu.memory_space<vmem>>, vector<128x64xbf16>
    %cst_81 = arith.constant dense<0.000000e+00> : vector<2x64xf32>
    %188 = tpu.matmul %186, %187, %cst_81 {dimension_numbers = #tpu.dot_dimension_numbers<[1], [0], [0], [1], [0, 0, 1, 1], [], []>} : vector<2x128xbf16>, vector<128x64xbf16>, vector<2x64xf32> -> vector<2x64xf32>
    %c0_82 = arith.constant 0 : index
    %c2816 = arith.constant 2816 : index
    %189 = vector.load %arg18[%c0_82, %c2816] : memref<1x3456xf32, #tpu.memory_space<vmem>>, vector<1x64xf32>
    %190 = vector.broadcast %189 : vector<1x64xf32> to vector<2x64xf32>
    %191 = arith.addf %188, %190 : vector<2x64xf32>
    %cst_83 = arith.constant 0.000000e+00 : f32
    %192 = vector.broadcast %cst_83 : f32 to vector<2x64xf32>
    %193 = arith.maximumf %191, %192 : vector<2x64xf32>
    %194 = arith.truncf %193 : vector<2x64xf32> to vector<2x64xbf16>
    %c0_84 = arith.constant 0 : index
    %c0_85 = arith.constant 0 : index
    %195 = vector.load %arg12[%c0_84, %c0_85] : memref<64x4xbf16, #tpu.memory_space<vmem>>, vector<64x4xbf16>
    %cst_86 = arith.constant dense<0.000000e+00> : vector<2x4xf32>
    %196 = tpu.matmul %194, %195, %cst_86 {dimension_numbers = #tpu.dot_dimension_numbers<[1], [0], [0], [1], [0, 0, 1, 1], [], []>} : vector<2x64xbf16>, vector<64x4xbf16>, vector<2x4xf32> -> vector<2x4xf32>
    %c0_87 = arith.constant 0 : index
    %c2944 = arith.constant 2944 : index
    %197 = vector.load %arg18[%c0_87, %c2944] : memref<1x3456xf32, #tpu.memory_space<vmem>>, vector<1x4xf32>
    %198 = vector.broadcast %197 : vector<1x4xf32> to vector<2x4xf32>
    %199 = arith.addf %196, %198 : vector<2x4xf32>
    %200 = arith.negf %199 : vector<2x4xf32>
    %201 = math.exp %200 : vector<2x4xf32>
    %cst_88 = arith.constant 1.000000e+00 : f32
    %202 = vector.broadcast %cst_88 : f32 to vector<2x4xf32>
    %203 = arith.addf %202, %201 : vector<2x4xf32>
    %204 = arith.divf %202, %203 : vector<2x4xf32>
    %205 = arith.truncf %9 : vector<2x32xf32> to vector<2x32xbf16>
    %c0_89 = arith.constant 0 : index
    %c0_90 = arith.constant 0 : index
    %206 = vector.load %arg13[%c0_89, %c0_90] : memref<32x192xbf16, #tpu.memory_space<vmem>>, vector<32x192xbf16>
    %cst_91 = arith.constant dense<0.000000e+00> : vector<2x192xf32>
    %207 = tpu.matmul %205, %206, %cst_91 {dimension_numbers = #tpu.dot_dimension_numbers<[1], [0], [0], [1], [0, 0, 1, 1], [], []>} : vector<2x32xbf16>, vector<32x192xbf16>, vector<2x192xf32> -> vector<2x192xf32>
    %c0_92 = arith.constant 0 : index
    %c3072 = arith.constant 3072 : index
    %208 = vector.load %arg18[%c0_92, %c3072] : memref<1x3456xf32, #tpu.memory_space<vmem>>, vector<1x192xf32>
    %209 = vector.broadcast %208 : vector<1x192xf32> to vector<2x192xf32>
    %210 = arith.addf %207, %209 : vector<2x192xf32>
    %211 = arith.truncf %11 : vector<2x32xf32> to vector<2x32xbf16>
    %c0_93 = arith.constant 0 : index
    %c0_94 = arith.constant 0 : index
    %212 = vector.load %arg13[%c0_93, %c0_94] : memref<32x192xbf16, #tpu.memory_space<vmem>>, vector<32x192xbf16>
    %cst_95 = arith.constant dense<0.000000e+00> : vector<2x192xf32>
    %213 = tpu.matmul %211, %212, %cst_95 {dimension_numbers = #tpu.dot_dimension_numbers<[1], [0], [0], [1], [0, 0, 1, 1], [], []>} : vector<2x32xbf16>, vector<32x192xbf16>, vector<2x192xf32> -> vector<2x192xf32>
    %c0_96 = arith.constant 0 : index
    %c3072_97 = arith.constant 3072 : index
    %214 = vector.load %arg18[%c0_96, %c3072_97] : memref<1x3456xf32, #tpu.memory_space<vmem>>, vector<1x192xf32>
    %215 = vector.broadcast %214 : vector<1x192xf32> to vector<2x192xf32>
    %216 = arith.addf %213, %215 : vector<2x192xf32>
    %217 = arith.truncf %173 : vector<2x32xf32> to vector<2x32xbf16>
    %c0_98 = arith.constant 0 : index
    %c0_99 = arith.constant 0 : index
    %218 = vector.load %arg13[%c0_98, %c0_99] : memref<32x192xbf16, #tpu.memory_space<vmem>>, vector<32x192xbf16>
    %cst_100 = arith.constant dense<0.000000e+00> : vector<2x192xf32>
    %219 = tpu.matmul %217, %218, %cst_100 {dimension_numbers = #tpu.dot_dimension_numbers<[1], [0], [0], [1], [0, 0, 1, 1], [], []>} : vector<2x32xbf16>, vector<32x192xbf16>, vector<2x192xf32> -> vector<2x192xf32>
    %c0_101 = arith.constant 0 : index
    %c3072_102 = arith.constant 3072 : index
    %220 = vector.load %arg18[%c0_101, %c3072_102] : memref<1x3456xf32, #tpu.memory_space<vmem>>, vector<1x192xf32>
    %221 = vector.broadcast %220 : vector<1x192xf32> to vector<2x192xf32>
    %222 = arith.addf %219, %221 : vector<2x192xf32>
    %223 = arith.truncf %28 : vector<2x32xf32> to vector<2x32xbf16>
    %c0_103 = arith.constant 0 : index
    %c0_104 = arith.constant 0 : index
    %224 = vector.load %arg13[%c0_103, %c0_104] : memref<32x192xbf16, #tpu.memory_space<vmem>>, vector<32x192xbf16>
    %cst_105 = arith.constant dense<0.000000e+00> : vector<2x192xf32>
    %225 = tpu.matmul %223, %224, %cst_105 {dimension_numbers = #tpu.dot_dimension_numbers<[1], [0], [0], [1], [0, 0, 1, 1], [], []>} : vector<2x32xbf16>, vector<32x192xbf16>, vector<2x192xf32> -> vector<2x192xf32>
    %c0_106 = arith.constant 0 : index
    %c3072_107 = arith.constant 3072 : index
    %226 = vector.load %arg18[%c0_106, %c3072_107] : memref<1x3456xf32, #tpu.memory_space<vmem>>, vector<1x192xf32>
    %227 = vector.broadcast %226 : vector<1x192xf32> to vector<2x192xf32>
    %228 = arith.addf %225, %227 : vector<2x192xf32>
    %cst_108 = arith.constant 1.000000e+00 : f32
    %229 = vector.broadcast %cst_108 : f32 to vector<2x4xf32>
    %230 = arith.subf %229, %204 : vector<2x4xf32>
    %231 = vector.extract_strided_slice %210 {offsets = [0, 128], sizes = [2, 32], strides = [1, 1]} : vector<2x192xf32> to vector<2x32xf32>
    %232 = vector.extract_strided_slice %230 {offsets = [0, 0], sizes = [2, 1], strides = [1, 1]} : vector<2x4xf32> to vector<2x1xf32>
    %233 = vector.broadcast %232 : vector<2x1xf32> to vector<2x32xf32>
    %234 = arith.mulf %231, %233 : vector<2x32xf32>
    %235 = vector.extract_strided_slice %216 {offsets = [0, 128], sizes = [2, 32], strides = [1, 1]} : vector<2x192xf32> to vector<2x32xf32>
    %236 = vector.extract_strided_slice %230 {offsets = [0, 1], sizes = [2, 1], strides = [1, 1]} : vector<2x4xf32> to vector<2x1xf32>
    %237 = vector.broadcast %236 : vector<2x1xf32> to vector<2x32xf32>
    %238 = arith.mulf %235, %237 : vector<2x32xf32>
    %239 = vector.extract_strided_slice %222 {offsets = [0, 128], sizes = [2, 32], strides = [1, 1]} : vector<2x192xf32> to vector<2x32xf32>
    %240 = vector.extract_strided_slice %230 {offsets = [0, 2], sizes = [2, 1], strides = [1, 1]} : vector<2x4xf32> to vector<2x1xf32>
    %241 = vector.broadcast %240 : vector<2x1xf32> to vector<2x32xf32>
    %242 = arith.mulf %239, %241 : vector<2x32xf32>
    %243 = vector.extract_strided_slice %228 {offsets = [0, 128], sizes = [2, 32], strides = [1, 1]} : vector<2x192xf32> to vector<2x32xf32>
    %244 = vector.extract_strided_slice %230 {offsets = [0, 3], sizes = [2, 1], strides = [1, 1]} : vector<2x4xf32> to vector<2x1xf32>
    %245 = vector.broadcast %244 : vector<2x1xf32> to vector<2x32xf32>
    %246 = arith.mulf %243, %245 : vector<2x32xf32>
    %247 = arith.addf %234, %238 : vector<2x32xf32>
    %248 = arith.addf %247, %242 : vector<2x32xf32>
    %249 = arith.addf %248, %246 : vector<2x32xf32>
    %cst_109 = arith.constant 2.500000e-01 : f32
    %250 = vector.broadcast %cst_109 : f32 to vector<2x32xf32>
    %251 = arith.mulf %249, %250 : vector<2x32xf32>
    %252 = vector.broadcast %0 : vector<2x1xf32> to vector<2x32xf32>
    %253 = arith.mulf %252, %251 : vector<2x32xf32>
    %cst_110 = arith.constant 1.000000e+00 : f32
    %254 = vector.broadcast %cst_110 : f32 to vector<2x1xf32>
    %255 = arith.subf %254, %0 : vector<2x1xf32>
    %cst_111 = arith.constant 0.333333343 : f32
    %256 = vector.broadcast %cst_111 : f32 to vector<2x32xf32>
    %257 = arith.mulf %248, %256 : vector<2x32xf32>
    %258 = vector.broadcast %255 : vector<2x1xf32> to vector<2x32xf32>
    %259 = arith.mulf %258, %257 : vector<2x32xf32>
    %260 = arith.addf %253, %259 : vector<2x32xf32>
    %c0_112 = arith.constant 0 : index
    %c0_113 = arith.constant 0 : index
    %261 = vector.load %arg14[%c0_112, %c0_113] : memref<32x128xf32, #tpu.memory_space<vmem>>, vector<32x128xf32>
    %c0_114 = arith.constant 0 : index
    %c0_115 = arith.constant 0 : index
    %262 = vector.load %arg15[%c0_114, %c0_115] : memref<128x4xf32, #tpu.memory_space<vmem>>, vector<128x4xf32>
    %cst_116 = arith.constant dense<0.000000e+00> : vector<2x128xf32>
    %263 = tpu.matmul %260, %261, %cst_116 {dimension_numbers = #tpu.dot_dimension_numbers<[1], [0], [0], [1], [0, 0, 1, 1], [], []>} : vector<2x32xf32>, vector<32x128xf32>, vector<2x128xf32> -> vector<2x128xf32>
    %264 = vector.extract_strided_slice %210 {offsets = [0, 0], sizes = [2, 128], strides = [1, 1]} : vector<2x192xf32> to vector<2x128xf32>
    %265 = arith.mulf %264, %263 : vector<2x128xf32>
    %cst_117 = arith.constant dense<0.000000e+00> : vector<2x4xf32>
    %266 = tpu.matmul %265, %262, %cst_117 {dimension_numbers = #tpu.dot_dimension_numbers<[1], [0], [0], [1], [0, 0, 1, 1], [], []>} : vector<2x128xf32>, vector<128x4xf32>, vector<2x4xf32> -> vector<2x4xf32>
    %267 = vector.extract_strided_slice %216 {offsets = [0, 0], sizes = [2, 128], strides = [1, 1]} : vector<2x192xf32> to vector<2x128xf32>
    %268 = arith.mulf %267, %263 : vector<2x128xf32>
    %cst_118 = arith.constant dense<0.000000e+00> : vector<2x4xf32>
    %269 = tpu.matmul %268, %262, %cst_118 {dimension_numbers = #tpu.dot_dimension_numbers<[1], [0], [0], [1], [0, 0, 1, 1], [], []>} : vector<2x128xf32>, vector<128x4xf32>, vector<2x4xf32> -> vector<2x4xf32>
    %270 = vector.extract_strided_slice %222 {offsets = [0, 0], sizes = [2, 128], strides = [1, 1]} : vector<2x192xf32> to vector<2x128xf32>
    %271 = arith.mulf %270, %263 : vector<2x128xf32>
    %cst_119 = arith.constant dense<0.000000e+00> : vector<2x4xf32>
    %272 = tpu.matmul %271, %262, %cst_119 {dimension_numbers = #tpu.dot_dimension_numbers<[1], [0], [0], [1], [0, 0, 1, 1], [], []>} : vector<2x128xf32>, vector<128x4xf32>, vector<2x4xf32> -> vector<2x4xf32>
    %273 = vector.extract_strided_slice %228 {offsets = [0, 0], sizes = [2, 128], strides = [1, 1]} : vector<2x192xf32> to vector<2x128xf32>
    %274 = arith.mulf %273, %263 : vector<2x128xf32>
    %cst_120 = arith.constant dense<0.000000e+00> : vector<2x4xf32>
    %275 = tpu.matmul %274, %262, %cst_120 {dimension_numbers = #tpu.dot_dimension_numbers<[1], [0], [0], [1], [0, 0, 1, 1], [], []>} : vector<2x128xf32>, vector<128x4xf32>, vector<2x4xf32> -> vector<2x4xf32>
    %cst_121 = arith.constant 5.000000e-01 : f32
    %276 = vector.broadcast %cst_121 : f32 to vector<2x1xf32>
    %277 = arith.cmpf olt, %0, %276 : vector<2x1xf32>
    %cst_122 = arith.constant -1.000000e+30 : f32
    %278 = vector.shape_cast %277 : vector<2x1xi1> to vector<2x1xi1>
    %279 = vector.broadcast %278 : vector<2x1xi1> to vector<2x4xi1>
    %280 = vector.broadcast %cst_122 : f32 to vector<2x4xf32>
    %281 = arith.select %279, %280, %275 : vector<2x4xi1>, vector<2x4xf32>
    %282 = arith.maximumf %266, %269 : vector<2x4xf32>
    %283 = arith.maximumf %272, %281 : vector<2x4xf32>
    %284 = arith.maximumf %282, %283 : vector<2x4xf32>
    %285 = arith.subf %266, %284 : vector<2x4xf32>
    %286 = math.exp %285 : vector<2x4xf32>
    %287 = arith.subf %269, %284 : vector<2x4xf32>
    %288 = math.exp %287 : vector<2x4xf32>
    %289 = arith.subf %272, %284 : vector<2x4xf32>
    %290 = math.exp %289 : vector<2x4xf32>
    %291 = arith.subf %281, %284 : vector<2x4xf32>
    %292 = math.exp %291 : vector<2x4xf32>
    %293 = arith.addf %286, %288 : vector<2x4xf32>
    %294 = arith.addf %293, %290 : vector<2x4xf32>
    %295 = arith.addf %294, %292 : vector<2x4xf32>
    %296 = arith.divf %286, %295 : vector<2x4xf32>
    %297 = arith.divf %288, %295 : vector<2x4xf32>
    %298 = arith.divf %290, %295 : vector<2x4xf32>
    %299 = arith.divf %292, %295 : vector<2x4xf32>
    %c0_123 = arith.constant 0 : index
    %c0_124 = arith.constant 0 : index
    %300 = vector.load %arg16[%c0_123, %c0_124] : memref<4x128xf32, #tpu.memory_space<vmem>>, vector<4x128xf32>
    %cst_125 = arith.constant 0.000000e+00 : f32
    %301 = vector.broadcast %cst_125 : f32 to vector<2x128xf32>
    %302 = vector.extract_strided_slice %210 {offsets = [0, 160], sizes = [2, 32], strides = [1, 1]} : vector<2x192xf32> to vector<2x32xf32>
    %cst_126 = arith.constant dense<0.000000e+00> : vector<2x128xf32>
    %303 = tpu.matmul %302, %261, %cst_126 {dimension_numbers = #tpu.dot_dimension_numbers<[1], [0], [0], [1], [0, 0, 1, 1], [], []>} : vector<2x32xf32>, vector<32x128xf32>, vector<2x128xf32> -> vector<2x128xf32>
    %cst_127 = arith.constant dense<0.000000e+00> : vector<2x128xf32>
    %304 = tpu.matmul %296, %300, %cst_127 {dimension_numbers = #tpu.dot_dimension_numbers<[1], [0], [0], [1], [0, 0, 1, 1], [], []>} : vector<2x4xf32>, vector<4x128xf32>, vector<2x128xf32> -> vector<2x128xf32>
    %305 = arith.mulf %304, %303 : vector<2x128xf32>
    %306 = arith.addf %301, %305 : vector<2x128xf32>
    %307 = vector.extract_strided_slice %216 {offsets = [0, 160], sizes = [2, 32], strides = [1, 1]} : vector<2x192xf32> to vector<2x32xf32>
    %cst_128 = arith.constant dense<0.000000e+00> : vector<2x128xf32>
    %308 = tpu.matmul %307, %261, %cst_128 {dimension_numbers = #tpu.dot_dimension_numbers<[1], [0], [0], [1], [0, 0, 1, 1], [], []>} : vector<2x32xf32>, vector<32x128xf32>, vector<2x128xf32> -> vector<2x128xf32>
    %cst_129 = arith.constant dense<0.000000e+00> : vector<2x128xf32>
    %309 = tpu.matmul %297, %300, %cst_129 {dimension_numbers = #tpu.dot_dimension_numbers<[1], [0], [0], [1], [0, 0, 1, 1], [], []>} : vector<2x4xf32>, vector<4x128xf32>, vector<2x128xf32> -> vector<2x128xf32>
    %310 = arith.mulf %309, %308 : vector<2x128xf32>
    %311 = arith.addf %306, %310 : vector<2x128xf32>
    %312 = vector.extract_strided_slice %222 {offsets = [0, 160], sizes = [2, 32], strides = [1, 1]} : vector<2x192xf32> to vector<2x32xf32>
    %cst_130 = arith.constant dense<0.000000e+00> : vector<2x128xf32>
    %313 = tpu.matmul %312, %261, %cst_130 {dimension_numbers = #tpu.dot_dimension_numbers<[1], [0], [0], [1], [0, 0, 1, 1], [], []>} : vector<2x32xf32>, vector<32x128xf32>, vector<2x128xf32> -> vector<2x128xf32>
    %cst_131 = arith.constant dense<0.000000e+00> : vector<2x128xf32>
    %314 = tpu.matmul %298, %300, %cst_131 {dimension_numbers = #tpu.dot_dimension_numbers<[1], [0], [0], [1], [0, 0, 1, 1], [], []>} : vector<2x4xf32>, vector<4x128xf32>, vector<2x128xf32> -> vector<2x128xf32>
    %315 = arith.mulf %314, %313 : vector<2x128xf32>
    %316 = arith.addf %311, %315 : vector<2x128xf32>
    %317 = vector.extract_strided_slice %228 {offsets = [0, 160], sizes = [2, 32], strides = [1, 1]} : vector<2x192xf32> to vector<2x32xf32>
    %cst_132 = arith.constant dense<0.000000e+00> : vector<2x128xf32>
    %318 = tpu.matmul %317, %261, %cst_132 {dimension_numbers = #tpu.dot_dimension_numbers<[1], [0], [0], [1], [0, 0, 1, 1], [], []>} : vector<2x32xf32>, vector<32x128xf32>, vector<2x128xf32> -> vector<2x128xf32>
    %cst_133 = arith.constant dense<0.000000e+00> : vector<2x128xf32>
    %319 = tpu.matmul %299, %300, %cst_133 {dimension_numbers = #tpu.dot_dimension_numbers<[1], [0], [0], [1], [0, 0, 1, 1], [], []>} : vector<2x4xf32>, vector<4x128xf32>, vector<2x128xf32> -> vector<2x128xf32>
    %320 = arith.mulf %319, %318 : vector<2x128xf32>
    %321 = arith.addf %316, %320 : vector<2x128xf32>
    %c0_134 = arith.constant 0 : index
    %c0_135 = arith.constant 0 : index
    %322 = vector.load %arg17[%c0_134, %c0_135] : memref<128x4xf32, #tpu.memory_space<vmem>>, vector<128x4xf32>
    %cst_136 = arith.constant dense<0.000000e+00> : vector<2x4xf32>
    %323 = tpu.matmul %321, %322, %cst_136 {dimension_numbers = #tpu.dot_dimension_numbers<[1], [0], [0], [1], [0, 0, 1, 1], [], []>} : vector<2x128xf32>, vector<128x4xf32>, vector<2x4xf32> -> vector<2x4xf32>
    %c0_137 = arith.constant 0 : index
    %c3328 = arith.constant 3328 : index
    %324 = vector.load %arg18[%c0_137, %c3328] : memref<1x3456xf32, #tpu.memory_space<vmem>>, vector<1x4xf32>
    %325 = vector.broadcast %324 : vector<1x4xf32> to vector<2x4xf32>
    %326 = arith.addf %323, %325 : vector<2x4xf32>
    %327 = arith.negf %326 : vector<2x4xf32>
    %328 = math.exp %327 : vector<2x4xf32>
    %cst_138 = arith.constant 1.000000e+00 : f32
    %329 = vector.broadcast %cst_138 : f32 to vector<2x4xf32>
    %330 = arith.addf %329, %328 : vector<2x4xf32>
    %331 = arith.divf %329, %330 : vector<2x4xf32>
    %c0_139 = arith.constant 0 : index
    %c0_140 = arith.constant 0 : index
    %332 = vector.load %arg19[%c0_139, %c0_140] : memref<2x512xf32, #tpu.memory_space<vmem>>, vector<2x128xf32>
    tpu.vector_store %arg19[%c0_139, %c0_140], %174 {strides = array<i32>} : memref<2x512xf32, #tpu.memory_space<vmem>>, vector<2x128xf32>,
    %c0_141 = arith.constant 0 : index
    %c128_142 = arith.constant 128 : index
    %333 = vector.load %arg19[%c0_141, %c128_142] : memref<2x512xf32, #tpu.memory_space<vmem>>, vector<2x128xf32>
    tpu.vector_store %arg19[%c0_141, %c128_142], %321 {strides = array<i32>} : memref<2x512xf32, #tpu.memory_space<vmem>>, vector<2x128xf32>,
    %334 = tpu.concatenate %50, %72, %94, %115 in 1 : vector<2x32xf32>, vector<2x32xf32>, vector<2x32xf32>, vector<2x32xf32> -> vector<2x128xf32>
    %c0_143 = arith.constant 0 : index
    %c256 = arith.constant 256 : index
    %335 = vector.load %arg19[%c0_143, %c256] : memref<2x512xf32, #tpu.memory_space<vmem>>, vector<2x128xf32>
    tpu.vector_store %arg19[%c0_143, %c256], %334 {strides = array<i32>} : memref<2x512xf32, #tpu.memory_space<vmem>>, vector<2x128xf32>,
    %336 = tpu.concatenate %296, %297, %298, %299 in 1 : vector<2x4xf32>, vector<2x4xf32>, vector<2x4xf32>, vector<2x4xf32> -> vector<2x16xf32>
    %cst_144 = arith.constant 0.000000e+00 : f32
    %337 = vector.broadcast %cst_144 : f32 to vector<2x88xf32>
    %338 = tpu.concatenate %185, %204, %336, %331, %337 in 1 : vector<2x16xf32>, vector<2x4xf32>, vector<2x16xf32>, vector<2x4xf32>, vector<2x88xf32> -> vector<2x128xf32>
    %c0_145 = arith.constant 0 : index
    %c384 = arith.constant 384 : index
    %339 = vector.load %arg19[%c0_145, %c384] : memref<2x512xf32, #tpu.memory_space<vmem>>, vector<2x128xf32>
    tpu.vector_store %arg19[%c0_145, %c384], %338 {strides = array<i32>} : memref<2x512xf32, #tpu.memory_space<vmem>>, vector<2x128xf32>,
    return
  }
  func.func @transform_0(%arg0: i32) -> (i32, i32) {
    %c0_i32 = arith.constant 0 : i32
    %c0_i32_0 = arith.constant 0 : i32
    return %arg0, %c0_i32 : i32, i32
  }
  func.func @transform_1(%arg0: i32) -> (i32, i32) {
    %c0_i32 = arith.constant 0 : i32
    %c0_i32_0 = arith.constant 0 : i32
    return %arg0, %c0_i32 : i32, i32
  }
  func.func @transform_2(%arg0: i32) -> (i32, i32) {
    %c0_i32 = arith.constant 0 : i32
    %c0_i32_0 = arith.constant 0 : i32
    return %arg0, %c0_i32 : i32, i32
  }
  func.func @transform_3(%arg0: i32) -> (i32, i32) {
    %c0_i32 = arith.constant 0 : i32
    %c0_i32_0 = arith.constant 0 : i32
    %c0_i32_1 = arith.constant 0 : i32
    return %c0_i32, %c0_i32_0 : i32, i32
  }
  func.func @transform_4(%arg0: i32) -> (i32, i32) {
    %c0_i32 = arith.constant 0 : i32
    %c0_i32_0 = arith.constant 0 : i32
    %c0_i32_1 = arith.constant 0 : i32
    return %c0_i32, %c0_i32_0 : i32, i32
  }
  func.func @transform_5(%arg0: i32) -> (i32, i32) {
    %c0_i32 = arith.constant 0 : i32
    %c0_i32_0 = arith.constant 0 : i32
    %c0_i32_1 = arith.constant 0 : i32
    return %c0_i32, %c0_i32_0 : i32, i32
  }
  func.func @transform_6(%arg0: i32) -> (i32, i32) {
    %c0_i32 = arith.constant 0 : i32
    %c0_i32_0 = arith.constant 0 : i32
    %c0_i32_1 = arith.constant 0 : i32
    return %c0_i32, %c0_i32_0 : i32, i32
  }
  func.func @transform_7(%arg0: i32) -> (i32, i32) {
    %c0_i32 = arith.constant 0 : i32
    %c0_i32_0 = arith.constant 0 : i32
    %c0_i32_1 = arith.constant 0 : i32
    return %c0_i32, %c0_i32_0 : i32, i32
  }
  func.func @transform_8(%arg0: i32) -> (i32, i32) {
    %c0_i32 = arith.constant 0 : i32
    %c0_i32_0 = arith.constant 0 : i32
    %c0_i32_1 = arith.constant 0 : i32
    return %c0_i32, %c0_i32_0 : i32, i32
  }
  func.func @transform_9(%arg0: i32) -> (i32, i32) {
    %c0_i32 = arith.constant 0 : i32
    %c0_i32_0 = arith.constant 0 : i32
    %c0_i32_1 = arith.constant 0 : i32
    return %c0_i32, %c0_i32_0 : i32, i32
  }
  func.func @transform_10(%arg0: i32) -> (i32, i32) {
    %c0_i32 = arith.constant 0 : i32
    %c0_i32_0 = arith.constant 0 : i32
    %c0_i32_1 = arith.constant 0 : i32
    return %c0_i32, %c0_i32_0 : i32, i32
  }
  func.func @transform_11(%arg0: i32) -> (i32, i32) {
    %c0_i32 = arith.constant 0 : i32
    %c0_i32_0 = arith.constant 0 : i32
    %c0_i32_1 = arith.constant 0 : i32
    return %c0_i32, %c0_i32_0 : i32, i32
  }
  func.func @transform_12(%arg0: i32) -> (i32, i32) {
    %c0_i32 = arith.constant 0 : i32
    %c0_i32_0 = arith.constant 0 : i32
    %c0_i32_1 = arith.constant 0 : i32
    return %c0_i32, %c0_i32_0 : i32, i32
  }
  func.func @transform_13(%arg0: i32) -> (i32, i32) {
    %c0_i32 = arith.constant 0 : i32
    %c0_i32_0 = arith.constant 0 : i32
    %c0_i32_1 = arith.constant 0 : i32
    return %c0_i32, %c0_i32_0 : i32, i32
  }
  func.func @transform_14(%arg0: i32) -> (i32, i32) {
    %c0_i32 = arith.constant 0 : i32
    %c0_i32_0 = arith.constant 0 : i32
    %c0_i32_1 = arith.constant 0 : i32
    return %c0_i32, %c0_i32_0 : i32, i32
  }
  func.func @transform_15(%arg0: i32) -> (i32, i32) {
    %c0_i32 = arith.constant 0 : i32
    %c0_i32_0 = arith.constant 0 : i32
    %c0_i32_1 = arith.constant 0 : i32
    return %c0_i32, %c0_i32_0 : i32, i32
  }
  func.func @transform_16(%arg0: i32) -> (i32, i32) {
    %c0_i32 = arith.constant 0 : i32
    %c0_i32_0 = arith.constant 0 : i32
    %c0_i32_1 = arith.constant 0 : i32
    return %c0_i32, %c0_i32_0 : i32, i32
  }
  func.func @transform_17(%arg0: i32) -> (i32, i32) {
    %c0_i32 = arith.constant 0 : i32
    %c0_i32_0 = arith.constant 0 : i32
    %c0_i32_1 = arith.constant 0 : i32
    return %c0_i32, %c0_i32_0 : i32, i32
  }
  func.func @transform_18(%arg0: i32) -> (i32, i32) {
    %c0_i32 = arith.constant 0 : i32
    %c0_i32_0 = arith.constant 0 : i32
    return %arg0, %c0_i32 : i32, i32
  }
}

</mosaic_0001>

<bundles_post_ra>
// kernel: forward.1
= control target key start
LH: loop header
LB: loop body
LE: loop exit
PB: predicated region body
PF: predicated region fallthrough
CT: control target
= control target key end

     0   :  { %vm312_vm0 = vcmask 1043456   ;;  %v5829_v1 = vmov 0   ;;  %v5830_v4 = vmov 0.0   ;;  %vm5831_vm1 = vmmov 0   ;;  %s5832_s21 = smov 96   ;;  %s5833_s27 = smov 64   ;;  %s7233_s4 = inlined_call_operand.vmem [shape: bf16[8,2048], index: 4, kind: input, shape index: {}]   ;;  %s7234_s1 = inlined_call_operand.vmem [shape: f32[2,8], index: 1, kind: input, shape index: {}]   ;;  %s7235_s3 = inlined_call_operand.vmem [shape: bf16[128,128], index: 3, kind: input, shape index: {}]   ;;  %s7236_s5 = inlined_call_operand.vmem [shape: bf16[2048,64], index: 5, kind: input, shape index: {}]   ;;  %s7237_s0 = inlined_call_operand.vmem [shape: f32[2,128], index: 0, kind: input, shape index: {}]   ;;  %s7238_s2 = inlined_call_operand.vmem [shape: f32[2,1], index: 2, kind: input, shape index: {}]   ;;  %s7239_s17 = inlined_call_operand.vmem [shape: f32[1,3456], index: 17, kind: input, shape index: {}]   ;;  %s7240_s6 = inlined_call_operand.vmem [shape: bf16[32,64], index: 6, kind: input, shape index: {}]   ;;  %s7241_s7 = inlined_call_operand.vmem [shape: bf16[64,32], index: 7, kind: input, shape index: {}]   ;;  %s7242_s8 = inlined_call_operand.vmem [shape: bf16[32,32], index: 8, kind: input, shape index: {}]   ;;  %s7243_s9 = inlined_call_operand.vmem [shape: bf16[128,16], index: 9, kind: input, shape index: {}]   ;;  %s7244_s10 = inlined_call_operand.vmem [shape: bf16[128,64], index: 10, kind: input, shape index: {}]   ;;  %s7245_s12 = inlined_call_operand.vmem [shape: bf16[32,192], index: 12, kind: input, shape index: {}]   ;;  %s7246_s11 = inlined_call_operand.vmem [shape: bf16[64,4], index: 11, kind: input, shape index: {}]   ;;  %s7247_s18 = inlined_call_operand.vmem [shape: f32[2,512], index: 18, kind: output, shape index: {}]   ;;  %s7248_s13 = inlined_call_operand.vmem [shape: f32[32,128], index: 13, kind: input, shape index: {}]   ;;  %s7249_s14 = inlined_call_operand.vmem [shape: f32[128,4], index: 14, kind: input, shape index: {}]   ;;  %s7250_s15 = inlined_call_operand.vmem [shape: f32[4,128], index: 15, kind: input, shape index: {}]   ;;  %s7251_s16 = inlined_call_operand.vmem [shape: f32[128,4], index: 16, kind: input, shape index: {}]  }
   0x1   :  { %7254 = sst [smem:[#allocation2_spill]] %s7233_s4  ;;  %393 = vmatprep.mubr.bf16.mxu1 %v5829_v1  ;;  %5006 = vmatprep.subr.bf16.mxu0 %v5830_v4  ;;  %vm308_vm2 = vcmask 64512   ;;  %v61_v36 = vld [vmem:[%s7237_s0] sm:$0x3]  ;;  %v5610_v49 = vld [vmem:[%s7236_s5 + $0x48] sm:$0xff]   ;;  %v5612_v51 = vld [vmem:[%s7236_s5 + $0x50] sm:$0xff]  }
   0x2   :  { %7255 = sst [smem:[#allocation3_spill]] %s7234_s1  ;;  %s7257_s29 = sld [smem:[#allocation2_spill]]  ;;  %5022 = vmatprep.mubr.msk.bf16.mxu0 %vm5831_vm1, %v5830_v4  ;;  %5579 = vset.pattern.permute.xlu1 %v5829_v1  ;;  %v62_v44 = vpack.c.bf16 %v61_v36, %v61_v36  ;;  %v5608_v46 = vld [vmem:[%s7236_s5 + $0x40] sm:$0xff]   ;;  %v5611_v50 = vld [vmem:[%s7236_s5 + $0x8] sm:$0xff]   ;;  %v5614_v54 = vld [vmem:[%s7236_s5 + $0x10] sm:$0xff]   ;;  %vm2096_vm3 = vcmask 261120  }
   0x3   :  { %7256 = sst [smem:[#allocation4_spill]] %s7235_s3  ;;  %s7258_s19 = sld [smem:[#allocation3_spill]]  ;;  %5578 = vset.pattern.permute.xlu0 %v5829_v1  ;;  %v5613_v47 = vld [vmem:[%s7236_s5 + $0xc0] sm:$0xff]   ;;  %v5617_v53 = vld [vmem:[%s7236_s5 + $0xc8] sm:$0xff]   ;;  %v5616_v55 = vld [vmem:[%s7236_s5 + $0x58] sm:$0xff]   ;;  %vm2181_vm4 = vcmask 523264  }
   0x4   :  { %s7259_s24 = sld [smem:[#allocation4_spill]]  ;;  %v5609_v48 = vld [vmem:[%s7236_s5] sm:$0xff]   ;;  %v5619_v56 = vld [vmem:[%s7236_s5 + $0x88] sm:$0xff]   ;;  %v5621_v57 = vld [vmem:[%s7236_s5 + $0xd0] sm:$0xff]   ;;  %s5834_s20 = smov 32   ;;  %vm2674_vm5 = vcmask 785408  }
   0x5   :  { %v5615_v52 = vld [vmem:[%s7236_s5 + $0x80] sm:$0xff]   ;;  %v5618_v58 = vld [vmem:[%s7236_s5 + $0x18] sm:$0xff]   ;;  %v5623_v60 = vld [vmem:[%s7236_s5 + $0x90] sm:$0xff]   ;;  %vm3728_vm8 = vcmask 31744   ;;  %vm4381_vm9 = vcmask 97280   ;;  %s5844_s30 = smov 36  }
   0x6   :  { %v5620_v59 = vld [vmem:[%s7236_s5 + $0x60] sm:$0xff]   ;;  %v5625_v61 = vld [vmem:[%s7236_s5 + $0xd8] sm:$0xff]   ;;  %v5624_v63 = vld [vmem:[%s7236_s5 + $0x68] sm:$0xff]   ;;  %vm4395_vm10 = vcmask 130048   ;;  %vm4397_vm11 = vcmask 162816   ;;  %vm4399_vm12 = vcmask 293888  }
   0x7   :  { %v5622_v62 = vld [vmem:[%s7236_s5 + $0x20] sm:$0xff]   ;;  %vm4401_vm13 = vcmask 326656  }
   0x8   :  { %v176_v0 = vld [vmem:[%s7257_s29] sm:$0xff]  ;;  %v177_v3 = vld [vmem:[%s7257_s29 + $0x8] sm:$0xff]  ;;  %v178_v9 = vld [vmem:[%s7257_s29 + $0x10] sm:$0xff] }
   0x9   :  { %v174_v2 = vld [vmem:[%s7258_s19] sm:$0x3]  ;;  %v4418_v5 = vcombine.high %v176_v0, %v176_v0  ;;  %v4417_v6 = vcombine.low %v176_v0, %v176_v0  ;;  %v4420_v7 = vcombine.high %v177_v3, %v177_v3  ;;  %v4419_v8 = vcombine.low %v177_v3, %v177_v3  ;;  %v179_v18 = vld [vmem:[%s7257_s29 + $0x18] sm:$0xff]  ;;  %v181_v28 = vld [vmem:[%s7257_s29 + $0x28] sm:$0xff] }
   0xa   :  { %v5590_v10 = vld [vmem:[%s7259_s24] sm:$0xff]   ;;  %v5963_v12 = vpack.c.bf16 %v174_v2, %v174_v2  ;;  %v4422_v14 = vcombine.high %v178_v9, %v178_v9  ;;  %v5592_v15 = vld [vmem:[%s7259_s24 + $0x8] sm:$0xff]   ;;  %v4421_v16 = vcombine.low %v178_v9, %v178_v9  ;;  %v5594_v17 = vld [vmem:[%s7259_s24 + $0x10] sm:$0xff]   ;;  %v4424_v20 = vcombine.high %v179_v18, %v179_v18 }
   0xb   :  { %4433 = vmatprep.subr.msk.bf16.mxu1 %vm312_vm0, %v4418_v5  ;;  %v314_v11 = vsel %vm312_vm0, %v4417_v6, 0  ;;  %5007 = vmatpush3.bf16.msra.mxu0 %v5590_v10  ;;  %v320_v13 = vsel %vm312_vm0, %v4419_v8, 0  ;;  %v5595_v21 = vld [vmem:[%s7259_s24 + $0x18] sm:$0xff]   ;;  %v4423_v22 = vcombine.low %v179_v18, %v179_v18  ;;  %v5596_v23 = vld [vmem:[%s7259_s24 + $0x20] sm:$0xff]   ;;  %v5597_v26 = vld [vmem:[%s7259_s24 + $0x28] sm:$0xff]   ;;  %v4427_v33 = vcombine.low %v181_v28, %v181_v28 }
   0xc   :  { %362 = vmatpush1.bf16.msra.mxu1 %v314_v11  ;;  %5008 = vmatprep.subr.bf16.mxu0 %v5830_v4  ;;  %v326_v19 = vsel %vm312_vm0, %v4421_v16, 0  ;;  %v180_v24 = vld [vmem:[%s7257_s29 + $0x20] sm:$0xff]  ;;  %v182_v29 = vld [vmem:[%s7257_s29 + $0x30] sm:$0xff]  ;;  %v183_v30 = vld [vmem:[%s7257_s29 + $0x38] sm:$0xff]  ;;  %v4428_v40 = vcombine.high %v181_v28, %v181_v28 }
   0xd   :  { %4435 = vmatprep.subr.msk.bf16.mxu1 %vm312_vm0, %v4420_v7  ;;  %v332_v25 = vsel %vm312_vm0, %v4423_v22, 0  ;;  %v4426_v27 = vcombine.high %v180_v24, %v180_v24  ;;  %v5598_v31 = vld [vmem:[%s7259_s24 + $0x30] sm:$0xff]   ;;  %v4425_v32 = vcombine.low %v180_v24, %v180_v24  ;;  %v4429_v34 = vcombine.low %v182_v29, %v182_v29  ;;  %v5601_v38 = vld [vmem:[%s7259_s24 + $0x38] sm:$0xff]   ;;  %v5626_v2 = vld [vmem:[%s7236_s5 + $0x28] sm:$0xff]   ;;  %s5842_s24 = smov 12  }
   0xe   :  { %v4431_v35 = vcombine.low %v183_v30, %v183_v30  ;;  %v4430_v39 = vcombine.high %v182_v29, %v182_v29  ;;  %v344_v41 = vsel %vm312_vm0, %v4427_v33, 0  ;;  %v4432_v45 = vcombine.high %v183_v30, %v183_v30  ;;  %v5627_v0 = vld [vmem:[%s7236_s5 + $0x98] sm:$0xff]   ;;  %v5628_v3 = vld [vmem:[%s7236_s5 + $0x70] sm:$0xff]   ;;  %v5629_v5 = vld [vmem:[%s7236_s5 + $0xe0] sm:$0xff]  }
   0xf   :  { %4434 = vmatmul.mubr.msk.bf16.vlgmr.msra.gmra.mrb[0].mxu1 %vm308_vm2, %v5963_v12  ;;  %5009 = vmatpush3.bf16.msra.mxu0 %v5592_v15  ;;  %v338_v37 = vsel %vm312_vm0, %v4425_v32, 0  ;;  %v350_v42 = vsel %vm312_vm0, %v4429_v34, 0  ;;  %v5630_v6 = vld [vmem:[%s7236_s5 + $0x30] sm:$0xff]   ;;  %v5631_v7 = vld [vmem:[%s7236_s5 + $0xa0] sm:$0xff]   ;;  %v5632_v8 = vld [vmem:[%s7236_s5 + $0x78] sm:$0xff]  }
  0x10   :  { %403 = vmatpush1.bf16.msra.mxu1 %v320_v13  ;;  %434 = vmatprep.mubr.bf16.mxu1 %v5829_v1  ;;  %v356_v43 = vsel %vm312_vm0, %v4431_v35, 0  ;;  %v5633_v9 = vld [vmem:[%s7236_s5 + $0xe8] sm:$0xff]   ;;  %v5634_v10 = vld [vmem:[%s7236_s5 + $0x38] sm:$0xff]   ;;  %v5637_v13 = vld [vmem:[%s7236_s5 + $0x140] sm:$0xff]  }
  0x11   :  { %4437 = vmatprep.subr.msk.bf16.mxu1 %vm312_vm0, %v4422_v14  ;;  %5010 = vmatprep.subr.bf16.mxu0 %v5830_v4  ;;  %v5635_v11 = vld [vmem:[%s7236_s5 + $0xa8] sm:$0xff]   ;;  %v5638_v14 = vld [vmem:[%s7236_s5 + $0xb0] sm:$0xff]   ;;  %v5640_v15 = vld [vmem:[%s7236_s5 + $0xf8] sm:$0xff]  }
  0x12   :  { %v5642_v16 = vld [vmem:[%s7236_s5 + $0xb8] sm:$0xff]   ;;  %v6153_v18 = vld [vmem:[%s7238_s2] sm:$0x3] }
  0x13   :  { %5011 = vmatpush3.bf16.msra.mxu0 %v5594_v17  ;;  %v5645_v17 = vld [vmem:[%s7236_s5 + $0x1c0] sm:$0xff]  }
  0x14   :  { %5012 = vmatprep.subr.bf16.mxu0 %v5830_v4 }
  0x17   :  { %4436 = vmatmul.mubr.msk.bf16.vlgmr.msra.gmra.mrb[4].mxu1 %vm308_vm2, %v5963_v12  ;;  %5013 = vmatpush3.bf16.msra.mxu0 %v5595_v21 }
  0x18   :  { %444 = vmatpush1.bf16.msra.mxu1 %v326_v19  ;;  %475 = vmatprep.mubr.bf16.mxu1 %v5829_v1  ;;  %v2649_v19 = vsub.f32 1.0, %v6153_v18 }
  0x19   :  { %4439 = vmatprep.subr.msk.bf16.mxu1 %vm312_vm0, %v4424_v20  ;;  %5014 = vmatprep.subr.bf16.mxu0 %v5830_v4  ;;  %v188_v20 = vlaneseq }
  0x1a   :  { %2652 = vperm.xlu1 %5579, %v2649_v19   ;;  %v5656_v19 = vld [vmem:[%s7236_s5 + $0x168] sm:$0xff]  }
  0x1b   :  { %5015 = vmatpush3.bf16.msra.mxu0 %v5596_v23  ;;  %v6156_v21 = vshrl.u32 %v188_v20, 7  ;;  %v6162_v23 = vld [vmem:[%s7239_s17 + $0x9] sm:$0xff]  ;;  %v5657_v20 = vld [vmem:[%s7236_s5 + $0x1d8] sm:$0xff]  }
  0x1c   :  { %5016 = vmatprep.subr.bf16.mxu0 %v5830_v4 }
  0x1d   :  { %v214_v22 = vsub.s32 6, %v6156_v21  ;;  %v198_v33 = vsub.s32 2, %v6156_v21  ;;  %v202_v36 = vsub.s32 3, %v6156_v21 }
  0x1f   :  { %4438 = vmatmul.mubr.msk.bf16.vlgmr.msra.gmra.mrb[8].mxu1 %vm308_vm2, %v5963_v12  ;;  %5017 = vmatpush3.bf16.msra.mxu0 %v5597_v26  ;;  %v6167_v24 = vrot.slane %v6162_v23, %v214_v22  ;;  %v6175_v26 = vld [vmem:[%s7239_s17 + $0x1] sm:$0xff] }
  0x20   :  { %485 = vmatpush1.bf16.msra.mxu1 %v332_v25  ;;  %516 = vmatprep.mubr.bf16.mxu1 %v5829_v1  ;;  %v6170_v25 = vsub.s32 0, %v6156_v21 }
  0x21   :  { %4441 = vmatprep.subr.msk.bf16.mxu1 %vm312_vm0, %v4426_v27  ;;  %5018 = vmatprep.subr.bf16.mxu0 %v5830_v4  ;;  %v6178_v27 = vsub.s32 1, %v6156_v21 }
  0x22   :  { %v191_v28 = vrot.slane %v6175_v26, %v6170_v25 }
  0x23   :  { %5019 = vmatpush3.bf16.msra.mxu0 %v5598_v31  ;;  %v195_v29 = vrot.slane %v6175_v26, %v6178_v27 }
  0x24   :  { %5020 = vmatprep.subr.bf16.mxu0 %v5830_v4 }
  0x27   :  { %4440 = vmatmul.mubr.msk.bf16.vlgmr.msra.gmra.mrb[12].mxu1 %vm308_vm2, %v5963_v12  ;;  %5021 = vmatpush3.bf16.msra.mxu0 %v5601_v38 }
  0x28   :  { %526 = vmatpush1.bf16.msra.mxu1 %v338_v37  ;;  %557 = vmatprep.mubr.bf16.mxu1 %v5829_v1 }
  0x29   :  { %4445 = vmatprep.subr.msk.bf16.mxu1 %vm312_vm0, %v4430_v39  ;;  %4443 = vmatprep.subr.msk.bf16.mxu0 %vm312_vm0, %v4428_v40  ;;  %v199_v40 = vrot.slane %v6175_v26, %v198_v33 }
  0x2a   :  { %5023 = vmatmul.mubr.bf16.vlgmr.msra.gmra.mrb[0].mxu0 %v62_v44 }
  0x2b   :  { %567 = vmatpush1.bf16.msra.mxu0 %v344_v41  ;;  %598 = vmatprep.mubr.bf16.mxu0 %v5829_v1 }
  0x2c   :  { %4447 = vmatprep.subr.msk.bf16.mxu0 %vm312_vm0, %v4432_v45  ;;  %v5641_v45 = vld [vmem:[%s7236_s5 + $0x148] sm:$0xff]  }
  0x2f   :  { %4442 = vmatmul.mubr.msk.bf16.vlgmr.msra.gmra.mrb[16].mxu1 %vm308_vm2, %v5963_v12 }
  0x30   :  { %608 = vmatpush1.bf16.msra.mxu1 %v350_v42  ;;  %639 = vmatprep.mubr.bf16.mxu1 %v5829_v1  ;;  %v203_v42 = vrot.slane %v6175_v26, %v202_v36 }
  0x31   :  { %4656 = vmatprep.subr.bf16.mxu1 %v5608_v46 }
  0x32   :  { %4444 = vmatmul.mubr.msk.bf16.vlgmr.msra.gmra.mrb[4].mxu0 %vm308_vm2, %v5963_v12 }
  0x33   :  { %649 = vmatpush1.bf16.msra.mxu0 %v356_v43  ;;  %680 = vmatprep.mubr.bf16.mxu0 %v5829_v1  ;;  %v5639_v43 = vld [vmem:[%s7236_s5 + $0x100] sm:$0xff]  }
  0x34   :  { %4678 = vmatprep.subr.bf16.mxu0 %v5613_v47 }
  0x37   :  { %4446 = vmatmul.mubr.msk.bf16.vlgmr.msra.gmra.mrb[20].mxu1 %vm308_vm2, %v5963_v12 }
  0x38   :  { %4657 = vmatpush3.bf16.msra.mxu1 %v5609_v48 }
  0x39   :  { %4658 = vmatprep.subr.bf16.mxu1 %v5610_v49 }
  0x3a   :  { %4448 = vmatmul.mubr.msk.bf16.vlgmr.msra.gmra.mrb[8].mxu0 %vm308_vm2, %v5963_v12  ;;  %v5636_v12 = vld [vmem:[%s7236_s5 + $0xf0] sm:$0xff]  }
  0x3b   :  { %4679 = vmatpush3.bf16.msra.mxu0 %v5615_v52  ;;  %v210_v52 = vsub.s32 5, %v6156_v21 }
  0x3c   :  { %4659 = vmatpush3.bf16.msra.mxu1 %v5611_v50  ;;  %4680 = vmatprep.subr.bf16.mxu0 %v5617_v53  ;;  %v5643_v50 = vld [vmem:[%s7236_s5 + $0x108] sm:$0xff]  }
  0x3d   :  { %4660 = vmatprep.subr.bf16.mxu1 %v5612_v51 }
  0x3f   :  { %4681 = vmatpush3.bf16.msra.mxu0 %v5619_v56 }
  0x40   :  { %4661 = vmatpush3.bf16.msra.mxu1 %v5614_v54  ;;  %4682 = vmatprep.subr.bf16.mxu0 %v5621_v57  ;;  %v5644_v54 = vld [vmem:[%s7236_s5 + $0x150] sm:$0xff]  }
  0x41   :  { %4662 = vmatprep.subr.bf16.mxu1 %v5616_v55 }
  0x43   :  { %4683 = vmatpush3.bf16.msra.mxu0 %v5623_v60  ;;  %v5647_v60 = vld [vmem:[%s7236_s5 + $0x180] sm:$0xff]  }
  0x44   :  { %4663 = vmatpush3.bf16.msra.mxu1 %v5618_v58  ;;  %4684 = vmatprep.subr.bf16.mxu0 %v5625_v61  ;;  %v211_v61 = vrot.slane %v6175_v26, %v210_v52 }
  0x45   :  { %4664 = vmatprep.subr.bf16.mxu1 %v5620_v59  ;;  %v5646_v59 = vld [vmem:[%s7236_s5 + $0x110] sm:$0xff]  }
  0x47   :  { %4685 = vmatpush3.bf16.msra.mxu0 %v5627_v0 }
  0x48   :  { %4665 = vmatpush3.bf16.msra.mxu1 %v5622_v62  ;;  %4686 = vmatprep.subr.bf16.mxu0 %v5629_v5  ;;  %v5648_v62 = vld [vmem:[%s7236_s5 + $0x158] sm:$0xff]   ;;  %v5651_v5 = vld [vmem:[%s7236_s5 + $0x188] sm:$0xff]  }
  0x49   :  { %4666 = vmatprep.subr.bf16.mxu1 %v5624_v63  ;;  %v5649_v63 = vld [vmem:[%s7236_s5 + $0x1c8] sm:$0xff]  }
  0x4b   :  { %4687 = vmatpush3.bf16.msra.mxu0 %v5631_v7 }
  0x4c   :  { %4667 = vmatpush3.bf16.msra.mxu1 %v5626_v2  ;;  %4688 = vmatprep.subr.bf16.mxu0 %v5633_v9  ;;  %v5652_v9 = vld [vmem:[%s7236_s5 + $0x160] sm:$0xff]  }
  0x4d   :  { %4668 = vmatprep.subr.bf16.mxu1 %v5628_v3  ;;  %v5650_v3 = vld [vmem:[%s7236_s5 + $0x118] sm:$0xff]  }
  0x4f   :  { %4689 = vmatpush3.bf16.msra.mxu0 %v5635_v11 }
  0x50   :  { %4669 = vmatpush3.bf16.msra.mxu1 %v5630_v6  ;;  %4690 = vmatprep.subr.bf16.mxu0 %v5636_v12 }
  0x51   :  { %4670 = vmatprep.subr.bf16.mxu1 %v5632_v8  ;;  %v218_v8 = vsub.s32 7, %v6156_v21 }
  0x53   :  { %4691 = vmatpush3.bf16.msra.mxu0 %v5638_v14  ;;  %v5654_v14 = vld [vmem:[%s7236_s5 + $0x120] sm:$0xff]  }
  0x54   :  { %4671 = vmatpush3.bf16.msra.mxu1 %v5634_v10  ;;  %4692 = vmatprep.subr.bf16.mxu0 %v5640_v15  ;;  %v5653_v10 = vld [vmem:[%s7236_s5 + $0x1d0] sm:$0xff]  }
  0x55   :  { %4700 = vmatprep.subr.bf16.mxu1 %v5637_v13  ;;  %v206_v13 = vsub.s32 4, %v6156_v21  ;;  %v5655_v15 = vld [vmem:[%s7236_s5 + $0x190] sm:$0xff]   ;;  %v5705_v21 = vld [vmem:[%s7236_s5 + $0x348] sm:$0xff]  }
  0x57   :  { %4693 = vmatpush3.bf16.msra.mxu0 %v5642_v16 }
  0x58   :  { %4722 = vmatprep.subr.bf16.mxu0 %v5645_v17  ;;  %v219_v17 = vrot.slane %v6175_v26, %v218_v8 }
  0xe2   :  { %v395_v30 = vpop.f32.mrb[0].mxu1 }
  0xe3   :  { %v396_v31 = vadd.f32 %v395_v30, %v191_v28  ;;  %v397_v32 = vpop.f32.mrb[1].mxu1 }
  0xe4   :  { %v398_v34 = vadd.f32 %v397_v32, %v195_v29  ;;  %v399_v35 = vpop.f32.mrb[2].mxu1  ;;  %v207_v29 = vrot.slane %v6175_v26, %v206_v13  ;;  %v5659_v32 = vld [vmem:[%s7236_s5 + $0x198] sm:$0xff]  }
  0xe5   :  { %v689_v37 = vmax.f32 %v396_v31, 0.0  ;;  %v400_v38 = vpop.f32.mrb[3].mxu1  ;;  %v5658_v31 = vld [vmem:[%s7236_s5 + $0x128] sm:$0xff]  }
  0xe6   :  { %v690_v39 = vmax.f32 %v398_v34, 0.0  ;;  %v5661_v38 = vld [vmem:[%s7236_s5 + $0x1e0] sm:$0xff]  }
  0xe7   :  { %v705_v44 = vpack.c.bf16 %v689_v37, %v689_v37  ;;  %v5660_v37 = vld [vmem:[%s7236_s5 + $0x170] sm:$0xff]  }
  0xe8   :  { %v706_v41 = vpack.c.bf16 %v690_v39, %v690_v39 }
  0xea   :  { %v436_v46 = vpop.f32.mrb[4].mxu1  ;;  %1784 = vmatprep.mubr.bf16.mxu1 %v706_v41 }
  0xeb   :  { %v437_v47 = vadd.f32 %v436_v46, %v199_v40  ;;  %v438_v48 = vpop.f32.mrb[5].mxu1  ;;  %1785 = vmatmul.mubr.bf16.vlgmr.msra.gmra.mrb[24].mxu1 %v705_v44  ;;  %v4408_v40 = vld [vmem:[%s7239_s17] ss:$0 sm:$0xff]  ;;  %v5662_v44 = vld [vmem:[%s7236_s5 + $0x130] sm:$0xff]  }
  0xec   :  { %v439_v49 = vadd.f32 %v438_v48, %v203_v42  ;;  %4701 = vmatpush3.bf16.msra.mxu1 %v5639_v43  ;;  %v440_v51 = vpop.f32.mrb[6].mxu1 }
  0xed   :  { %v691_v53 = vmax.f32 %v437_v47, 0.0  ;;  %4702 = vmatprep.subr.bf16.mxu1 %v5641_v45  ;;  %v441_v55 = vpop.f32.mrb[7].mxu1  ;;  %v5663_v45 = vld [vmem:[%s7236_s5 + $0x1a0] sm:$0xff]   ;;  %v227_v47 = vrot.slane %v6162_v23, %v6178_v27  ;;  %v5665_v51 = vld [vmem:[%s7236_s5 + $0x1e8] sm:$0xff]  }
  0xee   :  { %v692_v56 = vmax.f32 %v439_v49, 0.0 }
  0xef   :  { %v707_v57 = vpack.c.bf16 %v691_v53, %v691_v53 }
  0xf0   :  { %v708_v58 = vpack.c.bf16 %v692_v56, %v692_v56  ;;  %4703 = vmatpush3.bf16.msra.mxu1 %v5643_v50  ;;  %v5664_v50 = vld [vmem:[%s7236_s5 + $0x178] sm:$0xff]  }
  0xf1   :  { %4704 = vmatprep.subr.bf16.mxu1 %v5644_v54 }
  0xf2   :  { %1824 = vmatprep.mubr.bf16.mxu0 %v708_v58  ;;  %v477_v0 = vpop.f32.mrb[8].mxu1  ;;  %v215_v58 = vrot.slane %v6175_v26, %v214_v22  ;;  %v5668_v22 = vld [vmem:[%s7236_s5 + $0x1f0] sm:$0xff]   ;;  %v5669_v26 = vld [vmem:[%s7236_s5 + $0x240] sm:$0xff]  }
  0xf3   :  { %1825 = vmatmul.mubr.bf16.vlgmr.msra.gmra.mrb[12].mxu0 %v707_v57  ;;  %v479_v2 = vpop.f32.mrb[9].mxu1  ;;  %v478_v42 = vadd.f32 %v477_v0, %v207_v29  ;;  %v231_v0 = vrot.slane %v6162_v23, %v198_v33 }
  0xf4   :  { %4705 = vmatpush3.bf16.msra.mxu1 %v5646_v59  ;;  %4723 = vmatpush3.bf16.msra.mxu0 %v5647_v60  ;;  %v480_v6 = vadd.f32 %v479_v2, %v211_v61  ;;  %v481_v7 = vpop.f32.mrb[10].mxu1  ;;  %v5666_v60 = vld [vmem:[%s7236_s5 + $0x138] sm:$0xff]   ;;  %v5667_v61 = vld [vmem:[%s7236_s5 + $0x1a8] sm:$0xff]  }
  0xf5   :  { %4706 = vmatprep.subr.bf16.mxu1 %v5648_v62  ;;  %4724 = vmatprep.subr.bf16.mxu0 %v5649_v63  ;;  %v482_v11 = vpop.f32.mrb[11].mxu1  ;;  %v693_v57 = vmax.f32 %v478_v42, 0.0  ;;  %v5679_v42 = vld [vmem:[%s7236_s5 + $0x280] sm:$0xff]  }
  0xf6   :  { %v694_v12 = vmax.f32 %v480_v6, 0.0 }
  0xf7   :  { %v709_v33 = vpack.c.bf16 %v693_v57, %v693_v57  ;;  %v5687_v57 = vld [vmem:[%s7236_s5 + $0x290] sm:$0xff]  }
  0xf8   :  { %4707 = vmatpush3.bf16.msra.mxu1 %v5650_v3  ;;  %4725 = vmatpush3.bf16.msra.mxu0 %v5651_v5  ;;  %v710_v16 = vpack.c.bf16 %v694_v12, %v694_v12  ;;  %v235_v5 = vrot.slane %v6162_v23, %v202_v36  ;;  %v5671_v36 = vld [vmem:[%s7236_s5 + $0x200] sm:$0xff]  }
  0xf9   :  { %4708 = vmatprep.subr.bf16.mxu1 %v5652_v9  ;;  %4726 = vmatprep.subr.bf16.mxu0 %v5653_v10  ;;  %v239_v9 = vrot.slane %v6162_v23, %v206_v13  ;;  %v5670_v10 = vld [vmem:[%s7236_s5 + $0x1b0] sm:$0xff]   ;;  %v5673_v13 = vld [vmem:[%s7236_s5 + $0x248] sm:$0xff]  }
  0xfa   :  { %v518_v28 = vpop.f32.mrb[12].mxu1  ;;  %1864 = vmatprep.mubr.bf16.mxu1 %v710_v16 }
  0xfb   :  { %v520_v30 = vpop.f32.mrb[13].mxu1  ;;  %v519_v6 = vadd.f32 %v518_v28, %v215_v58  ;;  %v5688_v58 = vld [vmem:[%s7236_s5 + $0x268] sm:$0xff]  }
  0xfc   :  { %4709 = vmatpush3.bf16.msra.mxu1 %v5654_v14  ;;  %4727 = vmatpush3.bf16.msra.mxu0 %v5655_v15  ;;  %v521_v34 = vadd.f32 %v520_v30, %v219_v17  ;;  %v522_v35 = vpop.f32.mrb[14].mxu1  ;;  %v5672_v14 = vld [vmem:[%s7236_s5 + $0x1f8] sm:$0xff]  }
  0xfd   :  { %4710 = vmatprep.subr.bf16.mxu1 %v5656_v19  ;;  %4728 = vmatprep.subr.bf16.mxu0 %v5657_v20  ;;  %v523_v39 = vpop.f32.mrb[15].mxu1  ;;  %v168_v43 = vpop.f32.mrb[0].mxu0  ;;  %v695_v28 = vmax.f32 %v519_v6, 0.0  ;;  %v5677_v35 = vld [vmem:[%s7236_s5 + $0x2c0] sm:$0xff]   ;;  %v5698_v6 = vld [vmem:[%s7236_s5 + $0x238] sm:$0xff]  }
  0xfe   :  { %v696_v41 = vmax.f32 %v521_v34, 0.0  ;;  %v169_v48 = vadd.f32 %v4408_v40, %v168_v43  ;;  %v5024_v49 = vpop.f32.mrb[1].mxu0 }
  0xff   :  { %v171_v53 = vpop.f32.mrb[2].mxu0  ;;  %v711_v39 = vpack.c.bf16 %v695_v28, %v695_v28  ;;  %v5708_v28 = vld [vmem:[%s7236_s5 + $0x350] sm:$0xff]  }
 0x100   :  { %4711 = vmatpush3.bf16.msra.mxu1 %v5658_v31  ;;  %4729 = vmatpush3.bf16.msra.mxu0 %v5659_v32  ;;  %v712_v46 = vpack.c.bf16 %v696_v41, %v696_v41  ;;  %v6283_v55 = vpack.c.bf16 %v169_v48, %v169_v48  ;;  %v5025_v56 = vpop.f32.mrb[3].mxu0  ;;  %v5674_v31 = vld [vmem:[%s7236_s5 + $0x1b8] sm:$0xff]   ;;  %v5675_v32 = vld [vmem:[%s7236_s5 + $0x208] sm:$0xff]   ;;  %v5678_v41 = vld [vmem:[%s7236_s5 + $0x210] sm:$0xff]  }
 0x101   :  { %4712 = vmatprep.subr.bf16.mxu1 %v5660_v37  ;;  %4730 = vmatprep.subr.bf16.mxu0 %v5661_v38  ;;  %v5685_v53 = vld [vmem:[%s7236_s5 + $0x2d0] sm:$0xff]   ;;  %v5686_v56 = vld [vmem:[%s7236_s5 + $0x220] sm:$0xff]  }
 0x102   :  { %1904 = vmatprep.mubr.bf16.mxu0 %v712_v46  ;;  %v6281_v54 = vpop.f32.mrb[16].mxu1  ;;  %2658 = vrot.lane.b32.xlu1 %v169_v48, %s5832_s21  ;;  %v5681_v46 = vld [vmem:[%s7236_s5 + $0x2c8] sm:$0xff]  }
 0x103   :  { %v561_v59 = vpop.f32.mrb[17].mxu1  ;;  %2294 = vrot.lane.b32.xlu0 %v6283_v55, %s5833_s27 }
 0x104   :  { %4713 = vmatpush3.bf16.msra.mxu1 %v5662_v44  ;;  %4731 = vmatpush3.bf16.msra.mxu0 %v5663_v45  ;;  %v562_v62 = vadd.f32 %v561_v59, %v227_v47  ;;  %v563_v63 = vpop.f32.mrb[18].mxu1  ;;  %v5680_v45 = vld [vmem:[%s7236_s5 + $0x258] sm:$0xff]  }
 0x105   :  { %4714 = vmatprep.subr.bf16.mxu1 %v5664_v50  ;;  %4732 = vmatprep.subr.bf16.mxu0 %v5665_v51  ;;  %v564_v2 = vpop.f32.mrb[19].mxu1  ;;  %v600_v7 = vpop.f32.mrb[4].mxu0  ;;  %v5683_v50 = vld [vmem:[%s7236_s5 + $0x288] sm:$0xff]   ;;  %v5684_v51 = vld [vmem:[%s7236_s5 + $0x260] sm:$0xff]   ;;  %v5689_v59 = vld [vmem:[%s7236_s5 + $0x2d8] sm:$0xff]  }
 0x106   :  { %v698_v3 = vmax.f32 %v562_v62, 0.0  ;;  %2661 = vrot.lane.b32.xlu1 %v169_v48, %s5833_s27  ;;  %v6319_v11 = vadd.f32 %v600_v7, %v231_v0  ;;  %v602_v12 = vpop.f32.mrb[5].mxu0  ;;  %v5691_v62 = vld [vmem:[%s7236_s5 + $0x298] sm:$0xff]   ;;  %v5692_v63 = vld [vmem:[%s7236_s5 + $0x270] sm:$0xff]   ;;  %v5693_v0 = vld [vmem:[%s7236_s5 + $0x2e0] sm:$0xff]  }
 0x107   :  { %v604_v15 = vpop.f32.mrb[6].mxu0  ;;  %v603_v17 = vadd.f32 %v602_v12, %v235_v5  ;;  %2645 = vperm.xlu0 %5578, %v6153_v18   ;;  %v5676_v18 = vld [vmem:[%s7236_s5 + $0x250] sm:$0xff]   ;;  %v5696_v5 = vld [vmem:[%s7236_s5 + $0x278] sm:$0xff]   ;;  %v5699_v7 = vld [vmem:[%s7236_s5 + $0x2a8] sm:$0xff]   ;;  %v251_v12 = vrot.slane %v6162_v23, %v218_v8 }
 0x108   :  { %4715 = vmatpush3.bf16.msra.mxu1 %v5666_v60  ;;  %4733 = vmatpush3.bf16.msra.mxu0 %v5667_v61  ;;  %v714_v16 = vpack.c.bf16 %v698_v3, %v698_v3  ;;  %v605_v20 = vpop.f32.mrb[7].mxu0  ;;  %v223_v60 = vrot.slane %v6162_v23, %v6170_v25  ;;  %v5690_v61 = vld [vmem:[%s7236_s5 + $0x228] sm:$0xff]   ;;  %v5694_v2 = vld [vmem:[%s7236_s5 + $0x230] sm:$0xff]   ;;  %v5695_v3 = vld [vmem:[%s7236_s5 + $0x2a0] sm:$0xff]  }
 0x109   :  { %4734 = vmatprep.subr.bf16.mxu0 %v5668_v22  ;;  %4744 = vmatprep.subr.bf16.mxu1 %v5669_v26  ;;  %v700_v38 = vmax.f32 %v603_v17, 0.0  ;;  %v243_v22 = vrot.slane %v6162_v23, %v210_v52  ;;  %v5697_v52 = vld [vmem:[%s7236_s5 + $0x2e8] sm:$0xff]   ;;  %v5703_v15 = vld [vmem:[%s7236_s5 + $0x300] sm:$0xff]   ;;  %v699_v17 = vmax.f32 %v6319_v11, 0.0 }
 0x10a   :  { %v641_v19 = vpop.f32.mrb[20].mxu1  ;;  %v560_v26 = vadd.f32 %v6281_v54, %v223_v60  ;;  %v5707_v20 = vld [vmem:[%s7236_s5 + $0x308] sm:$0xff]   ;;  %v5709_v11 = vld [vmem:[%s7236_s5 + $0x3c0] sm:$0xff]   ;;  %v5732_v60 = vld [vmem:[%s7236_s5 + $0x3f0] sm:$0xff]  }
 0x10b   :  { %1865 = vmatmul.mubr.bf16.vlgmr.msra.gmra.mrb[28].mxu1 %v709_v33  ;;  %v6328_v29 = vadd.f32 %v641_v19, %v239_v9  ;;  %v6330_v30 = vpop.f32.mrb[21].mxu1  ;;  %v716_v48 = vpack.c.bf16 %v700_v38, %v700_v38  ;;  %v5700_v9 = vld [vmem:[%s7236_s5 + $0x2f0] sm:$0xff]   ;;  %v5706_v19 = vld [vmem:[%s7236_s5 + $0x2b8] sm:$0xff]  }
 0x10c   :  { %4735 = vmatpush3.bf16.msra.mxu0 %v5670_v10  ;;  %4745 = vmatpush3.bf16.msra.mxu1 %v5671_v36  ;;  %v645_v34 = vpop.f32.mrb[22].mxu1  ;;  %v644_v54 = vadd.f32 %v6330_v30, %v243_v22  ;;  %v697_v33 = vmax.f32 %v560_v26, 0.0  ;;  %v5701_v10 = vld [vmem:[%s7236_s5 + $0x340] sm:$0xff]   ;;  %v5714_v38 = vld [vmem:[%s7236_s5 + $0x318] sm:$0xff]   ;;  %v6547_v26 = vld [vmem:[%s7240_s6 + $0x8] sm:$0xff]  }
 0x10d   :  { %4736 = vmatprep.subr.bf16.mxu0 %v5672_v14  ;;  %4746 = vmatprep.subr.bf16.mxu1 %v5673_v13  ;;  %v646_v37 = vpop.f32.mrb[23].mxu1  ;;  %v682_v40 = vpop.f32.mrb[8].mxu0  ;;  %v5702_v13 = vld [vmem:[%s7236_s5 + $0x2b0] sm:$0xff]   ;;  %v5711_v34 = vld [vmem:[%s7236_s5 + $0x380] sm:$0xff]   ;;  %v5736_v22 = vld [vmem:[%s7236_s5 + $0x3b8] sm:$0xff]  }
 0x10e   :  { %1944 = vmatprep.mubr.bf16.mxu1 %v714_v16  ;;  %v6351_v43 = vadd.f32 %v682_v40, %v6167_v24  ;;  %v6353_v44 = vpop.f32.mrb[9].mxu0  ;;  %v5682_v24 = vld [vmem:[%s7236_s5 + $0x218] sm:$0xff]   ;;  %v702_v36 = vmax.f32 %v644_v54, 0.0  ;;  %v713_v14 = vpack.c.bf16 %v697_v33, %v697_v33  ;;  %v5716_v40 = vld [vmem:[%s7236_s5 + $0x360] sm:$0xff]  }
 0x10f   :  { %v686_v47 = vpop.f32.mrb[10].mxu0  ;;  %v5704_v16 = vld [vmem:[%s7236_s5 + $0x2f8] sm:$0xff]   ;;  %v685_v8 = vadd.f32 %v6353_v44, %v251_v12  ;;  %v5719_v44 = vld [vmem:[%s7236_s5 + $0x390] sm:$0xff]  }
 0x110   :  { %4737 = vmatpush3.bf16.msra.mxu0 %v5674_v31  ;;  %4747 = vmatpush3.bf16.msra.mxu1 %v5675_v32  ;;  %v687_v49 = vpop.f32.mrb[11].mxu0  ;;  %v718_v23 = vpack.c.bf16 %v702_v36, %v702_v36  ;;  %v715_v31 = vpack.c.bf16 %v699_v17, %v699_v17  ;;  %v5710_v32 = vld [vmem:[%s7236_s5 + $0x310] sm:$0xff]   ;;  %v5722_v47 = vld [vmem:[%s7236_s5 + $0x328] sm:$0xff]  }
 0x111   :  { %4748 = vmatprep.subr.bf16.mxu1 %v5676_v18  ;;  %4766 = vmatprep.subr.bf16.mxu0 %v5677_v35  ;;  %v704_v30 = vmax.f32 %v685_v8, 0.0  ;;  %v5712_v18 = vld [vmem:[%s7236_s5 + $0x358] sm:$0xff]   ;;  %v5713_v35 = vld [vmem:[%s7236_s5 + $0x3c8] sm:$0xff]   ;;  %v5724_v49 = vld [vmem:[%s7236_s5 + $0x370] sm:$0xff]  }
 0x113   :  { %1905 = vmatmul.mubr.bf16.vlgmr.msra.gmra.mrb[16].mxu0 %v711_v39  ;;  %v720_v37 = vpack.c.bf16 %v704_v30, %v704_v30  ;;  %v5715_v39 = vld [vmem:[%s7236_s5 + $0x388] sm:$0xff]  }
 0x114   :  { %4749 = vmatpush3.bf16.msra.mxu1 %v5678_v41  ;;  %4767 = vmatpush3.bf16.msra.mxu0 %v5679_v42  ;;  %v5717_v41 = vld [vmem:[%s7236_s5 + $0x3d0] sm:$0xff]   ;;  %v5718_v42 = vld [vmem:[%s7236_s5 + $0x320] sm:$0xff]  }
 0x115   :  { %4750 = vmatprep.subr.bf16.mxu1 %v5680_v45  ;;  %4768 = vmatprep.subr.bf16.mxu0 %v5681_v46  ;;  %v5720_v45 = vld [vmem:[%s7236_s5 + $0x368] sm:$0xff]   ;;  %v5721_v46 = vld [vmem:[%s7236_s5 + $0x3d8] sm:$0xff]  }
 0x116   :  { %1984 = vmatprep.mubr.bf16.mxu0 %v716_v48  ;;  %v5723_v48 = vld [vmem:[%s7236_s5 + $0x398] sm:$0xff]  }
 0x118   :  { %4751 = vmatpush3.bf16.msra.mxu1 %v5682_v24  ;;  %4769 = vmatpush3.bf16.msra.mxu0 %v5683_v50  ;;  %v5725_v24 = vld [vmem:[%s7236_s5 + $0x3e0] sm:$0xff]   ;;  %v5726_v50 = vld [vmem:[%s7236_s5 + $0x330] sm:$0xff]  }
 0x119   :  { %4752 = vmatprep.subr.bf16.mxu1 %v5684_v51  ;;  %4770 = vmatprep.subr.bf16.mxu0 %v5685_v53  ;;  %v5727_v51 = vld [vmem:[%s7236_s5 + $0x3a0] sm:$0xff]   ;;  %v5728_v53 = vld [vmem:[%s7236_s5 + $0x378] sm:$0xff]  }
 0x11c   :  { %4753 = vmatpush3.bf16.msra.mxu1 %v5686_v56  ;;  %4771 = vmatpush3.bf16.msra.mxu0 %v5687_v57  ;;  %v5729_v56 = vld [vmem:[%s7236_s5 + $0x3e8] sm:$0xff]   ;;  %v5730_v57 = vld [vmem:[%s7236_s5 + $0x338] sm:$0xff]  }
 0x11d   :  { %4754 = vmatprep.subr.bf16.mxu1 %v5688_v58  ;;  %4772 = vmatprep.subr.bf16.mxu0 %v5689_v59  ;;  %v5731_v58 = vld [vmem:[%s7236_s5 + $0x3a8] sm:$0xff]   ;;  %v701_v59 = vmax.f32 %v6328_v29, 0.0  ;;  %v5735_v29 = vld [vmem:[%s7236_s5 + $0x3f8] sm:$0xff]  }
 0x120   :  { %4755 = vmatpush3.bf16.msra.mxu1 %v5690_v61  ;;  %4773 = vmatpush3.bf16.msra.mxu0 %v5691_v62  ;;  %v5733_v61 = vld [vmem:[%s7236_s5 + $0x3b0] sm:$0xff]   ;;  %v6533_v62 = vld [vmem:[%s7240_s6] sm:$0xff]   ;;  %s5840_s6 = smov 4  }
 0x121   :  { %4756 = vmatprep.subr.bf16.mxu1 %v5692_v63  ;;  %4774 = vmatprep.subr.bf16.mxu0 %v5693_v0  ;;  %v717_v63 = vpack.c.bf16 %v701_v59, %v701_v59  ;;  %v703_v0 = vmax.f32 %v6351_v43, 0.0 }
 0x123   :  { %v719_v43 = vpack.c.bf16 %v703_v0, %v703_v0 }
 0x124   :  { %4757 = vmatpush3.bf16.msra.mxu1 %v5694_v2  ;;  %4775 = vmatpush3.bf16.msra.mxu0 %v5695_v3  ;;  %v6564_v2 = vld [vmem:[%s7241_s7] sm:$0xff]   ;;  %v6571_v3 = vld [vmem:[%s7241_s7 + $0x8] sm:$0xff]  }
 0x125   :  { %4758 = vmatprep.subr.bf16.mxu1 %v5696_v5  ;;  %4776 = vmatprep.subr.bf16.mxu0 %v5697_v52  ;;  %v6578_v5 = vld [vmem:[%s7241_s7 + $0x10] sm:$0xff]   ;;  %v6585_v52 = vld [vmem:[%s7241_s7 + $0x18] sm:$0xff]  }
 0x128   :  { %4759 = vmatpush3.bf16.msra.mxu1 %v5698_v6  ;;  %4777 = vmatpush3.bf16.msra.mxu0 %v5699_v7 }
 0x129   :  { %4778 = vmatprep.subr.bf16.mxu0 %v5700_v9  ;;  %4788 = vmatprep.subr.bf16.mxu1 %v5701_v10  ;;  %v4449_v10 = vld [vmem:[%s7239_s17 + $0x11] ss:$0 sm:$0xff] }
 0x12b   :  { %1945 = vmatmul.mubr.bf16.vlgmr.msra.gmra.mrb[32].mxu1 %v713_v14 }
 0x12c   :  { %4779 = vmatpush3.bf16.msra.mxu0 %v5702_v13  ;;  %4789 = vmatpush3.bf16.msra.mxu1 %v5703_v15 }
 0x12d   :  { %4780 = vmatprep.subr.bf16.mxu0 %v5704_v16  ;;  %4790 = vmatprep.subr.bf16.mxu1 %v5705_v21 }
 0x12e   :  { %2024 = vmatprep.mubr.bf16.mxu1 %v718_v23 }
 0x130   :  { %4781 = vmatpush3.bf16.msra.mxu0 %v5706_v19  ;;  %4791 = vmatpush3.bf16.msra.mxu1 %v5707_v20 }
 0x131   :  { %4792 = vmatprep.subr.bf16.mxu1 %v5708_v28  ;;  %4810 = vmatprep.subr.bf16.mxu0 %v5709_v11 }
 0x133   :  { %1985 = vmatmul.mubr.bf16.vlgmr.msra.gmra.mrb[20].mxu0 %v715_v31 }
 0x134   :  { %4793 = vmatpush3.bf16.msra.mxu1 %v5710_v32  ;;  %4811 = vmatpush3.bf16.msra.mxu0 %v5711_v34 }
 0x135   :  { %4794 = vmatprep.subr.bf16.mxu1 %v5712_v18  ;;  %4812 = vmatprep.subr.bf16.mxu0 %v5713_v35 }
 0x136   :  { %2064 = vmatprep.mubr.bf16.mxu0 %v720_v37 }
 0x138   :  { %4795 = vmatpush3.bf16.msra.mxu1 %v5714_v38  ;;  %4813 = vmatpush3.bf16.msra.mxu0 %v5715_v39 }
 0x139   :  { %4796 = vmatprep.subr.bf16.mxu1 %v5716_v40  ;;  %4814 = vmatprep.subr.bf16.mxu0 %v5717_v41 }
 0x13c   :  { %4797 = vmatpush3.bf16.msra.mxu1 %v5718_v42  ;;  %4815 = vmatpush3.bf16.msra.mxu0 %v5719_v44 }
 0x13d   :  { %4798 = vmatprep.subr.bf16.mxu1 %v5720_v45  ;;  %4816 = vmatprep.subr.bf16.mxu0 %v5721_v46 }
 0x140   :  { %4799 = vmatpush3.bf16.msra.mxu1 %v5722_v47  ;;  %4817 = vmatpush3.bf16.msra.mxu0 %v5723_v48 }
 0x141   :  { %4800 = vmatprep.subr.bf16.mxu1 %v5724_v49  ;;  %4818 = vmatprep.subr.bf16.mxu0 %v5725_v24 }
 0x144   :  { %4801 = vmatpush3.bf16.msra.mxu1 %v5726_v50  ;;  %4819 = vmatpush3.bf16.msra.mxu0 %v5727_v51 }
 0x145   :  { %4802 = vmatprep.subr.bf16.mxu1 %v5728_v53  ;;  %4820 = vmatprep.subr.bf16.mxu0 %v5729_v56 }
 0x148   :  { %4803 = vmatpush3.bf16.msra.mxu1 %v5730_v57  ;;  %4821 = vmatpush3.bf16.msra.mxu0 %v5731_v58  ;;  %v6595_v57 = vld [vmem:[%s7239_s17 + $0x12] ss:$0 sm:$0xff] }
 0x149   :  { %4822 = vmatprep.subr.bf16.mxu0 %v5732_v60  ;;  %5026 = vmatprep.subr.bf16.mxu1 %v5830_v4 }
 0x14b   :  { %2025 = vmatmul.mubr.bf16.vlgmr.msra.gmra.mrb[36].mxu1 %v717_v63 }
 0x14c   :  { %4823 = vmatpush3.bf16.msra.mxu0 %v5733_v61  ;;  %5027 = vmatpush3.bf16.msra.mxu1 %v6533_v62 }
 0x14d   :  { %4824 = vmatprep.subr.bf16.mxu0 %v5735_v29  ;;  %5028 = vmatprep.subr.bf16.mxu1 %v5830_v4 }
 0x14e   :  { %5030 = vmatprep.mubr.msk.bf16.mxu1 %vm5831_vm1, %v5830_v4 }
 0x150   :  { %4825 = vmatpush3.bf16.msra.mxu0 %v5736_v22  ;;  %5029 = vmatpush3.bf16.msra.mxu1 %v6547_v26 }
 0x151   :  { %5034 = vmatprep.subr.bf16.mxu0 %v5830_v4  ;;  %5046 = vmatprep.subr.bf16.mxu1 %v5830_v4 }
 0x153   :  { %2065 = vmatmul.mubr.bf16.vlgmr.msra.gmra.mrb[24].mxu0 %v719_v43  ;;  %5031 = vmatmul.mubr.msk.bf16.vlgmr.msra.gmra.mrb[40].mxu1 %vm2096_vm3, %v6283_v55 }
 0x154   :  { %5042 = vmatprep.mubr.msk.bf16.mxu0 %vm5831_vm1, %v5830_v4  ;;  %5050 = vmatprep.mubr.msk.bf16.mxu1 %vm5831_vm1, %v5830_v4 }
 0x155   :  { %5035 = vmatpush3.bf16.msra.mxu0 %v6564_v2 }
 0x156   :  { %5036 = vmatprep.subr.bf16.mxu0 %v5830_v4 }
 0x159   :  { %5037 = vmatpush3.bf16.msra.mxu0 %v6571_v3 }
 0x15a   :  { %5038 = vmatprep.subr.bf16.mxu0 %v5830_v4 }
 0x15d   :  { %5039 = vmatpush3.bf16.msra.mxu0 %v6578_v5 }
 0x15e   :  { %5040 = vmatprep.subr.bf16.mxu0 %v5830_v4 }
 0x161   :  { %5041 = vmatpush3.bf16.msra.mxu0 %v6585_v52 }
 0x162   :  { %5062 = vmatprep.subr.bf16.mxu0 %v5830_v4 }
 0x1be   :  { %v4672_v54 = vpop.f32.mrb[24].mxu1 }
 0x1bf   :  { %v4673_v33 = vpop.f32.mrb[25].mxu1 }
 0x1c0   :  { %v4674_v6 = vadd.f32 %v4673_v33, %v4672_v54  ;;  %v4675_v7 = vpop.f32.mrb[26].mxu1 }
 0x1c1   :  { %v4676_v9 = vpop.f32.mrb[27].mxu1 }
 0x1c2   :  { %v1787_v14 = vadd.f32 %v4674_v6, %v4449_v10  ;;  %v6618_v9 = vld [vmem:[%s7242_s8] sm:$0xff]   ;;  %v5743_v10 = vld [vmem:[%s7242_s8 + $0x8] sm:$0xff]   ;;  %s5841_s8 = smov 16  }
 0x1c3   :  { %5047 = vmatpush3.bf16.msra.mxu1 %v6618_v9 }
 0x1c4   :  { %5048 = vmatprep.subr.bf16.mxu1 %v5830_v4 }
 0x1c6   :  { %v4694_v36 = vpop.f32.mrb[12].mxu0 }
 0x1c7   :  { %v4695_v12 = vpop.f32.mrb[13].mxu0  ;;  %5049 = vmatpush3.bf16.msra.mxu1 %v5743_v10 }
 0x1c8   :  { %v4696_v13 = vadd.f32 %v4695_v12, %v4694_v36  ;;  %v4697_v15 = vpop.f32.mrb[14].mxu0  ;;  %5054 = vmatprep.subr.bf16.mxu1 %v5830_v4  ;;  %v6629_v36 = vld [vmem:[%s7239_s17 + $0x13] ss:$0 sm:$0xff] }
 0x1c9   :  { %v4698_v16 = vpop.f32.mrb[15].mxu0 }
 0x1ca   :  { %v1827_v21 = vadd.f32 %v4696_v13, %v1787_v14 }
 0x1de   :  { %v4716_v23 = vpop.f32.mrb[28].mxu1 }
 0x1df   :  { %v4717_v8 = vpop.f32.mrb[29].mxu1 }
 0x1e0   :  { %v4718_v17 = vadd.f32 %v4717_v8, %v4716_v23  ;;  %v4719_v19 = vpop.f32.mrb[30].mxu1  ;;  %v2295_v8 = vpop.permute.xlu0 %2294 }
 0x1e1   :  { %v4720_v20 = vpop.f32.mrb[31].mxu1 }
 0x1e2   :  { %v1867_v28 = vadd.f32 %v4718_v17, %v1827_v21 }
 0x1e6   :  { %v4738_v11 = vpop.f32.mrb[16].mxu0 }
 0x1e7   :  { %v4739_v30 = vpop.f32.mrb[17].mxu0 }
 0x1e8   :  { %v4740_v31 = vadd.f32 %v4739_v30, %v4738_v11  ;;  %v4741_v32 = vpop.f32.mrb[18].mxu0 }
 0x1e9   :  { %v4742_v34 = vpop.f32.mrb[19].mxu0 }
 0x1ea   :  { %v1907_v18 = vadd.f32 %v4740_v31, %v1867_v28 }
 0x1fe   :  { %v4760_v35 = vpop.f32.mrb[32].mxu1 }
 0x1ff   :  { %v4761_v37 = vpop.f32.mrb[33].mxu1 }
 0x200   :  { %v4762_v38 = vadd.f32 %v4761_v37, %v4760_v35  ;;  %v4763_v39 = vpop.f32.mrb[34].mxu1 }
 0x201   :  { %v4764_v40 = vpop.f32.mrb[35].mxu1 }
 0x202   :  { %v1947_v41 = vadd.f32 %v4762_v38, %v1907_v18 }
 0x206   :  { %v4782_v42 = vpop.f32.mrb[20].mxu0 }
 0x207   :  { %v4783_v44 = vpop.f32.mrb[21].mxu0 }
 0x208   :  { %v4784_v45 = vadd.f32 %v4783_v44, %v4782_v42  ;;  %v4785_v46 = vpop.f32.mrb[22].mxu0 }
 0x209   :  { %v4786_v47 = vpop.f32.mrb[23].mxu0 }
 0x20a   :  { %v1987_v48 = vadd.f32 %v4784_v45, %v1947_v41 }
 0x21e   :  { %v4804_v49 = vpop.f32.mrb[36].mxu1 }
 0x21f   :  { %v4805_v24 = vpop.f32.mrb[37].mxu1 }
 0x220   :  { %v4806_v50 = vadd.f32 %v4805_v24, %v4804_v49  ;;  %v4807_v51 = vpop.f32.mrb[38].mxu1 }
 0x221   :  { %v4808_v53 = vpop.f32.mrb[39].mxu1 }
 0x222   :  { %v2027_v56 = vadd.f32 %v4806_v50, %v1987_v48 }
 0x226   :  { %v4826_v58 = vpop.f32.mrb[24].mxu0  ;;  %v2134_v59 = vpop.f32.mrb[40].mxu1 }
 0x227   :  { %v2135_v60 = vadd.f32 %v6595_v57, %v2134_v59  ;;  %v4827_v61 = vpop.f32.mrb[25].mxu0  ;;  %v5032_v63 = vpop.f32.mrb[41].mxu1 }
 0x228   :  { %v4828_v29 = vadd.f32 %v4827_v61, %v4826_v58  ;;  %v2137_v0 = vpop.f32.mrb[42].mxu1  ;;  %v4829_v22 = vpop.f32.mrb[26].mxu0  ;;  %v5745_v61 = vld [vmem:[%s7244_s10] sm:$0xff]   ;;  %v5746_v63 = vld [vmem:[%s7243_s9 + $0x8] sm:$0xff]  }
 0x229   :  { %v2140_v43 = vmax.f32 %v2135_v60, 0.0  ;;  %v5033_v54 = vpop.f32.mrb[43].mxu1  ;;  %v4830_v33 = vpop.f32.mrb[27].mxu0  ;;  %v5748_v0 = vld [vmem:[%s7243_s9 + $0x10] sm:$0xff]  }
 0x22a   :  { %v6598_v6 = vadd.f32 %v4828_v29, %v2027_v56  ;;  %v5747_v29 = vld [vmem:[%s7244_s10 + $0x8] sm:$0xff]   ;;  %v5749_v22 = vld [vmem:[%s7244_s10 + $0x10] sm:$0xff]   ;;  %v5751_v54 = vld [vmem:[%s7244_s10 + $0x18] sm:$0xff]  }
 0x22b   :  { %v2141_v7 = vpack.c.bf16 %v2140_v43, %v2140_v43  ;;  %v5750_v43 = vld [vmem:[%s7243_s9 + $0x18] sm:$0xff]   ;;  %v5752_v33 = vld [vmem:[%s7243_s9 + $0x20] sm:$0xff]  }
 0x22c   :  { %2669 = vrot.lane.b32.xlu1 %v6598_v6, %s5833_s27 }
 0x22d   :  { %5043 = vmatmul.mubr.msk.bf16.vlgmr.msra.gmra.mrb[28].mxu0 %vm2181_vm4, %v2141_v7  ;;  %v5754_v7 = vld [vmem:[%s7243_s9 + $0x28] sm:$0xff]  }
 0x22e   :  { %5063 = vmatpush3.bf16.msra.mxu0 %v6564_v2  ;;  %5070 = vmatprep.mubr.msk.bf16.mxu0 %vm5831_vm1, %v5830_v4 }
 0x22f   :  { %5064 = vmatprep.subr.bf16.mxu0 %v5830_v4 }
 0x230   :  { %3077 = vrot.lane.b32.xlu1 %v6283_v55, %s5834_s20 }
 0x232   :  { %5065 = vmatpush3.bf16.msra.mxu0 %v6571_v3 }
 0x233   :  { %5066 = vmatprep.subr.bf16.mxu0 %v5830_v4 }
 0x236   :  { %5067 = vmatpush3.bf16.msra.mxu0 %v6578_v5 }
 0x237   :  { %5068 = vmatprep.subr.bf16.mxu0 %v5830_v4 }
 0x23a   :  { %5069 = vmatpush3.bf16.msra.mxu0 %v6585_v52 }
 0x23b   :  { %5090 = vmatprep.subr.bf16.mxu0 %v5830_v4 }
 0x300   :  { %v2219_v12 = vpop.f32.mrb[28].mxu0 }
 0x301   :  { %v2220_v14 = vadd.f32 %v6629_v36, %v2219_v12  ;;  %v5044_v13 = vpop.f32.mrb[29].mxu0  ;;  %v4588_v12 = vld [vmem:[%s7239_s17 + $0x14] ss:$0 sm:$0xff] }
 0x302   :  { %v2222_v15 = vpop.f32.mrb[30].mxu0 }
 0x303   :  { %v2225_v16 = vmax.f32 %v2220_v14, 0.0  ;;  %v5045_v21 = vpop.f32.mrb[31].mxu0 }
 0x305   :  { %v2226_v23 = vpack.c.bf16 %v2225_v16, %v2225_v16 }
 0x307   :  { %5051 = vmatmul.mubr.msk.bf16.vlgmr.msra.gmra.mrb[44].mxu1 %vm2096_vm3, %v2226_v23 }
 0x308   :  { %5055 = vmatpush3.bf16.msra.mxu1 %v6533_v62  ;;  %5058 = vmatprep.mubr.msk.bf16.mxu1 %vm5831_vm1, %v5830_v4 }
 0x309   :  { %5056 = vmatprep.subr.bf16.mxu1 %v5830_v4 }
 0x30c   :  { %5057 = vmatpush3.bf16.msra.mxu1 %v6547_v26 }
 0x30d   :  { %5074 = vmatprep.subr.bf16.mxu1 %v5830_v4 }
 0x30f   :  { %5059 = vmatmul.mubr.msk.bf16.vlgmr.msra.gmra.mrb[48].mxu1 %vm2096_vm3, %v2295_v8 }
 0x310   :  { %5075 = vmatpush3.bf16.msra.mxu1 %v6618_v9  ;;  %5078 = vmatprep.mubr.msk.bf16.mxu1 %vm5831_vm1, %v5830_v4 }
 0x311   :  { %5076 = vmatprep.subr.bf16.mxu1 %v5830_v4 }
 0x314   :  { %5077 = vmatpush3.bf16.msra.mxu1 %v5743_v10 }
 0x315   :  { %5082 = vmatprep.subr.bf16.mxu1 %v5830_v4 }
 0x3da   :  { %v6645_v17 = vpop.f32.mrb[44].mxu1 }
 0x3db   :  { %v5052_v19 = vpop.f32.mrb[45].mxu1  ;;  %v6751_v13 = vadd.f32 %v4588_v12, %v6645_v17 }
 0x3dc   :  { %v2290_v20 = vpop.f32.mrb[46].mxu1 }
 0x3dd   :  { %v5053_v28 = vpop.f32.mrb[47].mxu1 }
 0x3e2   :  { %v2333_v11 = vpop.f32.mrb[48].mxu1 }
 0x3e3   :  { %v2334_v30 = vadd.f32 %v6595_v57, %v2333_v11  ;;  %v5060_v31 = vpop.f32.mrb[49].mxu1 }
 0x3e4   :  { %v2336_v32 = vpop.f32.mrb[50].mxu1 }
 0x3e5   :  { %v2339_v34 = vmax.f32 %v2334_v30, 0.0  ;;  %v5061_v18 = vpop.f32.mrb[51].mxu1 }
 0x3e7   :  { %v2340_v35 = vpack.c.bf16 %v2339_v34, %v2339_v34  ;;  %v2587_v34 = vmax.f32 %v6751_v13, 0.0 }
 0x3e9   :  { %5071 = vmatmul.mubr.msk.bf16.vlgmr.msra.gmra.mrb[32].mxu0 %vm2181_vm4, %v2340_v35 }
 0x3ea   :  { %5091 = vmatpush3.bf16.msra.mxu0 %v6564_v2  ;;  %5098 = vmatprep.mubr.msk.bf16.mxu0 %vm5831_vm1, %v5830_v4 }
 0x3eb   :  { %5092 = vmatprep.subr.bf16.mxu0 %v5830_v4 }
 0x3ee   :  { %5093 = vmatpush3.bf16.msra.mxu0 %v6571_v3  ;;  %v6668_v3 = vpack.c.bf16 %v6598_v6, %v6598_v6  ;;  %v5753_v6 = vld [vmem:[%s7244_s10 + $0x20] sm:$0xff]  }
 0x3ef   :  { %5094 = vmatprep.subr.bf16.mxu0 %v5830_v4 }
 0x3f2   :  { %5095 = vmatpush3.bf16.msra.mxu0 %v6578_v5 }
 0x3f3   :  { %5096 = vmatprep.subr.bf16.mxu0 %v5830_v4 }
 0x3f6   :  { %5097 = vmatpush3.bf16.msra.mxu0 %v6585_v52 }
 0x3f7   :  { %5130 = vmatprep.subr.bf16.mxu0 %v5830_v4 }
 0x4bc   :  { %v2378_v37 = vpop.f32.mrb[32].mxu0 }
 0x4bd   :  { %v2379_v2 = vadd.f32 %v6629_v36, %v2378_v37  ;;  %v5072_v38 = vpop.f32.mrb[33].mxu0 }
 0x4be   :  { %v2381_v39 = vpop.f32.mrb[34].mxu0 }
 0x4bf   :  { %v2384_v40 = vmax.f32 %v2379_v2, 0.0  ;;  %v5073_v41 = vpop.f32.mrb[35].mxu0 }
 0x4c1   :  { %v2385_v42 = vpack.c.bf16 %v2384_v40, %v2384_v40 }
 0x4c3   :  { %5079 = vmatmul.mubr.msk.bf16.vlgmr.msra.gmra.mrb[52].mxu1 %vm2096_vm3, %v2385_v42 }
 0x4c4   :  { %5083 = vmatpush3.bf16.msra.mxu1 %v6533_v62  ;;  %5086 = vmatprep.mubr.msk.bf16.mxu1 %vm5831_vm1, %v5830_v4 }
 0x4c5   :  { %5084 = vmatprep.subr.bf16.mxu1 %v5830_v4 }
 0x4c8   :  { %5085 = vmatpush3.bf16.msra.mxu1 %v6547_v26 }
 0x4c9   :  { %5102 = vmatprep.subr.bf16.mxu1 %v5830_v4 }
 0x4cb   :  { %5087 = vmatmul.mubr.msk.bf16.vlgmr.msra.gmra.mrb[56].mxu1 %vm2096_vm3, %v6668_v3 }
 0x4cc   :  { %5103 = vmatpush3.bf16.msra.mxu1 %v6618_v9  ;;  %5106 = vmatprep.mubr.msk.bf16.mxu1 %vm5831_vm1, %v5830_v4  ;;  %v5755_v9 = vld [vmem:[%s7244_s10 + $0x28] sm:$0xff]  }
 0x4cd   :  { %5104 = vmatprep.subr.bf16.mxu1 %v5830_v4 }
 0x4d0   :  { %5105 = vmatpush3.bf16.msra.mxu1 %v5743_v10  ;;  %v5756_v10 = vld [vmem:[%s7243_s9 + $0x30] sm:$0xff]  }
 0x4d1   :  { %5110 = vmatprep.subr.bf16.mxu1 %v5830_v4 }
 0x596   :  { %v6678_v62 = vpop.f32.mrb[52].mxu1 }
 0x597   :  { %v5080_v26 = vpop.f32.mrb[53].mxu1  ;;  %v6748_v14 = vadd.f32 %v4588_v12, %v6678_v62 }
 0x598   :  { %v2426_v5 = vpop.f32.mrb[54].mxu1 }
 0x599   :  { %v5081_v52 = vpop.f32.mrb[55].mxu1  ;;  %v2563_v15 = vadd.f32 %v6748_v14, %v6751_v13  ;;  %v2609_v16 = vmax.f32 %v6751_v13, %v6748_v14 }
 0x59b   :  { %v6757_v21 = vmax.f32 %v2563_v15, %v2609_v16  ;;  %v6759_v23 = vmax.f32 %v2609_v16, 0.0 }
 0x59d   :  { %v2611_v8 = vsub.f32 %v2563_v15, %v6757_v21  ;;  %v2627_v19 = vsub.f32 0.0, %v6759_v23  ;;  %v2615_v17 = vsub.f32 %v6751_v13, %v6757_v21  ;;  %v2631_v11 = vsub.f32 %v6751_v13, %v6759_v23 }
 0x59e   :  { %v2467_v44 = vpop.f32.mrb[56].mxu1  ;;  %v2619_v37 = vsub.f32 %v6748_v14, %v6757_v21  ;;  %v2635_v41 = vsub.f32 %v6748_v14, %v6759_v23 }
 0x59f   :  { %v2468_v45 = vadd.f32 %v6595_v57, %v2467_v44  ;;  %v5088_v46 = vpop.f32.mrb[57].mxu1  ;;  %v5744_v57 = vld [vmem:[%s7243_s9] sm:$0xff]   ;;  %v2612_v20 = vmul.f32 1.442695, %v2611_v8  ;;  %v2628_v28 = vmul.f32 1.442695, %v2627_v19 }
 0x5a0   :  { %v2470_v47 = vpop.f32.mrb[58].mxu1  ;;  %v2616_v35 = vmul.f32 1.442695, %v2615_v17  ;;  %v2632_v40 = vmul.f32 1.442695, %v2631_v11 }
 0x5a1   :  { %v2473_v48 = vmax.f32 %v2468_v45, 0.0  ;;  %v5089_v49 = vpop.f32.mrb[59].mxu1  ;;  %5770 = vpow2.f32 %v2612_v20  ;;  %v2620_v26 = vmul.f32 1.442695, %v2619_v37  ;;  %v2636_v44 = vmul.f32 1.442695, %v2635_v41 }
 0x5a2   :  { %5772 = vpow2.f32 %v2628_v28 }
 0x5a3   :  { %v2474_v24 = vpack.c.bf16 %v2473_v48, %v2473_v48  ;;  %5774 = vpow2.f32 %v2616_v35 }
 0x5a4   :  { %5776 = vpow2.f32 %v2632_v40 }
 0x5a5   :  { %5099 = vmatmul.mubr.msk.bf16.vlgmr.msra.gmra.mrb[36].mxu0 %vm2181_vm4, %v2474_v24  ;;  %5778 = vpow2.f32 %v2620_v26 }
 0x5a6   :  { %5146 = vmatprep.mubr.msk.bf16.mxu0 %vm5831_vm1, %v5830_v4  ;;  %5131 = vmatpush3.bf16.msra.mxu0 %v5745_v61  ;;  %5780 = vpow2.f32 %v2636_v44 }
 0x5a7   :  { %5132 = vmatprep.subr.bf16.mxu0 %v5830_v4 }
 0x5aa   :  { %5133 = vmatpush3.bf16.msra.mxu0 %v5747_v29 }
 0x5ab   :  { %5134 = vmatprep.subr.bf16.mxu0 %v5830_v4  ;;  %v5771_v48 = vpop.eup %5770 }
 0x5ac   :  { %v2614_v61 = vmul.f32 2.0, %v5771_v48 }
 0x5ae   :  { %5135 = vmatpush3.bf16.msra.mxu0 %v5749_v22 }
 0x5af   :  { %5136 = vmatprep.subr.bf16.mxu0 %v5830_v4 }
 0x5b2   :  { %5137 = vmatpush3.bf16.msra.mxu0 %v5751_v54 }
 0x5b3   :  { %5138 = vmatprep.subr.bf16.mxu0 %v5830_v4 }
 0x5b6   :  { %5139 = vmatpush3.bf16.msra.mxu0 %v5753_v6 }
 0x5b7   :  { %5140 = vmatprep.subr.bf16.mxu0 %v5830_v4 }
 0x5ba   :  { %5141 = vmatpush3.bf16.msra.mxu0 %v5755_v9 }
 0x5bb   :  { %5142 = vmatprep.subr.bf16.mxu0 %v5830_v4 }
 0x678   :  { %v2512_v50 = vpop.f32.mrb[36].mxu0 }
 0x679   :  { %v2513_v51 = vadd.f32 %v6629_v36, %v2512_v50  ;;  %v5100_v53 = vpop.f32.mrb[37].mxu0  ;;  %v5757_v36 = vld [vmem:[%s7244_s10 + $0x30] sm:$0xff]  }
 0x67a   :  { %v2515_v56 = vpop.f32.mrb[38].mxu0  ;;  %5143 = vmatpush3.bf16.msra.mxu0 %v5757_v36 }
 0x67b   :  { %v2518_v58 = vmax.f32 %v2513_v51, 0.0  ;;  %v5101_v59 = vpop.f32.mrb[39].mxu0  ;;  %5144 = vmatprep.subr.bf16.mxu0 %v5830_v4  ;;  %v5773_v51 = vpop.eup %5772 }
 0x67c   :  { %v2630_v29 = vmul.f32 2.0, %v5773_v51  ;;  %v5775_v22 = vpop.eup %5774 }
 0x67d   :  { %v2519_v60 = vpack.c.bf16 %v2518_v58, %v2518_v58 }
 0x67f   :  { %5107 = vmatmul.mubr.msk.bf16.vlgmr.msra.gmra.mrb[60].mxu1 %vm2096_vm3, %v2519_v60 }
 0x680   :  { %5126 = vmatprep.mubr.msk.bf16.mxu1 %vm5831_vm1, %v5830_v4  ;;  %5111 = vmatpush3.bf16.msra.mxu1 %v5744_v57 }
 0x681   :  { %5112 = vmatprep.subr.bf16.mxu1 %v5830_v4 }
 0x684   :  { %5113 = vmatpush3.bf16.msra.mxu1 %v5746_v63 }
 0x685   :  { %5114 = vmatprep.subr.bf16.mxu1 %v5830_v4 }
 0x688   :  { %5115 = vmatpush3.bf16.msra.mxu1 %v5748_v0 }
 0x689   :  { %5116 = vmatprep.subr.bf16.mxu1 %v5830_v4 }
 0x68c   :  { %5117 = vmatpush3.bf16.msra.mxu1 %v5750_v43  ;;  %v5777_v43 = vpop.eup %5776 }
 0x68d   :  { %5118 = vmatprep.subr.bf16.mxu1 %v5830_v4  ;;  %v2634_v6 = vadd.f32 %v5777_v43, %v2630_v29  ;;  %v5765_v43 = vld [vmem:[%s7245_s12 + $0x10] ss:$8 sps:$4 sm:$0xff]  }
 0x690   :  { %5119 = vmatpush3.bf16.msra.mxu1 %v5752_v33  ;;  %v2618_v33 = vadd.f32 %v5775_v22, %v2614_v61 }
 0x691   :  { %5120 = vmatprep.subr.bf16.mxu1 %v5830_v4 }
 0x694   :  { %5121 = vmatpush3.bf16.msra.mxu1 %v5754_v7  ;;  %v5779_v7 = vpop.eup %5778 }
 0x695   :  { %5122 = vmatprep.subr.bf16.mxu1 %v5830_v4  ;;  %v5781_v9 = vpop.eup %5780 }
 0x698   :  { %5123 = vmatpush3.bf16.msra.mxu1 %v5756_v10  ;;  %v2622_v10 = vadd.f32 %v5779_v7, %v2618_v33  ;;  %v5769_v7 = vld [vmem:[%s7246_s11 + $0x18] sm:$0xff]  }
 0x699   :  { %5124 = vmatprep.subr.bf16.mxu1 %v5830_v4 }
 0x752   :  { %v2557_v30 = vpop.f32.mrb[60].mxu1 }
 0x753   :  { %v6767_v31 = vadd.f32 %v4588_v12, %v2557_v30  ;;  %v5108_v32 = vpop.f32.mrb[61].mxu1  ;;  %v2638_v12 = vadd.f32 %v5781_v9, %v2634_v6  ;;  %v5768_v6 = vld [vmem:[%s7246_s11 + $0x10] sm:$0xff]  }
 0x754   :  { %v2560_v18 = vpop.f32.mrb[62].mxu1  ;;  %v4608_v9 = vld [vmem:[%s7239_s17 + $0x16] ss:$0 sm:$0xff] }
 0x755   :  { %v2564_v2 = vadd.f32 %v2563_v15, %v6767_v31  ;;  %v2566_v38 = vmax.f32 %v6748_v14, %v6767_v31  ;;  %v5109_v39 = vpop.f32.mrb[63].mxu1 }
 0x757   :  { %v2565_v42 = vmax.f32 %v2564_v2, %v6751_v13  ;;  %v6778_v62 = vmax.f32 %v2587_v34, %v2566_v38 }
 0x759   :  { %v6780_v5 = vmax.f32 %v2565_v42, %v2566_v38  ;;  %v2589_v52 = vsub.f32 0.0, %v6778_v62  ;;  %v2593_v47 = vsub.f32 %v6751_v13, %v6778_v62  ;;  %v2597_v58 = vsub.f32 %v6748_v14, %v6778_v62 }
 0x75a   :  { %v2601_v60 = vsub.f32 %v6767_v31, %v6778_v62 }
 0x75b   :  { %v2568_v45 = vsub.f32 %v2564_v2, %v6780_v5  ;;  %v2572_v46 = vsub.f32 %v6751_v13, %v6780_v5  ;;  %v2580_v49 = vsub.f32 %v6767_v31, %v6780_v5  ;;  %v2576_v24 = vsub.f32 %v6748_v14, %v6780_v5 }
 0x75c   :  { %v2590_v50 = vmul.f32 1.442695, %v2589_v52  ;;  %v2594_v57 = vmul.f32 1.442695, %v2593_v47  ;;  %v2598_v0 = vmul.f32 1.442695, %v2597_v58 }
 0x75d   :  { %v2569_v53 = vmul.f32 1.442695, %v2568_v45  ;;  %v2573_v56 = vmul.f32 1.442695, %v2572_v46  ;;  %v2577_v59 = vmul.f32 1.442695, %v2576_v24 }
 0x75e   :  { %5782 = vpow2.f32 %v2590_v50  ;;  %v2581_v63 = vmul.f32 1.442695, %v2580_v49  ;;  %v2602_v54 = vmul.f32 1.442695, %v2601_v60  ;;  %v5758_v46 = vld [vmem:[%s7243_s9 + $0x38] sm:$0xff]  }
 0x75f   :  { %5784 = vpow2.f32 %v2569_v53  ;;  %v5759_v47 = vld [vmem:[%s7244_s10 + $0x38] sm:$0xff]   ;;  %5125 = vmatpush3.bf16.msra.mxu1 %v5758_v46  ;;  %v6815_v53 = vpop.permute.xlu1 %2652 }
 0x760   :  { %5786 = vpow2.f32 %v2573_v56  ;;  %5145 = vmatpush3.bf16.msra.mxu0 %v5759_v47 }
 0x761   :  { %5788 = vpow2.f32 %v2577_v59  ;;  %5150 = vmatprep.subr.bf16.mxu0 %v5830_v4 }
 0x762   :  { %5790 = vpow2.f32 %v2594_v57 }
 0x763   :  { %5792 = vpow2.f32 %v2581_v63  ;;  %v2659_v58 = vpop.permute.xlu1 %2658 }
 0x764   :  { %5794 = vpow2.f32 %v2598_v0  ;;  %v5762_v0 = vld [vmem:[%s7245_s12] ss:$8 sps:$4 sm:$0xff]  }
 0x765   :  { %5796 = vpow2.f32 %v2602_v54  ;;  %v5767_v54 = vld [vmem:[%s7246_s11 + $0x8] sm:$0xff]  }
 0x766   :  { %5798 = vlog2.f32 %v2622_v10 }
 0x767   :  { %5800 = vlog2.f32 %v2638_v12  ;;  %v2662_v59 = vpop.permute.xlu1 %2661 }
 0x768   :  { %v5783_v36 = vpop.eup %5782  ;;  %v2672_v60 = vsel %vm2096_vm3, %v2659_v58, %v2662_v59 }
 0x769   :  { %v5785_v15 = vpop.eup %5784  ;;  %v2592_v8 = vmul.f32 3.0, %v5783_v36 }
 0x76a   :  { %v2571_v16 = vmul.f32 3.0, %v5785_v15  ;;  %v5787_v19 = vpop.eup %5786 }
 0x76b   :  { %v5789_v20 = vpop.eup %5788  ;;  %v2670_v61 = vpop.permute.xlu1 %2669 }
 0x76c   :  { %v2575_v28 = vadd.f32 %v5787_v19, %v2571_v16  ;;  %v5791_v17 = vpop.eup %5790 }
 0x76d   :  { %v5793_v11 = vpop.eup %5792  ;;  %v2596_v32 = vadd.f32 %v5791_v17, %v2592_v8 }
 0x76e   :  { %v2579_v30 = vadd.f32 %v5789_v20, %v2575_v28  ;;  %v5795_v34 = vpop.eup %5794  ;;  %v6869_v20 = vld [vmem:[%s7239_s17 + $0x18] sm:$0x3] }
 0x76f   :  { %v2600_v35 = vadd.f32 %v5795_v34, %v2596_v32  ;;  %v5797_v37 = vpop.eup %5796  ;;  %v3004_v32 = vrot.slane %v6869_v20, %v6170_v25  ;;  %v3078_v25 = vpop.permute.xlu1 %3077 }
 0x770   :  { %v2583_v18 = vadd.f32 %v5793_v11, %v2579_v30  ;;  %v5799_v38 = vpop.eup %5798 }
 0x771   :  { %v2604_v2 = vadd.f32 %v5797_v37, %v2600_v35  ;;  %v5801_v39 = vpop.eup %5800  ;;  %v2624_v40 = vmul.f32 0.6931472, %v5799_v38 }
 0x772   :  { %5802 = vlog2.f32 %v2583_v18  ;;  %v2640_v41 = vmul.f32 0.6931472, %v5801_v39 }
 0x773   :  { %5804 = vlog2.f32 %v2604_v2  ;;  %v2625_v52 = vadd.f32 %v2624_v40, %v6757_v21  ;;  %v6809_v21 = vld [vmem:[%s7245_s12 + $0x4] ss:$8 sps:$4 sm:$0xff]   ;;  %v5835_v40 = vmov 1  }
 0x774   :  { %v2641_v44 = vadd.f32 %v2640_v41, %v6759_v23  ;;  %v6812_v23 = vpop.permute.xlu0 %2645  ;;  %3127 = vmatprep.subr.bf16.mxu1 %v6809_v21  ;;  %5580 = vset.pattern.permute.xlu0 %v5835_v40  ;;  %v4617_v41 = vld [vmem:[%s7239_s17 + $0x17] ss:$0 sm:$0xff]  ;;  %v3258_v40 = vld [vmem:[%s7249_s14 + $0x48] sm:$0xff] }
 0x776   :  { %v2642_v50 = vsub.f32 %v2625_v52, %v2641_v44 }
 0x778   :  { %v2655_v56 = vmul.f32 %v6815_v53, %v2642_v50 }
 0x77c   :  { %v5803_v42 = vpop.eup %5802 }
 0x77d   :  { %v2585_v26 = vmul.f32 0.6931472, %v5803_v42  ;;  %v5805_v45 = vpop.eup %5804 }
 0x77e   :  { %v2606_v49 = vmul.f32 0.6931472, %v5805_v45 }
 0x77f   :  { %v2586_v48 = vadd.f32 %v2585_v26, %v6780_v5 }
 0x780   :  { %v2607_v24 = vadd.f32 %v2606_v49, %v6778_v62 }
 0x782   :  { %v2608_v51 = vsub.f32 %v2586_v48, %v2607_v24 }
 0x784   :  { %v2648_v5 = vmul.f32 %v6812_v23, %v2608_v51 }
 0x786   :  { %v2656_v62 = vadd.f32 %v2655_v56, %v2648_v5 }
 0x788   :  { %2665 = vrot.lane.b32.xlu0 %v2656_v62, %s5833_s27  ;;  %v3123_v33 = vpack.c.bf16 %v2656_v62, %v2656_v62 }
 0x78c   :  { %3011 = vrot.lane.b32.xlu0 %v6283_v55, %s5832_s21  ;;  %v5763_v55 = vld [vmem:[%s7245_s12 + $0x14] ss:$8 sps:$4 sm:$0xff]  }
 0x790   :  { %3169 = vrot.lane.b32.xlu0 %v6668_v3, %s5832_s21  ;;  %v5766_v3 = vld [vmem:[%s7246_s11] sm:$0xff]  }
 0x7fa   :  { %v2666_v57 = vpop.permute.xlu0 %2665 }
 0x7fb   :  { %v2673_v63 = vsel %vm2181_vm4, %v2672_v60, %v2666_v57 }
 0x7fc   :  { %v2675_v29 = vsel %vm2674_vm5, %v2673_v63, %v2670_v61 }
 0x7fd   :  { %v2676_v22 = vpack.c.bf16 %v2675_v29, %v2675_v29  ;;  %4356 = vst [vmem:[%s7247_s18] sm:$0x3] %v2675_v29 }
 0x7fe   :  { %v3012_v38 = vpop.permute.xlu0 %3011 }
 0x7ff   :  { %5127 = vmatmul.mubr.bf16.vlgmr.msra.gmra.mrb[64].mxu1 %v2676_v22  ;;  %5147 = vmatmul.mubr.bf16.vlgmr.msra.gmra.mrb[40].mxu0 %v2676_v22 }
 0x800   :  { %3128 = vmatpush1.bf16.msra.mxu1 %v5762_v0  ;;  %3159 = vmatprep.mubr.bf16.mxu1 %v5829_v1 }
 0x801   :  { %3129 = vmatprep.subr.bf16.mxu1 %v5763_v55  ;;  %5151 = vmatpush3.bf16.msra.mxu0 %v5766_v3 }
 0x802   :  { %5152 = vmatprep.subr.bf16.mxu0 %v5830_v4  ;;  %5158 = vmatprep.mubr.msk.bf16.mxu0 %vm5831_vm1, %v5830_v4  ;;  %v3170_v39 = vpop.permute.xlu0 %3169 }
 0x804   :  { %3130 = vmatpush1.bf16.msra.mxu1 %v5765_v43 }
 0x805   :  { %5153 = vmatpush3.bf16.msra.mxu0 %v5767_v54  ;;  %v5836_v54 = vmov 2  }
 0x806   :  { %5154 = vmatprep.subr.bf16.mxu0 %v5830_v4 }
 0x807   :  { %4630 = vmatmul.mubr.msk.bf16.vlgmr.msra.gmra.mrb[68].mxu1 %vm2096_vm3, %v3123_v33 }
 0x808   :  { %5170 = vmatprep.mubr.msk.f32.mxu1 %vm5831_vm1, %v5830_v4 }
 0x809   :  { %5155 = vmatpush3.bf16.msra.mxu0 %v5768_v6  ;;  %v5837_v6 = vmov 3  }
 0x80a   :  { %5156 = vmatprep.subr.bf16.mxu0 %v5830_v4 }
 0x80d   :  { %5157 = vmatpush3.bf16.msra.mxu0 %v5769_v7 }
 0x80e   :  { %3036 = vmatprep.subr.bf16.mxu0 %v6809_v21 }
 0x8d2   :  { %v6864_v10 = vpop.f32.mrb[64].mxu1  ;;  %v2899_v36 = vpop.f32.mrb[40].mxu0 }
 0x8d3   :  { %v2900_v12 = vadd.f32 %v4608_v9, %v2899_v36  ;;  %v5128_v15 = vpop.f32.mrb[65].mxu1  ;;  %v5148_v16 = vpop.f32.mrb[41].mxu0 }
 0x8d4   :  { %v2785_v8 = vpop.f32.mrb[66].mxu1  ;;  %v2902_v19 = vpop.f32.mrb[42].mxu0  ;;  %v3247_v15 = vld [vmem:[%s7248_s13 + $0x10] sm:$0xff]  ;;  %v3248_v16 = vld [vmem:[%s7248_s13 + $0x18] sm:$0xff] }
 0x8d5   :  { %v2905_v28 = vmax.f32 %v2900_v12, 0.0  ;;  %v5129_v17 = vpop.f32.mrb[67].mxu1  ;;  %v5149_v11 = vpop.f32.mrb[43].mxu0  ;;  %v5838_v12 = vmov 0.0|0.0   ;;  %v6935_v8 = vpack.c.bf16 %v3248_v16, %v3247_v15 }
 0x8d6   :  { %5412 = vmatprep.subr.bf16.mxu1 %v5838_v12  ;;  %v3251_v17 = vld [vmem:[%s7249_s14 + $0x10] sm:$0xff] }
 0x8d7   :  { %v2906_v30 = vpack.c.bf16 %v2905_v28, %v2905_v28  ;;  %v3250_v28 = vld [vmem:[%s7249_s14 + $0x8] sm:$0xff] }
 0x8d9   :  { %5159 = vmatmul.mubr.msk.bf16.vlgmr.msra.gmra.mrb[44].mxu0 %vm2181_vm4, %v2906_v30  ;;  %v3252_v30 = vld [vmem:[%s7249_s14 + $0x18] sm:$0xff] }
 0x8da   :  { %3037 = vmatpush1.bf16.msra.mxu0 %v5762_v0  ;;  %v3161_v34 = vpop.f32.mrb[68].mxu1  ;;  %3068 = vmatprep.mubr.bf16.mxu0 %v5829_v1 }
 0x8db   :  { %v6875_v18 = vadd.f32 %v3161_v34, %v3004_v32  ;;  %v6877_v35 = vpop.f32.mrb[69].mxu1  ;;  %3038 = vmatprep.subr.bf16.mxu0 %v5763_v55  ;;  %v3253_v34 = vld [vmem:[%s7249_s14 + $0x20] sm:$0xff] }
 0x8dc   :  { %v3165_v37 = vpop.f32.mrb[70].mxu1 }
 0x8dd   :  { %v3166_v2 = vpop.f32.mrb[71].mxu1 }
 0x8de   :  { %3039 = vmatpush1.bf16.msra.mxu0 %v5765_v43  ;;  %v3255_v2 = vld [vmem:[%s7249_s14 + $0x30] sm:$0xff] }
 0x8df   :  { %3082 = vmatprep.subr.bf16.mxu0 %v6809_v21 }
 0x8e1   :  { %4628 = vmatmul.mubr.msk.bf16.vlgmr.msra.gmra.mrb[48].mxu0 %vm2096_vm3, %v3012_v38  ;;  %v3256_v38 = vld [vmem:[%s7249_s14 + $0x38] sm:$0xff] }
 0x8e2   :  { %3083 = vmatpush1.bf16.msra.mxu0 %v5762_v0  ;;  %3114 = vmatprep.mubr.bf16.mxu0 %v5829_v1 }
 0x8e3   :  { %3084 = vmatprep.subr.bf16.mxu0 %v5763_v55 }
 0x8e6   :  { %3085 = vmatpush1.bf16.msra.mxu0 %v5765_v43 }
 0x8e7   :  { %3174 = vmatprep.subr.bf16.mxu0 %v6809_v21 }
 0x8e9   :  { %4629 = vmatmul.mubr.msk.bf16.vlgmr.msra.gmra.mrb[52].mxu0 %vm2096_vm3, %v3078_v25  ;;  %v6975_v25 = vpack.c.bf16 %v3256_v38, %v3255_v2 }
 0x8ea   :  { %3175 = vmatpush1.bf16.msra.mxu0 %v5762_v0  ;;  %3206 = vmatprep.mubr.bf16.mxu0 %v5829_v1 }
 0x8eb   :  { %3176 = vmatprep.subr.bf16.mxu0 %v5763_v55  ;;  %v5828_v55 = vld [vmem:[%s7238_s2] sm:$0x3] }
 0x8ec   :  { %vm3622_vm6 = vcmp.lt.f32.partialorder %v5828_v55, 0.5 }
 0x8ed   :  { %v3623_v3 = vsel %vm3622_vm6, 1, %v5829_v1 }
 0x8ee   :  { %3177 = vmatpush1.bf16.msra.mxu0 %v5765_v43  ;;  %v3008_v43 = vrot.slane %v6869_v20, %v6178_v27  ;;  %v3246_v27 = vld [vmem:[%s7248_s13 + $0x8] sm:$0xff]  ;;  %v3249_v20 = vld [vmem:[%s7249_s14] sm:$0xff] }
 0x8ef   :  { %5418 = vmatprep.subr.bf16.mxu0 %v5838_v12  ;;  %v6949_v11 = vpack.c.bf16 %v3250_v28, %v3249_v20 }
 0x8f0   :  { %v6908_v33 = vadd.f32 %v6877_v35, %v3008_v43  ;;  %v3254_v35 = vld [vmem:[%s7249_s14 + $0x28] sm:$0xff] }
 0x8f1   :  { %4631 = vmatmul.mubr.msk.bf16.vlgmr.msra.gmra.mrb[56].mxu0 %vm2096_vm3, %v3170_v39  ;;  %v6965_v37 = vpack.c.bf16 %v3254_v35, %v3253_v34  ;;  %v3257_v39 = vld [vmem:[%s7249_s14 + $0x40] sm:$0xff] }
 0x8f2   :  { %5205 = vmatprep.mubr.msk.f32.mxu0 %vm5831_vm1, %v5830_v4  ;;  %5420 = vmatpush3.bf16.msra.mxu0 %v6949_v11 }
 0x8f3   :  { %5421 = vmatprep.subr.bf16.mxu0 %v5838_v12 }
 0x9ac   :  { %v2983_v42 = vpop.f32.mrb[44].mxu0 }
 0x9ad   :  { %v2984_v26 = vadd.f32 %v4617_v41, %v2983_v42  ;;  %v5160_v52 = vpop.f32.mrb[45].mxu0  ;;  %v6985_v41 = vpack.c.bf16 %v3258_v40, %v3257_v39  ;;  %v3259_v42 = vld [vmem:[%s7249_s14 + $0x50] sm:$0xff] }
 0x9ae   :  { %v2986_v44 = vpop.f32.mrb[46].mxu0 }
 0x9af   :  { %v4623_v45 = vmul.f32 -1.442695, %v2984_v26  ;;  %v5161_v46 = vpop.f32.mrb[47].mxu0  ;;  %v3260_v26 = vld [vmem:[%s7249_s14 + $0x58] sm:$0xff]  ;;  %v3261_v44 = vld [vmem:[%s7249_s14 + $0x60] sm:$0xff] }
 0x9b0   :  { %v6995_v52 = vpack.c.bf16 %v3260_v26, %v3259_v42 }
 0x9b1   :  { %5806 = vpow2.f32 %v4623_v45  ;;  %v3262_v45 = vld [vmem:[%s7249_s14 + $0x68] sm:$0xff] }
 0x9b2   :  { %v7005_v46 = vpack.c.bf16 %v3262_v45, %v3261_v44 }
 0x9b4   :  { %v3070_v47 = vpop.f32.mrb[48].mxu0 }
 0x9b5   :  { %v6891_v48 = vadd.f32 %v3070_v47, %v3004_v32  ;;  %v3072_v49 = vpop.f32.mrb[49].mxu0  ;;  %v3263_v47 = vld [vmem:[%s7249_s14 + $0x70] sm:$0xff] }
 0x9b6   :  { %v3074_v24 = vpop.f32.mrb[50].mxu0  ;;  %v6912_v7 = vadd.f32 %v3072_v49, %v3008_v43  ;;  %v3264_v49 = vld [vmem:[%s7249_s14 + $0x78] sm:$0xff] }
 0x9b7   :  { %v3075_v50 = vpop.f32.mrb[51].mxu0  ;;  %v7015_v24 = vpack.c.bf16 %v3264_v49, %v3263_v47 }
 0x9bb   :  { %v5807_v21 = vpop.eup %5806 }
 0x9bc   :  { %v2992_v51 = vadd.f32 1.0, %v5807_v21  ;;  %v3116_v5 = vpop.f32.mrb[52].mxu0 }
 0x9bd   :  { %v6893_v56 = vadd.f32 %v3116_v5, %v3004_v32  ;;  %v3118_v62 = vpop.f32.mrb[53].mxu0 }
 0x9be   :  { %5808 = vrcp.f32 %v2992_v51  ;;  %v3120_v58 = vpop.f32.mrb[54].mxu0  ;;  %v3119_v9 = vadd.f32 %v3118_v62, %v3008_v43 }
 0x9bf   :  { %v3121_v59 = vpop.f32.mrb[55].mxu0 }
 0x9c4   :  { %v3208_v60 = vpop.f32.mrb[56].mxu0 }
 0x9c5   :  { %v6895_v57 = vadd.f32 %v3208_v60, %v3004_v32  ;;  %v3210_v61 = vpop.f32.mrb[57].mxu0  ;;  %v6955_v32 = vpack.c.bf16 %v3252_v30, %v3251_v17 }
 0x9c6   :  { %v3212_v63 = vpop.f32.mrb[58].mxu0  ;;  %v3211_v19 = vadd.f32 %v3210_v61, %v3008_v43 }
 0x9c7   :  { %v3213_v29 = vpop.f32.mrb[59].mxu0  ;;  %5423 = vmatpush3.bf16.msra.mxu0 %v6955_v32 }
 0x9c8   :  { %v6897_v0 = vpop.eup %5808  ;;  %5424 = vmatprep.subr.bf16.mxu0 %v5838_v12 }
 0x9c9   :  { %v3215_v22 = vsub.f32 1.0, %v6897_v0 }
 0x9cb   :  { %3223 = vperm.xlu0 %5580, %v3215_v22   ;;  %3218 = vperm.xlu1 %5579, %v3215_v22  }
 0x9cc   :  { %5426 = vmatpush3.bf16.msra.mxu0 %v6965_v37 }
 0x9cd   :  { %5427 = vmatprep.subr.bf16.mxu0 %v5838_v12 }
 0x9cf   :  { %5583 = vset.pattern.permute.xlu0 %v5829_v1  ;;  %5581 = vset.pattern.permute.xlu1 %v5836_v54  ;;  %v3245_v1 = vld [vmem:[%s7248_s13] sm:$0xff] }
 0x9d0   :  { %3625 = vperm.xlu0 %5583, %v3623_v3   ;;  %3228 = vperm.xlu1 %5581, %v3215_v22   ;;  %v6922_v36 = vpack.c.bf16 %v3246_v27, %v3245_v1 }
 0x9d1   :  { %5429 = vmatpush3.bf16.msra.mxu0 %v6975_v25 }
 0x9d2   :  { %5414 = vmatpush3.bf16.msra.mxu1 %v6922_v36  ;;  %5430 = vmatprep.subr.bf16.mxu0 %v5838_v12 }
 0x9d3   :  { %5415 = vmatprep.subr.bf16.mxu1 %v5838_v12 }
 0x9d4   :  { %5582 = vset.pattern.permute.xlu1 %v5837_v6  ;;  %3958 = vrot.lane.b32.xlu0 %v6908_v33, %s5832_s21 }
 0x9d5   :  { %3233 = vperm.xlu1 %5582, %v3215_v22   ;;  %5432 = vmatpush3.bf16.msra.mxu0 %v6985_v41 }
 0x9d6   :  { %5417 = vmatpush3.bf16.msra.mxu1 %v6935_v8  ;;  %5433 = vmatprep.subr.bf16.mxu0 %v5838_v12 }
 0x9d7   :  { %5442 = vmatprep.subr.bf16.mxu1 %v5838_v12 }
 0x9d9   :  { %3654 = vrot.lane.b32.xlu1 %v6912_v7, %s5832_s21  ;;  %5435 = vmatpush3.bf16.msra.mxu0 %v6995_v52 }
 0x9da   :  { %5436 = vmatprep.subr.bf16.mxu0 %v5838_v12 }
 0x9dd   :  { %3808 = vrot.lane.b32.xlu1 %v3119_v9, %s5832_s21  ;;  %5438 = vmatpush3.bf16.msra.mxu0 %v7005_v46 }
 0x9de   :  { %5439 = vmatprep.subr.bf16.mxu0 %v5838_v12 }
 0x9e1   :  { %4108 = vrot.lane.b32.xlu1 %v3211_v19, %s5832_s21  ;;  %5441 = vmatpush3.bf16.msra.mxu0 %v7015_v24 }
 0x9e2   :  { %5466 = vmatprep.subr.bf16.mxu0 %v5838_v12 }
 0xa4a   :  { %v3219_v50 = vpop.permute.xlu1 %3218  ;;  %v3224_v21 = vpop.permute.xlu0 %3223 }
 0xa4b   :  { %v3221_v51 = vmul.f32 %v3219_v50, %v6912_v7  ;;  %v3226_v5 = vmul.f32 %v3224_v21, %v3119_v9 }
 0xa4d   :  { %v3237_v59 = vadd.f32 %v3226_v5, %v3221_v51 }
 0xa4f   :  { %v3229_v62 = vpop.permute.xlu1 %3228 }
 0xa50   :  { %v3231_v58 = vmul.f32 %v3229_v62, %v6908_v33 }
 0xa52   :  { %v3238_v60 = vadd.f32 %v3237_v59, %v3231_v58 }
 0xa54   :  { %v3234_v61 = vpop.permute.xlu1 %3233  ;;  %v3242_v29 = vmul.f32 0.33333334, %v3238_v60 }
 0xa55   :  { %v3236_v63 = vmul.f32 %v3234_v61, %v3211_v19  ;;  %v3626_v19 = vpop.permute.xlu0 %3625 }
 0xa56   :  { %v3243_v3 = vmul.f32 %v3242_v29, %v6815_v53  ;;  %vm3627_vm7 = vcmp.eq.s32.totalorder %v3626_v19, 1  ;;  %v4261_v29 = vld [vmem:[%s7251_s16 + $0x20] sm:$0xff] }
 0xa57   :  { %v3239_v22 = vadd.f32 %v3238_v60, %v3236_v63  ;;  %v4260_v63 = vld [vmem:[%s7251_s16 + $0x18] sm:$0xff] }
 0xa59   :  { %v3240_v55 = vmul.f32 0.25, %v3239_v22  ;;  %v3959_v61 = vpop.permute.xlu0 %3958  ;;  %v4262_v22 = vld [vmem:[%s7251_s16 + $0x28] sm:$0xff] }
 0xa5b   :  { %v3241_v43 = vmul.f32 %v3240_v55, %v6812_v23  ;;  %v5545_v55 = vpack.c.bf16 %v4262_v22, %v4261_v29 }
 0xa5d   :  { %v3244_v54 = vadd.f32 %v3243_v3, %v3241_v43  ;;  %v4264_v3 = vld [vmem:[%s7251_s16 + $0x38] sm:$0xff] }
 0xa5f   :  { %5171 = vmatmul.mubr.msk.f32.vlgmr.msra.gmra.mrb[72].mxu1 %vm2096_vm3, %v3244_v54  ;;  %v4265_v54 = vld [vmem:[%s7251_s16 + $0x40] sm:$0xff] }
 0xa60   :  { %5444 = vmatpush3.bf16.msra.mxu1 %v6949_v11  ;;  %5240 = vmatprep.mubr.msk.f32.mxu1 %vm5831_vm1, %v5830_v4 }
 0xa61   :  { %5445 = vmatprep.subr.bf16.mxu1 %v5838_v12 }
 0xa64   :  { %5447 = vmatpush3.bf16.msra.mxu1 %v6955_v32 }
 0xa65   :  { %5448 = vmatprep.subr.bf16.mxu1 %v5838_v12 }
 0xa68   :  { %5450 = vmatpush3.bf16.msra.mxu1 %v6965_v37 }
 0xa69   :  { %5451 = vmatprep.subr.bf16.mxu1 %v5838_v12 }
 0xa6c   :  { %5453 = vmatpush3.bf16.msra.mxu1 %v6975_v25 }
 0xa6d   :  { %5454 = vmatprep.subr.bf16.mxu1 %v5838_v12 }
 0xa70   :  { %5456 = vmatpush3.bf16.msra.mxu1 %v6985_v41 }
 0xa71   :  { %5457 = vmatprep.subr.bf16.mxu1 %v5838_v12 }
 0xa74   :  { %5459 = vmatpush3.bf16.msra.mxu1 %v6995_v52 }
 0xa75   :  { %5460 = vmatprep.subr.bf16.mxu1 %v5838_v12 }
 0xa78   :  { %5462 = vmatpush3.bf16.msra.mxu1 %v7005_v46 }
 0xa79   :  { %5463 = vmatprep.subr.bf16.mxu1 %v5838_v12 }
 0xa7c   :  { %5465 = vmatpush3.bf16.msra.mxu1 %v7015_v24 }
 0xa7d   :  { %5490 = vmatprep.subr.bf16.mxu1 %v5838_v12 }
 0xb32   :  { %v3334_v23 = vpop.f32.mrb[72].mxu1 }
 0xb33   :  { %v3338_v53 = vmul.f32 %v3334_v23, %v6891_v48  ;;  %v3409_v33 = vmul.f32 %v3334_v23, %v6893_v56  ;;  %v3480_v6 = vmul.f32 %v3334_v23, %v6875_v18  ;;  %v3551_v7 = vmul.f32 %v3334_v23, %v6895_v57  ;;  %v5172_v1 = vpop.f32.mrb[73].mxu1  ;;  %v3655_v18 = vpop.permute.xlu1 %3654  ;;  %v7104_v56 = vld [vmem:[%s7250_s15] sm:$0xf]  ;;  %s5839_s15 = smov 8   ;;  %v4266_v23 = vld [vmem:[%s7251_s16 + $0x48] sm:$0xff] }
 0xb34   :  { %v4269_v1 = vld [vmem:[%s7251_s16 + $0x60] sm:$0xff] }
 0xb35   :  { %5206 = vmatmul.mubr.f32.vlgmr.msra.gmra.mrb[60].mxu0 %v3338_v53  ;;  %5241 = vmatmul.mubr.f32.vlgmr.msra.gmra.mrb[74].mxu1 %v3409_v33  ;;  %v5551_v53 = vpack.c.bf16 %v4266_v23, %v4265_v54  ;;  %v4267_v33 = vld [vmem:[%s7251_s16 + $0x50] sm:$0xff] }
 0xb36   :  { %5468 = vmatpush3.bf16.msra.mxu0 %v6949_v11  ;;  %5492 = vmatpush3.bf16.msra.mxu1 %v6949_v11 }
 0xb37   :  { %5469 = vmatprep.subr.bf16.mxu0 %v5838_v12  ;;  %5493 = vmatprep.subr.bf16.mxu1 %v5838_v12  ;;  %v3809_v48 = vpop.permute.xlu1 %3808 }
 0xb38   :  { %5275 = vmatprep.mubr.msk.f32.mxu0 %vm5831_vm1, %v5830_v4  ;;  %5310 = vmatprep.mubr.msk.f32.mxu1 %vm5831_vm1, %v5830_v4 }
 0xb3a   :  { %5471 = vmatpush3.bf16.msra.mxu0 %v6955_v32  ;;  %5495 = vmatpush3.bf16.msra.mxu1 %v6955_v32 }
 0xb3b   :  { %5472 = vmatprep.subr.bf16.mxu0 %v5838_v12  ;;  %5496 = vmatprep.subr.bf16.mxu1 %v5838_v12  ;;  %v4109_v60 = vpop.permute.xlu1 %4108 }
 0xb3e   :  { %5474 = vmatpush3.bf16.msra.mxu0 %v6965_v37  ;;  %5498 = vmatpush3.bf16.msra.mxu1 %v6965_v37 }
 0xb3f   :  { %5475 = vmatprep.subr.bf16.mxu0 %v5838_v12  ;;  %5499 = vmatprep.subr.bf16.mxu1 %v5838_v12 }
 0xb42   :  { %5477 = vmatpush3.bf16.msra.mxu0 %v6975_v25  ;;  %5501 = vmatpush3.bf16.msra.mxu1 %v6975_v25 }
 0xb43   :  { %5478 = vmatprep.subr.bf16.mxu0 %v5838_v12  ;;  %5502 = vmatprep.subr.bf16.mxu1 %v5838_v12 }
 0xb46   :  { %5480 = vmatpush3.bf16.msra.mxu0 %v6985_v41  ;;  %5504 = vmatpush3.bf16.msra.mxu1 %v6985_v41 }
 0xb47   :  { %5481 = vmatprep.subr.bf16.mxu0 %v5838_v12  ;;  %5505 = vmatprep.subr.bf16.mxu1 %v5838_v12 }
 0xb4a   :  { %5483 = vmatpush3.bf16.msra.mxu0 %v6995_v52  ;;  %5507 = vmatpush3.bf16.msra.mxu1 %v6995_v52 }
 0xb4b   :  { %5484 = vmatprep.subr.bf16.mxu0 %v5838_v12  ;;  %5508 = vmatprep.subr.bf16.mxu1 %v5838_v12 }
 0xb4e   :  { %5486 = vmatpush3.bf16.msra.mxu0 %v7005_v46  ;;  %5510 = vmatpush3.bf16.msra.mxu1 %v7005_v46 }
 0xb4f   :  { %5487 = vmatprep.subr.bf16.mxu0 %v5838_v12  ;;  %5511 = vmatprep.subr.bf16.mxu1 %v5838_v12 }
 0xb52   :  { %5489 = vmatpush3.bf16.msra.mxu0 %v7015_v24  ;;  %5513 = vmatpush3.bf16.msra.mxu1 %v7015_v24 }
 0xb53   :  { %5514 = vmatprep.subr.bf16.mxu0 %v5838_v12  ;;  %5324 = vmatprep.subr.mxu1 %v5830_v4 }
 0xb55   :  { %5276 = vmatmul.mubr.f32.vlgmr.msra.gmra.mrb[62].mxu0 %v3480_v6  ;;  %5311 = vmatmul.mubr.f32.vlgmr.msra.gmra.mrb[76].mxu1 %v3551_v7  ;;  %v4268_v6 = vld [vmem:[%s7251_s16 + $0x58] sm:$0xff] }
 0xb56   :  { %5516 = vmatpush3.bf16.msra.mxu0 %v6922_v36  ;;  %5321 = vmatprep.mubr.msk.f32.mxu0 %vm5831_vm1, %v5830_v4  ;;  %v5554_v7 = vpack.c.bf16 %v4268_v6, %v4267_v33 }
 0xb57   :  { %5517 = vmatprep.subr.bf16.mxu0 %v5838_v12  ;;  %5326 = vmatprep.mubr.msk.f32.mxu1 %vm5831_vm1, %v5830_v4 }
 0xb58   :  { %5325 = vmatpush3.msk.msra.mxu1 %vm312_vm0, %v7104_v56 }
 0xb59   :  { %5340 = vmatprep.subr.mxu1 %v5830_v4 }
 0xb5a   :  { %5519 = vmatpush3.bf16.msra.mxu0 %v6935_v8 }
 0xb5b   :  { %5520 = vmatprep.subr.bf16.mxu0 %v5838_v12 }
 0xb5d   :  { %5322 = vmatmul.mubr.msk.f32.vlgmr.msra.gmra.mrb[64].mxu0 %vm2096_vm3, %v3655_v18  ;;  %v4270_v18 = vld [vmem:[%s7251_s16 + $0x68] sm:$0xff] }
 0xb5e   :  { %5522 = vmatpush3.bf16.msra.mxu0 %v6922_v36  ;;  %5337 = vmatprep.mubr.msk.f32.mxu0 %vm5831_vm1, %v5830_v4 }
 0xb5f   :  { %5523 = vmatprep.subr.bf16.mxu0 %v5838_v12 }
 0xb62   :  { %5525 = vmatpush3.bf16.msra.mxu0 %v6935_v8 }
 0xb63   :  { %5356 = vmatprep.subr.mxu0 %v5830_v4 }
 0xb65   :  { %5338 = vmatmul.mubr.msk.f32.vlgmr.msra.gmra.mrb[66].mxu0 %vm2096_vm3, %v3809_v48  ;;  %v5557_v48 = vpack.c.bf16 %v4270_v18, %v4269_v1 }
 0xb66   :  { %5358 = vmatprep.mubr.msk.f32.mxu0 %vm5831_vm1, %v5830_v4  ;;  %5357 = vmatpush3.msk.msra.mxu0 %vm312_vm0, %v7104_v56 }
 0xb67   :  { %5532 = vmatprep.subr.bf16.mxu0 %v5838_v12 }
 0xc08   :  { %v3405_v57 = vpop.f32.mrb[60].mxu0  ;;  %v3476_v27 = vpop.f32.mrb[74].mxu1 }
 0xc09   :  { %v3629_v9 = vmax.f32 %v3405_v57, %v3476_v27  ;;  %v5207_v15 = vpop.f32.mrb[61].mxu0  ;;  %v5242_v16 = vpop.f32.mrb[75].mxu1 }
 0xc28   :  { %v3547_v20 = vpop.f32.mrb[62].mxu0  ;;  %v3618_v28 = vpop.f32.mrb[76].mxu1 }
 0xc29   :  { %v3628_v17 = vsel %vm3627_vm7, -1e+30, %v3618_v28  ;;  %v5277_v11 = vpop.f32.mrb[63].mxu0  ;;  %v5312_v30 = vpop.f32.mrb[77].mxu1 }
 0xc2a   :  { %v3630_v32 = vmax.f32 %v3547_v20, %v3628_v17 }
 0xc2c   :  { %v3631_v34 = vmax.f32 %v3629_v9, %v3630_v32 }
 0xc2e   :  { %v3632_v35 = vsub.f32 %v3405_v57, %v3631_v34  ;;  %v3635_v37 = vsub.f32 %v3476_v27, %v3631_v34  ;;  %v3638_v2 = vsub.f32 %v3547_v20, %v3631_v34  ;;  %v3641_v38 = vsub.f32 %v3628_v17, %v3631_v34  ;;  %v4272_v57 = vld [vmem:[%s7251_s16 + $0x78] sm:$0xff] }
 0xc30   :  { %v3633_v25 = vmul.f32 1.442695, %v3632_v35  ;;  %v3636_v39 = vmul.f32 1.442695, %v3635_v37  ;;  %v3639_v40 = vmul.f32 1.442695, %v3638_v2 }
 0xc31   :  { %v7112_v41 = vpop.f32.mrb[64].mxu0  ;;  %v3642_v26 = vmul.f32 1.442695, %v3641_v38 }
 0xc32   :  { %5810 = vpow2.f32 %v3633_v25  ;;  %v5323_v42 = vpop.f32.mrb[65].mxu0 }
 0xc33   :  { %5812 = vpow2.f32 %v3636_v39 }
 0xc34   :  { %5814 = vpow2.f32 %v3639_v40 }
 0xc35   :  { %5816 = vpow2.f32 %v3642_v26 }
 0xc38   :  { %v7114_v52 = vpop.f32.mrb[66].mxu0 }
 0xc39   :  { %v5339_v44 = vpop.f32.mrb[67].mxu0 }
 0xc3c   :  { %v5811_v45 = vpop.eup %5810 }
 0xc3d   :  { %v5813_v46 = vpop.eup %5812 }
 0xc3e   :  { %v3644_v47 = vadd.f32 %v5813_v46, %v5811_v45  ;;  %v5815_v49 = vpop.eup %5814 }
 0xc3f   :  { %v5817_v50 = vpop.eup %5816 }
 0xc40   :  { %v3645_v24 = vadd.f32 %v5815_v49, %v3644_v47 }
 0xc42   :  { %v3646_v21 = vadd.f32 %v5817_v50, %v3645_v24 }
 0xc44   :  { %5818 = vrcp.f32 %v3646_v21 }
 0xc4e   :  { %v5819_v51 = vpop.eup %5818 }
 0xc4f   :  { %v3650_v5 = vmul.f32 %v5819_v51, %v5815_v49  ;;  %v3649_v62 = vmul.f32 %v5819_v51, %v5813_v46  ;;  %v7116_v58 = vmul.f32 %v5819_v51, %v5811_v45  ;;  %v3651_v59 = vmul.f32 %v5819_v51, %v5817_v50 }
 0xc51   :  { %4373 = vrot.lane.b32.xlu1 %v3650_v5, %s5839_s15  ;;  %5359 = vmatmul.mubr.msk.f32.vlgmr.msra.gmra.mrb[68].mxu0 %vm3728_vm8, %v3650_v5 }
 0xc52   :  { %5534 = vmatpush3.bf16.msra.mxu0 %v6922_v36  ;;  %4370 = vrot.lane.b32.xlu0 %v3649_v62, %s5840_s6 }
 0xc53   :  { %5327 = vmatmul.mubr.msk.f32.vlgmr.msra.gmra.mrb[78].mxu1 %vm3728_vm8, %v7116_v58  ;;  %5535 = vmatprep.subr.bf16.mxu0 %v5838_v12 }
 0xc54   :  { %5341 = vmatpush3.msk.msra.mxu1 %vm312_vm0, %v7104_v56  ;;  %5342 = vmatprep.mubr.msk.f32.mxu1 %vm5831_vm1, %v5830_v4 }
 0xc55   :  { %5526 = vmatprep.subr.bf16.mxu1 %v5838_v12  ;;  %4384 = vrot.lane.b32.xlu1 %v6897_v0, %s5841_s8  ;;  %v4257_v0 = vld [vmem:[%s7251_s16] sm:$0xff] }
 0xc56   :  { %5537 = vmatpush3.bf16.msra.mxu0 %v6935_v8  ;;  %4376 = vrot.lane.b32.xlu0 %v3651_v59, %s5842_s24 }
 0xc57   :  { %5343 = vmatmul.mubr.msk.f32.vlgmr.msra.gmra.mrb[80].mxu1 %vm3728_vm8, %v3649_v62  ;;  %5369 = vmatprep.mubr.msk.f32.mxu0 %vm5831_vm1, %v5830_v4 }
 0xc58   :  { %5528 = vmatpush3.bf16.msra.mxu1 %v6922_v36  ;;  %5353 = vmatprep.mubr.msk.f32.mxu1 %vm5831_vm1, %v5830_v4  ;;  %v4258_v36 = vld [vmem:[%s7251_s16 + $0x8] sm:$0xff] }
 0xc59   :  { %5529 = vmatprep.subr.bf16.mxu1 %v5838_v12  ;;  %5370 = vmatmul.mubr.msk.f32.vlgmr.msra.gmra.mrb[70].mxu0 %vm2096_vm3, %v4109_v60 }
 0xc5a   :  { %4359 = vrot.lane.b32.xlu0 %v6748_v14, %s5834_s20  ;;  %v5539_v14 = vpack.c.bf16 %v4258_v36, %v4257_v0  ;;  %s5843_s20 = smov 20   ;;  %v4598_v0 = vld [vmem:[%s7239_s17 + $0x15] ss:$0 sm:$0xff] }
 0xc5b   :  { %v2783_v36 = vadd.f32 %v4598_v0, %v6864_v10 }
 0xc5c   :  { %5531 = vmatpush3.bf16.msra.mxu1 %v6935_v8  ;;  %v4259_v8 = vld [vmem:[%s7251_s16 + $0x10] sm:$0xff] }
 0xc5d   :  { %5372 = vmatprep.subr.mxu1 %v5830_v4 }
 0xc5e   :  { %4363 = vrot.lane.b32.xlu0 %v6767_v31, %s5833_s27  ;;  %v5542_v31 = vpack.c.bf16 %v4260_v63, %v4259_v8 }
 0xc5f   :  { %5354 = vmatmul.mubr.msk.f32.vlgmr.msra.gmra.mrb[82].mxu1 %vm2096_vm3, %v3959_v61  ;;  %v4607_v61 = vmul.f32 -1.442695, %v2783_v36 }
 0xc60   :  { %5373 = vmatpush3.msk.msra.mxu1 %vm312_vm0, %v7104_v56  ;;  %5374 = vmatprep.mubr.msk.f32.mxu1 %vm5831_vm1, %v5830_v4  ;;  %v4271_v56 = vld [vmem:[%s7251_s16 + $0x70] sm:$0xff] }
 0xc61   :  { %5538 = vmatprep.subr.bf16.mxu1 %v5838_v12  ;;  %v5560_v27 = vpack.c.bf16 %v4272_v57, %v4271_v56 }
 0xc63   :  { %5375 = vmatmul.mubr.msk.f32.vlgmr.msra.gmra.mrb[84].mxu1 %vm3728_vm8, %v3651_v59 }
 0xc64   :  { %5540 = vmatpush3.bf16.msra.mxu1 %v5539_v14  ;;  %5409 = vmatprep.mubr.msk.f32.mxu1 %vm5831_vm1, %v5830_v4  ;;  %v4263_v4 = vld [vmem:[%s7251_s16 + $0x30] sm:$0xff] }
 0xc65   :  { %5541 = vmatprep.subr.bf16.mxu1 %v5838_v12  ;;  %v5548_v43 = vpack.c.bf16 %v4264_v3, %v4263_v4 }
 0xc68   :  { %5543 = vmatpush3.bf16.msra.mxu1 %v5542_v31 }
 0xc69   :  { %5544 = vmatprep.subr.bf16.mxu1 %v5838_v12 }
 0xc6c   :  { %5546 = vmatpush3.bf16.msra.mxu1 %v5545_v55 }
 0xc6d   :  { %5547 = vmatprep.subr.bf16.mxu1 %v5838_v12 }
 0xc70   :  { %5549 = vmatpush3.bf16.msra.mxu1 %v5548_v43 }
 0xc71   :  { %5550 = vmatprep.subr.bf16.mxu1 %v5838_v12 }
 0xc74   :  { %5552 = vmatpush3.bf16.msra.mxu1 %v5551_v53 }
 0xc75   :  { %5553 = vmatprep.subr.bf16.mxu1 %v5838_v12 }
 0xc78   :  { %5555 = vmatpush3.bf16.msra.mxu1 %v5554_v7 }
 0xc79   :  { %5556 = vmatprep.subr.bf16.mxu1 %v5838_v12 }
 0xc7c   :  { %5558 = vmatpush3.bf16.msra.mxu1 %v5557_v48 }
 0xc7d   :  { %5559 = vmatprep.subr.bf16.mxu1 %v5838_v12 }
 0xc80   :  { %5561 = vmatpush3.bf16.msra.mxu1 %v5560_v27 }
 0xcc3   :  { %v4374_v15 = vpop.permute.xlu1 %4373 }
 0xcc4   :  { %v4371_v9 = vpop.permute.xlu0 %4370 }
 0xcc5   :  { %v4379_v16 = vsel %vm3728_vm8, %v7116_v58, %v4371_v9 }
 0xcc6   :  { %v4380_v20 = vsel %vm308_vm2, %v4379_v16, %v4374_v15 }
 0xcc7   :  { %v4385_v63 = vpop.permute.xlu1 %4384 }
 0xcc8   :  { %v4377_v19 = vpop.permute.xlu0 %4376 }
 0xcc9   :  { %v4382_v12 = vsel %vm4381_vm9, %v4380_v20, %v4377_v19 }
 0xcca   :  { %4388 = vrot.lane.b32.xlu1 %v4382_v12, %s5843_s20 }
 0xccc   :  { %v4360_v28 = vpop.permute.xlu0 %4359 }
 0xccd   :  { %v4366_v17 = vsel %vm2096_vm3, %v6751_v13, %v4360_v28 }
 0xcd0   :  { %v4364_v11 = vpop.permute.xlu0 %4363 }
 0xcd1   :  { %v4367_v30 = vsel %vm2181_vm4, %v4366_v17, %v4364_v11 }
 0xcd2   :  { %v4368_v32 = vsel %vm2674_vm5, %v4367_v30, 0.0 }
 0xcd3   :  { %4369 = vst [vmem:[%s7247_s18 + $0x4] sm:$0x3] %v4368_v32 }
 0xd24   :  { %v4101_v34 = vpop.f32.mrb[68].mxu0 }
 0xd25   :  { %v5360_v35 = vpop.f32.mrb[69].mxu0 }
 0xd26   :  { %v3801_v37 = vpop.f32.mrb[78].mxu1 }
 0xd27   :  { %v3805_v2 = vmul.f32 %v3801_v37, %v7112_v41  ;;  %v5328_v38 = vpop.f32.mrb[79].mxu1  ;;  %v4645_v41 = vld [vmem:[%s7239_s17 + $0x1a] ss:$0 sm:$0xff] }
 0xd2a   :  { %v3951_v25 = vpop.f32.mrb[80].mxu1 }
 0xd2b   :  { %v3955_v39 = vmul.f32 %v3951_v25, %v7114_v52  ;;  %v5344_v40 = vpop.f32.mrb[81].mxu1 }
 0xd2c   :  { %v4178_v13 = vpop.f32.mrb[70].mxu0 }
 0xd2d   :  { %v3956_v42 = vadd.f32 %v3955_v39, %v3805_v2  ;;  %v5371_v26 = vpop.f32.mrb[71].mxu0 }
 0xd32   :  { %v4028_v44 = vpop.f32.mrb[82].mxu1 }
 0xd33   :  { %v4105_v45 = vmul.f32 %v4101_v34, %v4028_v44  ;;  %v5355_v46 = vpop.f32.mrb[83].mxu1 }
 0xd35   :  { %v4106_v47 = vadd.f32 %v4105_v45, %v3956_v42 }
 0xd36   :  { %v4251_v49 = vpop.f32.mrb[84].mxu1 }
 0xd37   :  { %v4255_v24 = vmul.f32 %v4251_v49, %v4178_v13  ;;  %v5376_v50 = vpop.f32.mrb[85].mxu1 }
 0xd39   :  { %v4256_v21 = vadd.f32 %v4255_v24, %v4106_v47 }
 0xd3b   :  { %4357 = vst [vmem:[%s7247_s18 + $0x2] sm:$0x3] %v4256_v21  ;;  %5410 = vmatmul.mubr.f32.vlgmr.msra.gmra.mrb[86].mxu1 %v4256_v21 }
 0xd3c   :  { %v4389_v31 = vpop.permute.xlu1 %4388 }
 0xe0e   :  { %v4346_v52 = vpop.f32.mrb[86].mxu1 }
 0xe0f   :  { %v4347_v51 = vadd.f32 %v4645_v41, %v4346_v52  ;;  %v5411_v5 = vpop.f32.mrb[87].mxu1 }
 0xe11   :  { %v4646_v62 = vmul.f32 -1.442695, %v4347_v51 }
 0xe13   :  { %5820 = vpow2.f32 %v4646_v62 }
 0xe1d   :  { %v5821_v58 = vpop.eup %5820 }
 0xe1e   :  { %v4353_v59 = vadd.f32 1.0, %v5821_v58 }
 0xe20   :  { %5822 = vrcp.f32 %v4353_v59 }
 0xe21   :  { %5824 = vpow2.f32 %v4607_v61 }
 0xe2a   :  { %v5823_v60 = vpop.eup %5822 }
 0xe2b   :  { %4392 = vrot.lane.b32.xlu1 %v5823_v60, %s5844_s30  ;;  %v5825_v14 = vpop.eup %5824 }
 0xe2c   :  { %v2791_v8 = vadd.f32 1.0, %v5825_v14 }
 0xe2e   :  { %5826 = vrcp.f32 %v2791_v8 }
 0xe38   :  { %v5827_v29 = vpop.eup %5826 }
 0xe39   :  { %v4396_v22 = vsel %vm4395_vm10, %v5827_v29, %v4385_v63 }
 0xe3a   :  { %v4398_v55 = vsel %vm4397_vm11, %v4396_v22, %v4389_v31 }
 0xe9d   :  { %v4393_v4 = vpop.permute.xlu1 %4392 }
 0xe9e   :  { %v4400_v3 = vsel %vm4399_vm12, %v4398_v55, %v4393_v4 }
 0xe9f   :  { %v4402_v43 = vsel %vm4401_vm13, %v4400_v3, 0.0 }
 0xea0   :  { %4403 = vst [vmem:[%s7247_s18 + $0x6] sm:$0x3] %v4402_v43 }

</bundles_post_ra>
